<compile_context>
chip_gen: v7x
topology: tpu7x:2x2x1
jax: 0.10.0
libtpu: 0.0.40
codegen_flags: <defaults>
</compile_context>

<pallas_src>
import functools

import jax
import jax.numpy as jnp
from jax import lax
from jax.experimental import pallas as pl
from jax.experimental.pallas import tpu as pltpu

EPS = 1e-5
LANE = 128


def _round_up(v, m):
    return (v + m - 1) // m * m


def _pad_to(a, shape):
    return jnp.pad(a, [(0, s - d) for d, s in zip(a.shape, shape)])


def _largest_divisor_leq(n, cap):
    cap = max(1, min(cap, n))
    for d in range(cap, 0, -1):
        if n % d == 0:
            return d
    return 1


def _bottleneck_kernel(RC, RC1,
                       xp_ref, w1_ref, s1_ref, b1_ref,
                       w2s_ref, s2_ref, b2_ref,
                       w3_ref, s3_ref, b3_ref,
                       out_ref, padc_ref):
    # xp_ref  : (1, H+2, W, Cp) cdt -- full image, zero row top/bottom, channels
    #                                  padded to Cp.  Block index depends only on
    #                                  n, so it stays resident across row steps.
    # w2s_ref : (3, 3*Wd, Wd) cdt   -- per-kh 3x3 weights stacked over kw (K-concat).
    # out_ref : (1, TH, W, Cp) f32  -- TH output rows per grid step.
    # padc_ref: (TH+2, W, 3*Wd) cdt -- bn1/relu activation in kw-concatenated
    #                                  layout: lanes [kw*Wd,(kw+1)*Wd) of column w
    #                                  hold the (zero-padded) activation at column
    #                                  w+kw-1 of the image.
    _, TH, W, Cp = out_ref.shape
    Wd = w1_ref.shape[1]
    KW = w2s_ref.shape[1]            # 3 * Wd
    TH2 = padc_ref.shape[0]          # TH + 2
    cdt = w1_ref.dtype               # MXU operand dtype (f32 or bf16)
    f32 = jnp.float32

    h = pl.program_id(1)
    r0 = pl.multiple_of(h * TH, TH)

    s1v = s1_ref[...]
    b1v = b1_ref[...]

    # ---- stage 1: conv1x1 + bn1 + relu over TH+2 halo rows, chunked, staged
    #      directly into the kw-concatenated scratch (shift folded into the
    #      store; every element of padc_ref is rewritten each step). ----------
    for c0 in range(0, TH2, RC1):
        rc = min(RC1, TH2 - c0)
        xh = xp_ref[0, pl.ds(r0 + c0, rc), :, :]              # (rc, W, Cp) cdt
        t1 = jnp.dot(xh.reshape(rc * W, Cp), w1_ref[...],
                     preferred_element_type=f32)
        t1 = jnp.maximum(t1 * s1v + b1v, 0.0)                 # f32 BN + relu
        a = t1.astype(cdt).reshape(rc, W, Wd)
        zc = jnp.zeros((rc, 1, Wd), cdt)
        # kw = 1 (center tap): columns line up 1:1.
        padc_ref[pl.ds(c0, rc), :, pl.ds(Wd, Wd)] = a
        # kw = 0 (left tap): shifted right by one column, zero at w = 0.
        padc_ref[pl.ds(c0, rc), pl.ds(1, W - 1), pl.ds(0, Wd)] = a[:, :W - 1, :]
        padc_ref[pl.ds(c0, rc), pl.ds(0, 1), pl.ds(0, Wd)] = zc
        # kw = 2 (right tap): shifted left by one column, zero at w = W-1.
        padc_ref[pl.ds(c0, rc), pl.ds(0, W - 1), pl.ds(2 * Wd, Wd)] = a[:, 1:, :]
        padc_ref[pl.ds(c0, rc), pl.ds(W - 1, 1), pl.ds(2 * Wd, Wd)] = zc

    # Zero the vertical halo rows at the image top/bottom: conv1 of the zero
    # pad rows is relu(b1), which must not leak into the 3x3 conv.
    zrow = jnp.zeros((1, W, KW), cdt)

    @pl.when(h == 0)
    def _():
        padc_ref[pl.ds(0, 1), :, :] = zrow

    @pl.when(h == pl.num_programs(1) - 1)
    def _():
        padc_ref[pl.ds(TH2 - 1, 1), :, :] = zrow

    s2v = s2_ref[...]
    b2v = b2_ref[...]
    s3v = s3_ref[...]
    b3v = b3_ref[...]

    # ---- stage 2: conv3x3 (3 K-concatenated taps) + bn2 + relu + conv1x1 +
    #      bn3 + residual + relu, M-chunked over output rows so the f32
    #      accumulator stays vreg-resident across the tap dots. ---------------
    M = RC * W
    for oc0 in range(0, TH, RC):
        p = padc_ref[pl.ds(oc0, RC), :, :].reshape(M, KW)          # aligned read
        acc = jnp.dot(p, w2s_ref[0], preferred_element_type=f32)   # init from tap
        p = padc_ref[pl.ds(oc0 + 1, RC), :, :].reshape(M, KW)
        acc = acc + jnp.dot(p, w2s_ref[1], preferred_element_type=f32)
        p = padc_ref[pl.ds(oc0 + 2, RC), :, :].reshape(M, KW)
        acc = acc + jnp.dot(p, w2s_ref[2], preferred_element_type=f32)

        t2 = jnp.maximum(acc * s2v + b2v, 0.0)                     # (M, Wd) f32
        t3 = jnp.dot(t2.astype(cdt), w3_ref[...],
                     preferred_element_type=f32)
        t3 = t3 * s3v + b3v                                        # (M, Cp) f32

        xres = xp_ref[0, pl.ds(r0 + 1 + oc0, RC), :, :].reshape(M, Cp).astype(f32)
        out = jnp.maximum(t3 + xres, 0.0)
        out_ref[0, pl.ds(oc0, RC), :, :] = out.reshape(RC, W, Cp).astype(out_ref.dtype)


def bottleneck_forward_nhwc(x_nhwc, params, *, compute_dtype=jnp.float32,
                            row_tile=16):
    """x_nhwc: (N, H, W, C) float32. Returns (N, H, W, C) float32.

    compute_dtype=jnp.bfloat16 uses bf16 MXU operands (fast path on v5e, v6e
    and v7x alike) with f32 accumulation and f32 BN/residual/relu math.
    """
    (w1, s1, b1, w2, s2, b2, w3, s3, b3) = params
    N, H, W, C = x_nhwc.shape
    width = w1.shape[1]
    assert w1.shape[0] == C and w3.shape[1] == C, (
        "residual add requires Cin == Cout (expansion=1, no downsample)")
    assert W >= 2

    f32 = jnp.float32
    cdt = jnp.dtype(compute_dtype)
    Cp = _round_up(C, LANE)          # lane-dense in/out channels
    Wd = _round_up(width, LANE)      # lane-dense bottleneck width
    KW = 3 * Wd

    # Row tiling: largest divisor of H <= row_tile (no silent TH = H fallback).
    TH = _largest_divisor_leq(H, row_tile)
    GH = H // TH
    TH2 = TH + 2

    # M-chunking: keep the conv3x3 f32 accumulator (~RC*W x Wd) around 64 KiB.
    m_rows = max(1, 16384 // Wd)
    rc_cap = max(1, m_rows // W)
    RC = _largest_divisor_leq(TH, rc_cap)   # output-row chunk (divides TH)
    RC1 = max(1, min(rc_cap, TH2))          # conv1 halo-row chunk (uneven tail ok)

    # One fused pad: +1 zero row top/bottom, channels zero-padded to Cp, cast
    # to the matmul-operand dtype.  Zero-padded channels stay exactly zero
    # through all three convs (weights / bn bias are zero-padded too).
    xp = jnp.pad(x_nhwc.astype(cdt), ((0, 0), (1, 1), (0, 0), (0, Cp - C)))

    w1p = _pad_to(w1, (Cp, Wd)).astype(cdt)
    # Per-kh 3x3 weights stacked over kw along the input-channel axis.
    w2s = _pad_to(w2, (3, 3, Wd, Wd)).reshape(3, KW, Wd).astype(cdt)
    w3p = _pad_to(w3, (Wd, Cp)).astype(cdt)
    s1p = _pad_to(s1.reshape(-1), (Wd,)).reshape(1, Wd).astype(f32)
    b1p = _pad_to(b1.reshape(-1), (Wd,)).reshape(1, Wd).astype(f32)
    s2p = _pad_to(s2.reshape(-1), (Wd,)).reshape(1, Wd).astype(f32)
    b2p = _pad_to(b2.reshape(-1), (Wd,)).reshape(1, Wd).astype(f32)
    s3p = _pad_to(s3.reshape(-1), (Cp,)).reshape(1, Cp).astype(f32)
    b3p = _pad_to(b3.reshape(-1), (Cp,)).reshape(1, Cp).astype(f32)

    # Explicit VMEM budget: double-buffered image + output blocks, params,
    # staging scratch, plus headroom for compiler spill scratch.
    itemsize = cdt.itemsize
    param_bytes = sum(int(a.size) * a.dtype.itemsize
                      for a in (w1p, w2s, w3p, s1p, b1p, s2p, b2p, s3p, b3p))
    vmem_needed = (2 * (H + 2) * W * Cp * itemsize
                   + 2 * TH * W * Cp * 4
                   + 2 * param_bytes
                   + TH2 * W * KW * itemsize)
    vmem_limit = int(min(max(vmem_needed + (16 << 20), 32 << 20), 120 << 20))

    full = lambda a: pl.BlockSpec(a.shape, lambda n, h: (0,) * a.ndim)

    out_p = pl.pallas_call(
        functools.partial(_bottleneck_kernel, RC, RC1),
        out_shape=jax.ShapeDtypeStruct((N, H, W, Cp), f32),
        grid_spec=pltpu.PrefetchScalarGridSpec(
            num_scalar_prefetch=0,
            grid=(N, GH),
            in_specs=[
                # full (row-padded) image: block index depends only on n, so it
                # is fetched once per image and stays resident across row steps.
                pl.BlockSpec((1, H + 2, W, Cp), lambda n, h: (n, 0, 0, 0)),
                full(w1p), full(s1p), full(b1p),
                full(w2s), full(s2p), full(b2p),
                full(w3p), full(s3p), full(b3p),
            ],
            out_specs=pl.BlockSpec((1, TH, W, Cp), lambda n, h: (n, h, 0, 0)),
            scratch_shapes=[pltpu.VMEM((TH2, W, KW), cdt)],
        ),
        compiler_params=pltpu.CompilerParams(
            dimension_semantics=("parallel", "parallel"),
            vmem_limit_bytes=vmem_limit),
    )(xp, w1p, s1p, b1p, w2s, s2p, b2p, w3p, s3p, b3p)

    return out_p[..., :C]


def bottleneck_forward(x_nchw, params, **kwargs):
    """x_nchw: (N, C, H, W) float32 — PyTorch layout. Returns NCHW."""
    x = jnp.transpose(x_nchw, (0, 2, 3, 1))                  # -> NHWC
    out = bottleneck_forward_nhwc(x, params, **kwargs)
    return jnp.transpose(out, (0, 3, 1, 2))                  # -> NCHW


def _fold_bn(gamma, beta, mean, var):
    scale = gamma / jnp.sqrt(var + EPS)
    bias = beta - mean * scale
    return scale[None, :], bias[None, :]                     # (1, C)


def _reference(x_nchw, raw):
    """Pure-JAX reference (no Pallas) for validation."""
    (w1, w2, w3,
     g1, be1, m1, v1, g2, be2, m2, v2, g3, be3, m3, v3) = raw
    x = jnp.transpose(x_nchw, (0, 2, 3, 1))
    bn = lambda y, g, b, m, v: g * (y - m) / jnp.sqrt(v + EPS) + b

    t = jnp.einsum('nhwc,co->nhwo', x, w1)
    t = jax.nn.relu(bn(t, g1, be1, m1, v1))
    t = lax.conv_general_dilated(t, w2, (1, 1), 'SAME',
                                 dimension_numbers=('NHWC', 'HWIO', 'NHWC'))
    t = jax.nn.relu(bn(t, g2, be2, m2, v2))
    t = jnp.einsum('nhwc,co->nhwo', t, w3)
    t = bn(t, g3, be3, m3, v3)
    out = jax.nn.relu(t + x)
    return jnp.transpose(out, (0, 3, 1, 2))


if __name__ == "__main__":
    # Small shapes: inplanes = planes = width = 8 (expansion=1, base_width=64,
    # groups=1), spatial 16x16, batch 2.
    N, C, H, W = 2, 8, 16, 16
    planes = C
    width = planes

    key = jax.random.PRNGKey(0)
    ks = jax.random.split(key, 16)

    w1 = jax.random.normal(ks[0], (C, width), jnp.float32) * 0.1            # 1x1 (in,out)
    w2 = jax.random.normal(ks[1], (3, 3, width, width), jnp.float32) * 0.1  # HWIO
    w3 = jax.random.normal(ks[2], (width, planes), jnp.float32) * 0.1

    def bn_params(k):
        ka, kb, kc, kd = jax.random.split(k, 4)
        gamma = 1.0 + 0.1 * jax.random.normal(ka, (width,), jnp.float32)
        beta = 0.1 * jax.random.normal(kb, (width,), jnp.float32)
        mean = 0.1 * jax.random.normal(kc, (width,), jnp.float32)
        var = 1.0 + 0.1 * jax.random.uniform(kd, (width,), jnp.float32)
        return gamma, beta, mean, var

    g1, be1, m1, v1 = bn_params(ks[3])
    g2, be2, m2, v2 = bn_params(ks[4])
    g3, be3, m3, v3 = bn_params(ks[5])

    s1, b1 = _fold_bn(g1, be1, m1, v1)
    s2, b2 = _fold_bn(g2, be2, m2, v2)
    s3, b3 = _fold_bn(g3, be3, m3, v3)

    x = jax.random.normal(ks[6], (N, C, H, W), jnp.float32)
    params = (w1, s1, b1, w2, s2, b2, w3, s3, b3)

    raw = (w1, w2, w3, g1, be1, m1, v1, g2, be2, m2, v2, g3, be3, m3, v3)
    ref = jax.block_until_ready(_reference(x, raw))

    # f32 MXU path (exact parity with the PyTorch module semantics).
    out_f32 = jax.block_until_ready(bottleneck_forward(x, params))
    assert out_f32.shape == (N, C, H, W)
    assert jnp.allclose(out_f32, ref, rtol=1e-3, atol=1e-3), \
        float(jnp.max(jnp.abs(out_f32 - ref)))

    # bf16 MXU-operand path (fast path on v5e/v6e/v7x): bf16 image slab,
    # bf16 staging scratch, bf16 matmul operands; f32 accumulation / BN /
    # residual / relu.  Looser tolerance reflects bf16 operand rounding.
    out_bf16 = jax.block_until_ready(
        bottleneck_forward(x, params, compute_dtype=jnp.bfloat16))
    assert out_bf16.shape == (N, C, H, W)
    assert jnp.allclose(out_bf16, ref, rtol=5e-2, atol=5e-2), \
        float(jnp.max(jnp.abs(out_bf16 - ref)))

    print("KERNEL_OK")
</pallas_src>

<mosaic_0001>
module attributes {stable_mosaic.version = 11 : i64} {
  func.func @_bottleneck_kernel(%arg0: i32, %arg1: i32, %arg2: memref<1x18x16x128xf32, #tpu.memory_space<vmem>>, %arg3: memref<128x128xf32, #tpu.memory_space<vmem>>, %arg4: memref<1x128xf32, #tpu.memory_space<vmem>>, %arg5: memref<1x128xf32, #tpu.memory_space<vmem>>, %arg6: memref<3x384x128xf32, #tpu.memory_space<vmem>>, %arg7: memref<1x128xf32, #tpu.memory_space<vmem>>, %arg8: memref<1x128xf32, #tpu.memory_space<vmem>>, %arg9: memref<128x128xf32, #tpu.memory_space<vmem>>, %arg10: memref<1x128xf32, #tpu.memory_space<vmem>>, %arg11: memref<1x128xf32, #tpu.memory_space<vmem>>, %arg12: memref<1x16x16x128xf32, #tpu.memory_space<vmem>>, %arg13: memref<18x16x384xf32, #tpu.memory_space<vmem>>) attributes {dimension_semantics = [#tpu.dimension_semantics<parallel>, #tpu.dimension_semantics<parallel>], iteration_bounds = array<i64: 2, 1>, scalar_prefetch = 0 : i64, scratch_operands = 1 : i64, tpu.core_type = #tpu.core_type<tc>, window_params = [{transform_indices = @transform_0, window_bounds = array<i64: 1, 18, 16, 128>}, {pipeline_mode = #tpu.pipeline_mode<synchronous>, transform_indices = @transform_1, window_bounds = array<i64: 128, 128>}, {pipeline_mode = #tpu.pipeline_mode<synchronous>, transform_indices = @transform_2, window_bounds = array<i64: 1, 128>}, {pipeline_mode = #tpu.pipeline_mode<synchronous>, transform_indices = @transform_3, window_bounds = array<i64: 1, 128>}, {pipeline_mode = #tpu.pipeline_mode<synchronous>, transform_indices = @transform_4, window_bounds = array<i64: 3, 384, 128>}, {pipeline_mode = #tpu.pipeline_mode<synchronous>, transform_indices = @transform_5, window_bounds = array<i64: 1, 128>}, {pipeline_mode = #tpu.pipeline_mode<synchronous>, transform_indices = @transform_6, window_bounds = array<i64: 1, 128>}, {pipeline_mode = #tpu.pipeline_mode<synchronous>, transform_indices = @transform_7, window_bounds = array<i64: 128, 128>}, {pipeline_mode = #tpu.pipeline_mode<synchronous>, transform_indices = @transform_8, window_bounds = array<i64: 1, 128>}, {pipeline_mode = #tpu.pipeline_mode<synchronous>, transform_indices = @transform_9, window_bounds = array<i64: 1, 128>}, {transform_indices = @transform_10, window_bounds = array<i64: 1, 16, 16, 128>}]} {
    %c16_i32 = arith.constant 16 : i32
    %0 = arith.muli %arg1, %c16_i32 : i32
    %1 = tpu.assume_multiple %0, 16 : i32
    %c0 = arith.constant 0 : index
    %c0_0 = arith.constant 0 : index
    %2 = vector.load %arg4[%c0, %c0_0] : memref<1x128xf32, #tpu.memory_space<vmem>>, vector<1x128xf32>
    %c0_1 = arith.constant 0 : index
    %c0_2 = arith.constant 0 : index
    %3 = vector.load %arg5[%c0_1, %c0_2] : memref<1x128xf32, #tpu.memory_space<vmem>>, vector<1x128xf32>
    %c0_i32 = arith.constant 0 : i32
    %4 = arith.addi %1, %c0_i32 : i32
    %c0_3 = arith.constant 0 : index
    %5 = arith.index_cast %4 : i32 to index
    %c0_4 = arith.constant 0 : index
    %c0_5 = arith.constant 0 : index
    %6 = vector.load %arg2[%c0_3, %5, %c0_4, %c0_5] : memref<1x18x16x128xf32, #tpu.memory_space<vmem>>, vector<1x8x16x128xf32>
    %7 = vector.shape_cast %6 : vector<1x8x16x128xf32> to vector<8x16x128xf32>
    %8 = vector.shape_cast %7 : vector<8x16x128xf32> to vector<128x128xf32>
    %c0_6 = arith.constant 0 : index
    %c0_7 = arith.constant 0 : index
    %9 = vector.load %arg3[%c0_6, %c0_7] : memref<128x128xf32, #tpu.memory_space<vmem>>, vector<128x128xf32>
    %cst = arith.constant dense<0.000000e+00> : vector<128x128xf32>
    %10 = tpu.matmul %8, %9, %cst {dimension_numbers = #tpu.dot_dimension_numbers<[1], [0], [0], [1], [0, 0, 1, 1], [], []>} : vector<128x128xf32>, vector<128x128xf32>, vector<128x128xf32> -> vector<128x128xf32>
    %11 = vector.broadcast %2 : vector<1x128xf32> to vector<128x128xf32>
    %12 = arith.mulf %10, %11 : vector<128x128xf32>
    %13 = vector.broadcast %3 : vector<1x128xf32> to vector<128x128xf32>
    %14 = arith.addf %12, %13 : vector<128x128xf32>
    %cst_8 = arith.constant 0.000000e+00 : f32
    %15 = vector.broadcast %cst_8 : f32 to vector<128x128xf32>
    %16 = arith.maximumf %14, %15 : vector<128x128xf32>
    %17 = vector.shape_cast %16 : vector<128x128xf32> to vector<8x16x128xf32>
    %cst_9 = arith.constant 0.000000e+00 : f32
    %18 = vector.broadcast %cst_9 : f32 to vector<8x1x128xf32>
    %c0_10 = arith.constant 0 : index
    %c0_11 = arith.constant 0 : index
    %c128 = arith.constant 128 : index
    %19 = vector.load %arg13[%c0_10, %c0_11, %c128] : memref<18x16x384xf32, #tpu.memory_space<vmem>>, vector<8x16x128xf32>
    tpu.vector_store %arg13[%c0_10, %c0_11, %c128], %17 {strides = array<i32>} : memref<18x16x384xf32, #tpu.memory_space<vmem>>, vector<8x16x128xf32>,
    %20 = vector.extract_strided_slice %17 {offsets = [0, 0, 0], sizes = [8, 15, 128], strides = [1, 1, 1]} : vector<8x16x128xf32> to vector<8x15x128xf32>
    %c0_12 = arith.constant 0 : index
    %c1 = arith.constant 1 : index
    %c0_13 = arith.constant 0 : index
    %21 = vector.load %arg13[%c0_12, %c1, %c0_13] : memref<18x16x384xf32, #tpu.memory_space<vmem>>, vector<8x15x128xf32>
    tpu.vector_store %arg13[%c0_12, %c1, %c0_13], %20 {strides = array<i32>} : memref<18x16x384xf32, #tpu.memory_space<vmem>>, vector<8x15x128xf32>,
    %c0_14 = arith.constant 0 : index
    %c0_15 = arith.constant 0 : index
    %c0_16 = arith.constant 0 : index
    %22 = vector.load %arg13[%c0_14, %c0_15, %c0_16] : memref<18x16x384xf32, #tpu.memory_space<vmem>>, vector<8x1x128xf32>
    tpu.vector_store %arg13[%c0_14, %c0_15, %c0_16], %18 {strides = array<i32>} : memref<18x16x384xf32, #tpu.memory_space<vmem>>, vector<8x1x128xf32>,
    %23 = vector.extract_strided_slice %17 {offsets = [0, 1, 0], sizes = [8, 15, 128], strides = [1, 1, 1]} : vector<8x16x128xf32> to vector<8x15x128xf32>
    %c0_17 = arith.constant 0 : index
    %c0_18 = arith.constant 0 : index
    %c256 = arith.constant 256 : index
    %24 = vector.load %arg13[%c0_17, %c0_18, %c256] : memref<18x16x384xf32, #tpu.memory_space<vmem>>, vector<8x15x128xf32>
    tpu.vector_store %arg13[%c0_17, %c0_18, %c256], %23 {strides = array<i32>} : memref<18x16x384xf32, #tpu.memory_space<vmem>>, vector<8x15x128xf32>,
    %c0_19 = arith.constant 0 : index
    %c15 = arith.constant 15 : index
    %c256_20 = arith.constant 256 : index
    %25 = vector.load %arg13[%c0_19, %c15, %c256_20] : memref<18x16x384xf32, #tpu.memory_space<vmem>>, vector<8x1x128xf32>
    tpu.vector_store %arg13[%c0_19, %c15, %c256_20], %18 {strides = array<i32>} : memref<18x16x384xf32, #tpu.memory_space<vmem>>, vector<8x1x128xf32>,
    %c8_i32 = arith.constant 8 : i32
    %26 = arith.addi %1, %c8_i32 : i32
    %c0_21 = arith.constant 0 : index
    %27 = arith.index_cast %26 : i32 to index
    %c0_22 = arith.constant 0 : index
    %c0_23 = arith.constant 0 : index
    %28 = vector.load %arg2[%c0_21, %27, %c0_22, %c0_23] : memref<1x18x16x128xf32, #tpu.memory_space<vmem>>, vector<1x8x16x128xf32>
    %29 = vector.shape_cast %28 : vector<1x8x16x128xf32> to vector<8x16x128xf32>
    %30 = vector.shape_cast %29 : vector<8x16x128xf32> to vector<128x128xf32>
    %c0_24 = arith.constant 0 : index
    %c0_25 = arith.constant 0 : index
    %31 = vector.load %arg3[%c0_24, %c0_25] : memref<128x128xf32, #tpu.memory_space<vmem>>, vector<128x128xf32>
    %cst_26 = arith.constant dense<0.000000e+00> : vector<128x128xf32>
    %32 = tpu.matmul %30, %31, %cst_26 {dimension_numbers = #tpu.dot_dimension_numbers<[1], [0], [0], [1], [0, 0, 1, 1], [], []>} : vector<128x128xf32>, vector<128x128xf32>, vector<128x128xf32> -> vector<128x128xf32>
    %33 = vector.broadcast %2 : vector<1x128xf32> to vector<128x128xf32>
    %34 = arith.mulf %32, %33 : vector<128x128xf32>
    %35 = vector.broadcast %3 : vector<1x128xf32> to vector<128x128xf32>
    %36 = arith.addf %34, %35 : vector<128x128xf32>
    %cst_27 = arith.constant 0.000000e+00 : f32
    %37 = vector.broadcast %cst_27 : f32 to vector<128x128xf32>
    %38 = arith.maximumf %36, %37 : vector<128x128xf32>
    %39 = vector.shape_cast %38 : vector<128x128xf32> to vector<8x16x128xf32>
    %cst_28 = arith.constant 0.000000e+00 : f32
    %40 = vector.broadcast %cst_28 : f32 to vector<8x1x128xf32>
    %c8 = arith.constant 8 : index
    %c0_29 = arith.constant 0 : index
    %c128_30 = arith.constant 128 : index
    %41 = vector.load %arg13[%c8, %c0_29, %c128_30] : memref<18x16x384xf32, #tpu.memory_space<vmem>>, vector<8x16x128xf32>
    tpu.vector_store %arg13[%c8, %c0_29, %c128_30], %39 {strides = array<i32>} : memref<18x16x384xf32, #tpu.memory_space<vmem>>, vector<8x16x128xf32>,
    %42 = vector.extract_strided_slice %39 {offsets = [0, 0, 0], sizes = [8, 15, 128], strides = [1, 1, 1]} : vector<8x16x128xf32> to vector<8x15x128xf32>
    %c8_31 = arith.constant 8 : index
    %c1_32 = arith.constant 1 : index
    %c0_33 = arith.constant 0 : index
    %43 = vector.load %arg13[%c8_31, %c1_32, %c0_33] : memref<18x16x384xf32, #tpu.memory_space<vmem>>, vector<8x15x128xf32>
    tpu.vector_store %arg13[%c8_31, %c1_32, %c0_33], %42 {strides = array<i32>} : memref<18x16x384xf32, #tpu.memory_space<vmem>>, vector<8x15x128xf32>,
    %c8_34 = arith.constant 8 : index
    %c0_35 = arith.constant 0 : index
    %c0_36 = arith.constant 0 : index
    %44 = vector.load %arg13[%c8_34, %c0_35, %c0_36] : memref<18x16x384xf32, #tpu.memory_space<vmem>>, vector<8x1x128xf32>
    tpu.vector_store %arg13[%c8_34, %c0_35, %c0_36], %40 {strides = array<i32>} : memref<18x16x384xf32, #tpu.memory_space<vmem>>, vector<8x1x128xf32>,
    %45 = vector.extract_strided_slice %39 {offsets = [0, 1, 0], sizes = [8, 15, 128], strides = [1, 1, 1]} : vector<8x16x128xf32> to vector<8x15x128xf32>
    %c8_37 = arith.constant 8 : index
    %c0_38 = arith.constant 0 : index
    %c256_39 = arith.constant 256 : index
    %46 = vector.load %arg13[%c8_37, %c0_38, %c256_39] : memref<18x16x384xf32, #tpu.memory_space<vmem>>, vector<8x15x128xf32>
    tpu.vector_store %arg13[%c8_37, %c0_38, %c256_39], %45 {strides = array<i32>} : memref<18x16x384xf32, #tpu.memory_space<vmem>>, vector<8x15x128xf32>,
    %c8_40 = arith.constant 8 : index
    %c15_41 = arith.constant 15 : index
    %c256_42 = arith.constant 256 : index
    %47 = vector.load %arg13[%c8_40, %c15_41, %c256_42] : memref<18x16x384xf32, #tpu.memory_space<vmem>>, vector<8x1x128xf32>
    tpu.vector_store %arg13[%c8_40, %c15_41, %c256_42], %40 {strides = array<i32>} : memref<18x16x384xf32, #tpu.memory_space<vmem>>, vector<8x1x128xf32>,
    %c16_i32_43 = arith.constant 16 : i32
    %48 = arith.addi %1, %c16_i32_43 : i32
    %c0_44 = arith.constant 0 : index
    %49 = arith.index_cast %48 : i32 to index
    %c0_45 = arith.constant 0 : index
    %c0_46 = arith.constant 0 : index
    %50 = vector.load %arg2[%c0_44, %49, %c0_45, %c0_46] : memref<1x18x16x128xf32, #tpu.memory_space<vmem>>, vector<1x2x16x128xf32>
    %51 = vector.shape_cast %50 : vector<1x2x16x128xf32> to vector<2x16x128xf32>
    %52 = vector.shape_cast %51 : vector<2x16x128xf32> to vector<32x128xf32>
    %c0_47 = arith.constant 0 : index
    %c0_48 = arith.constant 0 : index
    %53 = vector.load %arg3[%c0_47, %c0_48] : memref<128x128xf32, #tpu.memory_space<vmem>>, vector<128x128xf32>
    %cst_49 = arith.constant dense<0.000000e+00> : vector<32x128xf32>
    %54 = tpu.matmul %52, %53, %cst_49 {dimension_numbers = #tpu.dot_dimension_numbers<[1], [0], [0], [1], [0, 0, 1, 1], [], []>} : vector<32x128xf32>, vector<128x128xf32>, vector<32x128xf32> -> vector<32x128xf32>
    %55 = vector.broadcast %2 : vector<1x128xf32> to vector<32x128xf32>
    %56 = arith.mulf %54, %55 : vector<32x128xf32>
    %57 = vector.broadcast %3 : vector<1x128xf32> to vector<32x128xf32>
    %58 = arith.addf %56, %57 : vector<32x128xf32>
    %cst_50 = arith.constant 0.000000e+00 : f32
    %59 = vector.broadcast %cst_50 : f32 to vector<32x128xf32>
    %60 = arith.maximumf %58, %59 : vector<32x128xf32>
    %61 = vector.shape_cast %60 : vector<32x128xf32> to vector<2x16x128xf32>
    %cst_51 = arith.constant 0.000000e+00 : f32
    %62 = vector.broadcast %cst_51 : f32 to vector<2x1x128xf32>
    %c16 = arith.constant 16 : index
    %c0_52 = arith.constant 0 : index
    %c128_53 = arith.constant 128 : index
    %63 = vector.load %arg13[%c16, %c0_52, %c128_53] : memref<18x16x384xf32, #tpu.memory_space<vmem>>, vector<2x16x128xf32>
    tpu.vector_store %arg13[%c16, %c0_52, %c128_53], %61 {strides = array<i32>} : memref<18x16x384xf32, #tpu.memory_space<vmem>>, vector<2x16x128xf32>,
    %64 = vector.extract_strided_slice %61 {offsets = [0, 0, 0], sizes = [2, 15, 128], strides = [1, 1, 1]} : vector<2x16x128xf32> to vector<2x15x128xf32>
    %c16_54 = arith.constant 16 : index
    %c1_55 = arith.constant 1 : index
    %c0_56 = arith.constant 0 : index
    %65 = vector.load %arg13[%c16_54, %c1_55, %c0_56] : memref<18x16x384xf32, #tpu.memory_space<vmem>>, vector<2x15x128xf32>
    tpu.vector_store %arg13[%c16_54, %c1_55, %c0_56], %64 {strides = array<i32>} : memref<18x16x384xf32, #tpu.memory_space<vmem>>, vector<2x15x128xf32>,
    %c16_57 = arith.constant 16 : index
    %c0_58 = arith.constant 0 : index
    %c0_59 = arith.constant 0 : index
    %66 = vector.load %arg13[%c16_57, %c0_58, %c0_59] : memref<18x16x384xf32, #tpu.memory_space<vmem>>, vector<2x1x128xf32>
    tpu.vector_store %arg13[%c16_57, %c0_58, %c0_59], %62 {strides = array<i32>} : memref<18x16x384xf32, #tpu.memory_space<vmem>>, vector<2x1x128xf32>,
    %67 = vector.extract_strided_slice %61 {offsets = [0, 1, 0], sizes = [2, 15, 128], strides = [1, 1, 1]} : vector<2x16x128xf32> to vector<2x15x128xf32>
    %c16_60 = arith.constant 16 : index
    %c0_61 = arith.constant 0 : index
    %c256_62 = arith.constant 256 : index
    %68 = vector.load %arg13[%c16_60, %c0_61, %c256_62] : memref<18x16x384xf32, #tpu.memory_space<vmem>>, vector<2x15x128xf32>
    tpu.vector_store %arg13[%c16_60, %c0_61, %c256_62], %67 {strides = array<i32>} : memref<18x16x384xf32, #tpu.memory_space<vmem>>, vector<2x15x128xf32>,
    %c16_63 = arith.constant 16 : index
    %c15_64 = arith.constant 15 : index
    %c256_65 = arith.constant 256 : index
    %69 = vector.load %arg13[%c16_63, %c15_64, %c256_65] : memref<18x16x384xf32, #tpu.memory_space<vmem>>, vector<2x1x128xf32>
    tpu.vector_store %arg13[%c16_63, %c15_64, %c256_65], %62 {strides = array<i32>} : memref<18x16x384xf32, #tpu.memory_space<vmem>>, vector<2x1x128xf32>,
    %cst_66 = arith.constant 0.000000e+00 : f32
    %70 = vector.broadcast %cst_66 : f32 to vector<1x16x384xf32>
    %c0_i32_67 = arith.constant 0 : i32
    %71 = arith.cmpi eq, %arg1, %c0_i32_67 : i32
    %72 = arith.extui %71 : i1 to i32
    %c0_i32_68 = arith.constant 0 : i32
    %73 = arith.cmpi ne, %72, %c0_i32_68 : i32
    scf.if %73 {
      %c0_145 = arith.constant 0 : index
      %c0_146 = arith.constant 0 : index
      %c0_147 = arith.constant 0 : index
      %165 = vector.load %arg13[%c0_145, %c0_146, %c0_147] : memref<18x16x384xf32, #tpu.memory_space<vmem>>, vector<1x16x384xf32>
      tpu.vector_store %arg13[%c0_145, %c0_146, %c0_147], %70 {strides = array<i32>} : memref<18x16x384xf32, #tpu.memory_space<vmem>>, vector<1x16x384xf32>,
    } else {
    }
    %c0_i32_69 = arith.constant 0 : i32
    %74 = arith.cmpi eq, %arg1, %c0_i32_69 : i32
    %75 = arith.extui %74 : i1 to i32
    %c0_i32_70 = arith.constant 0 : i32
    %76 = arith.cmpi ne, %75, %c0_i32_70 : i32
    scf.if %76 {
      %c17 = arith.constant 17 : index
      %c0_145 = arith.constant 0 : index
      %c0_146 = arith.constant 0 : index
      %165 = vector.load %arg13[%c17, %c0_145, %c0_146] : memref<18x16x384xf32, #tpu.memory_space<vmem>>, vector<1x16x384xf32>
      tpu.vector_store %arg13[%c17, %c0_145, %c0_146], %70 {strides = array<i32>} : memref<18x16x384xf32, #tpu.memory_space<vmem>>, vector<1x16x384xf32>,
    } else {
    }
    %c0_71 = arith.constant 0 : index
    %c0_72 = arith.constant 0 : index
    %77 = vector.load %arg7[%c0_71, %c0_72] : memref<1x128xf32, #tpu.memory_space<vmem>>, vector<1x128xf32>
    %c0_73 = arith.constant 0 : index
    %c0_74 = arith.constant 0 : index
    %78 = vector.load %arg8[%c0_73, %c0_74] : memref<1x128xf32, #tpu.memory_space<vmem>>, vector<1x128xf32>
    %c0_75 = arith.constant 0 : index
    %c0_76 = arith.constant 0 : index
    %79 = vector.load %arg10[%c0_75, %c0_76] : memref<1x128xf32, #tpu.memory_space<vmem>>, vector<1x128xf32>
    %c0_77 = arith.constant 0 : index
    %c0_78 = arith.constant 0 : index
    %80 = vector.load %arg11[%c0_77, %c0_78] : memref<1x128xf32, #tpu.memory_space<vmem>>, vector<1x128xf32>
    %c0_79 = arith.constant 0 : index
    %c0_80 = arith.constant 0 : index
    %c0_81 = arith.constant 0 : index
    %81 = vector.load %arg13[%c0_79, %c0_80, %c0_81] : memref<18x16x384xf32, #tpu.memory_space<vmem>>, vector<8x16x384xf32>
    %82 = vector.shape_cast %81 : vector<8x16x384xf32> to vector<128x384xf32>
    %c0_82 = arith.constant 0 : index
    %c0_83 = arith.constant 0 : index
    %c0_84 = arith.constant 0 : index
    %83 = vector.load %arg6[%c0_82, %c0_83, %c0_84] : memref<3x384x128xf32, #tpu.memory_space<vmem>>, vector<1x384x128xf32>
    %84 = vector.shape_cast %83 : vector<1x384x128xf32> to vector<384x128xf32>
    %cst_85 = arith.constant dense<0.000000e+00> : vector<128x128xf32>
    %85 = tpu.matmul %82, %84, %cst_85 {dimension_numbers = #tpu.dot_dimension_numbers<[1], [0], [0], [1], [0, 0, 1, 1], [], []>} : vector<128x384xf32>, vector<384x128xf32>, vector<128x128xf32> -> vector<128x128xf32>
    %c1_86 = arith.constant 1 : index
    %c0_87 = arith.constant 0 : index
    %c0_88 = arith.constant 0 : index
    %86 = vector.load %arg13[%c1_86, %c0_87, %c0_88] : memref<18x16x384xf32, #tpu.memory_space<vmem>>, vector<8x16x384xf32>
    %87 = vector.shape_cast %86 : vector<8x16x384xf32> to vector<128x384xf32>
    %c1_89 = arith.constant 1 : index
    %c0_90 = arith.constant 0 : index
    %c0_91 = arith.constant 0 : index
    %88 = vector.load %arg6[%c1_89, %c0_90, %c0_91] : memref<3x384x128xf32, #tpu.memory_space<vmem>>, vector<1x384x128xf32>
    %89 = vector.shape_cast %88 : vector<1x384x128xf32> to vector<384x128xf32>
    %cst_92 = arith.constant dense<0.000000e+00> : vector<128x128xf32>
    %90 = tpu.matmul %87, %89, %cst_92 {dimension_numbers = #tpu.dot_dimension_numbers<[1], [0], [0], [1], [0, 0, 1, 1], [], []>} : vector<128x384xf32>, vector<384x128xf32>, vector<128x128xf32> -> vector<128x128xf32>
    %91 = arith.addf %85, %90 : vector<128x128xf32>
    %c2 = arith.constant 2 : index
    %c0_93 = arith.constant 0 : index
    %c0_94 = arith.constant 0 : index
    %92 = vector.load %arg13[%c2, %c0_93, %c0_94] : memref<18x16x384xf32, #tpu.memory_space<vmem>>, vector<8x16x384xf32>
    %93 = vector.shape_cast %92 : vector<8x16x384xf32> to vector<128x384xf32>
    %c2_95 = arith.constant 2 : index
    %c0_96 = arith.constant 0 : index
    %c0_97 = arith.constant 0 : index
    %94 = vector.load %arg6[%c2_95, %c0_96, %c0_97] : memref<3x384x128xf32, #tpu.memory_space<vmem>>, vector<1x384x128xf32>
    %95 = vector.shape_cast %94 : vector<1x384x128xf32> to vector<384x128xf32>
    %cst_98 = arith.constant dense<0.000000e+00> : vector<128x128xf32>
    %96 = tpu.matmul %93, %95, %cst_98 {dimension_numbers = #tpu.dot_dimension_numbers<[1], [0], [0], [1], [0, 0, 1, 1], [], []>} : vector<128x384xf32>, vector<384x128xf32>, vector<128x128xf32> -> vector<128x128xf32>
    %97 = arith.addf %91, %96 : vector<128x128xf32>
    %98 = vector.broadcast %77 : vector<1x128xf32> to vector<128x128xf32>
    %99 = arith.mulf %97, %98 : vector<128x128xf32>
    %100 = vector.broadcast %78 : vector<1x128xf32> to vector<128x128xf32>
    %101 = arith.addf %99, %100 : vector<128x128xf32>
    %cst_99 = arith.constant 0.000000e+00 : f32
    %102 = vector.broadcast %cst_99 : f32 to vector<128x128xf32>
    %103 = arith.maximumf %101, %102 : vector<128x128xf32>
    %c0_100 = arith.constant 0 : index
    %c0_101 = arith.constant 0 : index
    %104 = vector.load %arg9[%c0_100, %c0_101] : memref<128x128xf32, #tpu.memory_space<vmem>>, vector<128x128xf32>
    %cst_102 = arith.constant dense<0.000000e+00> : vector<128x128xf32>
    %105 = tpu.matmul %103, %104, %cst_102 {dimension_numbers = #tpu.dot_dimension_numbers<[1], [0], [0], [1], [0, 0, 1, 1], [], []>} : vector<128x128xf32>, vector<128x128xf32>, vector<128x128xf32> -> vector<128x128xf32>
    %106 = vector.broadcast %79 : vector<1x128xf32> to vector<128x128xf32>
    %107 = arith.mulf %105, %106 : vector<128x128xf32>
    %108 = vector.broadcast %80 : vector<1x128xf32> to vector<128x128xf32>
    %109 = arith.addf %107, %108 : vector<128x128xf32>
    %c1_i32 = arith.constant 1 : i32
    %110 = arith.addi %1, %c1_i32 : i32
    %c0_i32_103 = arith.constant 0 : i32
    %111 = arith.addi %110, %c0_i32_103 : i32
    %c0_104 = arith.constant 0 : index
    %112 = arith.index_cast %111 : i32 to index
    %c0_105 = arith.constant 0 : index
    %c0_106 = arith.constant 0 : index
    %113 = vector.load %arg2[%c0_104, %112, %c0_105, %c0_106] : memref<1x18x16x128xf32, #tpu.memory_space<vmem>>, vector<1x8x16x128xf32>
    %114 = vector.shape_cast %113 : vector<1x8x16x128xf32> to vector<8x16x128xf32>
    %115 = vector.shape_cast %114 : vector<8x16x128xf32> to vector<128x128xf32>
    %116 = arith.addf %109, %115 : vector<128x128xf32>
    %cst_107 = arith.constant 0.000000e+00 : f32
    %117 = vector.broadcast %cst_107 : f32 to vector<128x128xf32>
    %118 = arith.maximumf %116, %117 : vector<128x128xf32>
    %119 = vector.shape_cast %118 : vector<128x128xf32> to vector<8x16x128xf32>
    %c0_108 = arith.constant 0 : index
    %c0_109 = arith.constant 0 : index
    %c0_110 = arith.constant 0 : index
    %c0_111 = arith.constant 0 : index
    %120 = vector.load %arg12[%c0_108, %c0_109, %c0_110, %c0_111] : memref<1x16x16x128xf32, #tpu.memory_space<vmem>>, vector<1x8x16x128xf32>
    %121 = vector.shape_cast %120 : vector<1x8x16x128xf32> to vector<8x16x128xf32>
    %122 = vector.shape_cast %119 : vector<8x16x128xf32> to vector<1x8x16x128xf32>
    tpu.vector_store %arg12[%c0_108, %c0_109, %c0_110, %c0_111], %122 {strides = array<i32>} : memref<1x16x16x128xf32, #tpu.memory_space<vmem>>, vector<1x8x16x128xf32>,
    %c8_112 = arith.constant 8 : index
    %c0_113 = arith.constant 0 : index
    %c0_114 = arith.constant 0 : index
    %123 = vector.load %arg13[%c8_112, %c0_113, %c0_114] : memref<18x16x384xf32, #tpu.memory_space<vmem>>, vector<8x16x384xf32>
    %124 = vector.shape_cast %123 : vector<8x16x384xf32> to vector<128x384xf32>
    %c0_115 = arith.constant 0 : index
    %c0_116 = arith.constant 0 : index
    %c0_117 = arith.constant 0 : index
    %125 = vector.load %arg6[%c0_115, %c0_116, %c0_117] : memref<3x384x128xf32, #tpu.memory_space<vmem>>, vector<1x384x128xf32>
    %126 = vector.shape_cast %125 : vector<1x384x128xf32> to vector<384x128xf32>
    %cst_118 = arith.constant dense<0.000000e+00> : vector<128x128xf32>
    %127 = tpu.matmul %124, %126, %cst_118 {dimension_numbers = #tpu.dot_dimension_numbers<[1], [0], [0], [1], [0, 0, 1, 1], [], []>} : vector<128x384xf32>, vector<384x128xf32>, vector<128x128xf32> -> vector<128x128xf32>
    %c9 = arith.constant 9 : index
    %c0_119 = arith.constant 0 : index
    %c0_120 = arith.constant 0 : index
    %128 = vector.load %arg13[%c9, %c0_119, %c0_120] : memref<18x16x384xf32, #tpu.memory_space<vmem>>, vector<8x16x384xf32>
    %129 = vector.shape_cast %128 : vector<8x16x384xf32> to vector<128x384xf32>
    %c1_121 = arith.constant 1 : index
    %c0_122 = arith.constant 0 : index
    %c0_123 = arith.constant 0 : index
    %130 = vector.load %arg6[%c1_121, %c0_122, %c0_123] : memref<3x384x128xf32, #tpu.memory_space<vmem>>, vector<1x384x128xf32>
    %131 = vector.shape_cast %130 : vector<1x384x128xf32> to vector<384x128xf32>
    %cst_124 = arith.constant dense<0.000000e+00> : vector<128x128xf32>
    %132 = tpu.matmul %129, %131, %cst_124 {dimension_numbers = #tpu.dot_dimension_numbers<[1], [0], [0], [1], [0, 0, 1, 1], [], []>} : vector<128x384xf32>, vector<384x128xf32>, vector<128x128xf32> -> vector<128x128xf32>
    %133 = arith.addf %127, %132 : vector<128x128xf32>
    %c10 = arith.constant 10 : index
    %c0_125 = arith.constant 0 : index
    %c0_126 = arith.constant 0 : index
    %134 = vector.load %arg13[%c10, %c0_125, %c0_126] : memref<18x16x384xf32, #tpu.memory_space<vmem>>, vector<8x16x384xf32>
    %135 = vector.shape_cast %134 : vector<8x16x384xf32> to vector<128x384xf32>
    %c2_127 = arith.constant 2 : index
    %c0_128 = arith.constant 0 : index
    %c0_129 = arith.constant 0 : index
    %136 = vector.load %arg6[%c2_127, %c0_128, %c0_129] : memref<3x384x128xf32, #tpu.memory_space<vmem>>, vector<1x384x128xf32>
    %137 = vector.shape_cast %136 : vector<1x384x128xf32> to vector<384x128xf32>
    %cst_130 = arith.constant dense<0.000000e+00> : vector<128x128xf32>
    %138 = tpu.matmul %135, %137, %cst_130 {dimension_numbers = #tpu.dot_dimension_numbers<[1], [0], [0], [1], [0, 0, 1, 1], [], []>} : vector<128x384xf32>, vector<384x128xf32>, vector<128x128xf32> -> vector<128x128xf32>
    %139 = arith.addf %133, %138 : vector<128x128xf32>
    %140 = vector.broadcast %77 : vector<1x128xf32> to vector<128x128xf32>
    %141 = arith.mulf %139, %140 : vector<128x128xf32>
    %142 = vector.broadcast %78 : vector<1x128xf32> to vector<128x128xf32>
    %143 = arith.addf %141, %142 : vector<128x128xf32>
    %cst_131 = arith.constant 0.000000e+00 : f32
    %144 = vector.broadcast %cst_131 : f32 to vector<128x128xf32>
    %145 = arith.maximumf %143, %144 : vector<128x128xf32>
    %c0_132 = arith.constant 0 : index
    %c0_133 = arith.constant 0 : index
    %146 = vector.load %arg9[%c0_132, %c0_133] : memref<128x128xf32, #tpu.memory_space<vmem>>, vector<128x128xf32>
    %cst_134 = arith.constant dense<0.000000e+00> : vector<128x128xf32>
    %147 = tpu.matmul %145, %146, %cst_134 {dimension_numbers = #tpu.dot_dimension_numbers<[1], [0], [0], [1], [0, 0, 1, 1], [], []>} : vector<128x128xf32>, vector<128x128xf32>, vector<128x128xf32> -> vector<128x128xf32>
    %148 = vector.broadcast %79 : vector<1x128xf32> to vector<128x128xf32>
    %149 = arith.mulf %147, %148 : vector<128x128xf32>
    %150 = vector.broadcast %80 : vector<1x128xf32> to vector<128x128xf32>
    %151 = arith.addf %149, %150 : vector<128x128xf32>
    %c1_i32_135 = arith.constant 1 : i32
    %152 = arith.addi %1, %c1_i32_135 : i32
    %c8_i32_136 = arith.constant 8 : i32
    %153 = arith.addi %152, %c8_i32_136 : i32
    %c0_137 = arith.constant 0 : index
    %154 = arith.index_cast %153 : i32 to index
    %c0_138 = arith.constant 0 : index
    %c0_139 = arith.constant 0 : index
    %155 = vector.load %arg2[%c0_137, %154, %c0_138, %c0_139] : memref<1x18x16x128xf32, #tpu.memory_space<vmem>>, vector<1x8x16x128xf32>
    %156 = vector.shape_cast %155 : vector<1x8x16x128xf32> to vector<8x16x128xf32>
    %157 = vector.shape_cast %156 : vector<8x16x128xf32> to vector<128x128xf32>
    %158 = arith.addf %151, %157 : vector<128x128xf32>
    %cst_140 = arith.constant 0.000000e+00 : f32
    %159 = vector.broadcast %cst_140 : f32 to vector<128x128xf32>
    %160 = arith.maximumf %158, %159 : vector<128x128xf32>
    %161 = vector.shape_cast %160 : vector<128x128xf32> to vector<8x16x128xf32>
    %c0_141 = arith.constant 0 : index
    %c8_142 = arith.constant 8 : index
    %c0_143 = arith.constant 0 : index
    %c0_144 = arith.constant 0 : index
    %162 = vector.load %arg12[%c0_141, %c8_142, %c0_143, %c0_144] : memref<1x16x16x128xf32, #tpu.memory_space<vmem>>, vector<1x8x16x128xf32>
    %163 = vector.shape_cast %162 : vector<1x8x16x128xf32> to vector<8x16x128xf32>
    %164 = vector.shape_cast %161 : vector<8x16x128xf32> to vector<1x8x16x128xf32>
    tpu.vector_store %arg12[%c0_141, %c8_142, %c0_143, %c0_144], %164 {strides = array<i32>} : memref<1x16x16x128xf32, #tpu.memory_space<vmem>>, vector<1x8x16x128xf32>,
    return
  }
  func.func @transform_0(%arg0: i32, %arg1: i32) -> (i32, i32, i32, i32) {
    %c0_i32 = arith.constant 0 : i32
    %c0_i32_0 = arith.constant 0 : i32
    %c0_i32_1 = arith.constant 0 : i32
    %c0_i32_2 = arith.constant 0 : i32
    return %arg0, %c0_i32, %c0_i32_0, %c0_i32_1 : i32, i32, i32, i32
  }
  func.func @transform_1(%arg0: i32, %arg1: i32) -> (i32, i32) {
    %c0_i32 = arith.constant 0 : i32
    %c0_i32_0 = arith.constant 0 : i32
    %c0_i32_1 = arith.constant 0 : i32
    return %c0_i32, %c0_i32_0 : i32, i32
  }
  func.func @transform_2(%arg0: i32, %arg1: i32) -> (i32, i32) {
    %c0_i32 = arith.constant 0 : i32
    %c0_i32_0 = arith.constant 0 : i32
    %c0_i32_1 = arith.constant 0 : i32
    return %c0_i32, %c0_i32_0 : i32, i32
  }
  func.func @transform_3(%arg0: i32, %arg1: i32) -> (i32, i32) {
    %c0_i32 = arith.constant 0 : i32
    %c0_i32_0 = arith.constant 0 : i32
    %c0_i32_1 = arith.constant 0 : i32
    return %c0_i32, %c0_i32_0 : i32, i32
  }
  func.func @transform_4(%arg0: i32, %arg1: i32) -> (i32, i32, i32) {
    %c0_i32 = arith.constant 0 : i32
    %c0_i32_0 = arith.constant 0 : i32
    %c0_i32_1 = arith.constant 0 : i32
    %c0_i32_2 = arith.constant 0 : i32
    return %c0_i32, %c0_i32_0, %c0_i32_1 : i32, i32, i32
  }
  func.func @transform_5(%arg0: i32, %arg1: i32) -> (i32, i32) {
    %c0_i32 = arith.constant 0 : i32
    %c0_i32_0 = arith.constant 0 : i32
    %c0_i32_1 = arith.constant 0 : i32
    return %c0_i32, %c0_i32_0 : i32, i32
  }
  func.func @transform_6(%arg0: i32, %arg1: i32) -> (i32, i32) {
    %c0_i32 = arith.constant 0 : i32
    %c0_i32_0 = arith.constant 0 : i32
    %c0_i32_1 = arith.constant 0 : i32
    return %c0_i32, %c0_i32_0 : i32, i32
  }
  func.func @transform_7(%arg0: i32, %arg1: i32) -> (i32, i32) {
    %c0_i32 = arith.constant 0 : i32
    %c0_i32_0 = arith.constant 0 : i32
    %c0_i32_1 = arith.constant 0 : i32
    return %c0_i32, %c0_i32_0 : i32, i32
  }
  func.func @transform_8(%arg0: i32, %arg1: i32) -> (i32, i32) {
    %c0_i32 = arith.constant 0 : i32
    %c0_i32_0 = arith.constant 0 : i32
    %c0_i32_1 = arith.constant 0 : i32
    return %c0_i32, %c0_i32_0 : i32, i32
  }
  func.func @transform_9(%arg0: i32, %arg1: i32) -> (i32, i32) {
    %c0_i32 = arith.constant 0 : i32
    %c0_i32_0 = arith.constant 0 : i32
    %c0_i32_1 = arith.constant 0 : i32
    return %c0_i32, %c0_i32_0 : i32, i32
  }
  func.func @transform_10(%arg0: i32, %arg1: i32) -> (i32, i32, i32, i32) {
    %c0_i32 = arith.constant 0 : i32
    %c0_i32_0 = arith.constant 0 : i32
    %c0_i32_1 = arith.constant 0 : i32
    return %arg0, %arg1, %c0_i32, %c0_i32_0 : i32, i32, i32, i32
  }
}

</mosaic_0001>

<bundles_post_ra>
// kernel: tpu_custom_call.1
= control target key start
LH: loop header
LB: loop body
LE: loop exit
PB: predicated region body
PF: predicated region fallthrough
CT: control target
= control target key end

     0   :  { %s8751_s0 = inlined_call_operand.hbm [shape: f32[2,18,16,128], index: 0, kind: input, shape index: {}]   ;;  %s8752_s1 = inlined_call_operand.hbm [shape: f32[128,128], index: 1, kind: input, shape index: {}]   ;;  %s8753_s2 = inlined_call_operand.vmem [shape: f32[1,128], index: 2, kind: input, shape index: {}]   ;;  %s8754_s3 = inlined_call_operand.vmem [shape: f32[1,128], index: 3, kind: input, shape index: {}]   ;;  %s8755_s4 = inlined_call_operand.hbm [shape: f32[3,384,128], index: 4, kind: input, shape index: {}]   ;;  %s8756_s5 = inlined_call_operand.vmem [shape: f32[1,128], index: 5, kind: input, shape index: {}]   ;;  %s8757_s6 = inlined_call_operand.vmem [shape: f32[1,128], index: 6, kind: input, shape index: {}]   ;;  %s8758_s7 = inlined_call_operand.hbm [shape: f32[128,128], index: 7, kind: input, shape index: {}]   ;;  %s8759_s8 = inlined_call_operand.vmem [shape: f32[1,128], index: 8, kind: input, shape index: {}]   ;;  %s8760_s9 = inlined_call_operand.vmem [shape: f32[1,128], index: 9, kind: input, shape index: {}]   ;;  %s8761_s10 = inlined_call_operand.hbm [shape: f32[2,16,16,128], index: 10, kind: output, shape index: {}]  }
   0x1   :  { %8772 = sst [smem:[#allocation20_spill]] %s8757_s6 }
   0x2   :  { %8773 = sst [smem:[#allocation21_spill]] %s8759_s8 }
   0x3   :  { %8774 = sst [smem:[#allocation22_spill]] %s8760_s9 }
   0x4   :  { %8775 = sst [smem:[#allocation23_spill]] %s8761_s10 }
   0x5   :  { %15 = vsyncpa [#allocation4], 0 }
   0x6   :  { %17 = vsyncpa [#allocation4 + $0x1], 0 }
   0x7   :  { %18 = vsyncpa [#allocation7], 0 }
   0x8   :  { %19 = vsyncpa [#allocation10], 0 }
   0x9   :  { %20 = vsyncpa [#allocation5], 0 }
   0xa   :  { %22 = vsyncpa [#allocation5 + $0x1], 0  ;;  %s7176_s13 = smov 0   ;;  %s7178_s14 = smov 0  }
   0xb   :  { %s7180_s15 = smov 0   ;;  %s7182_s16 = smov 0  }
   0xc   :  { %s7184_s17 = smov 0   ;;  %s7186_s18 = smov 0  }
   0xd LB: > { %8776 = sst [smem:[#allocation16_spill]] %s7089_s13  ;;  %s4555_s19 = sadd.s32 4294967295, %s7109_s18   ;;  %s7109_s18 = sphi %s7186_s18, %s28_s18   ;;  %s7105_s17 = sphi %s7184_s17, %s8808_s17   ;;  %s7101_s16 = sphi %s7182_s16, %s8807_s16   ;;  %s7097_s15 = sphi %s7180_s15, %s8806_s15   ;;  %s7093_s14 = sphi %s7178_s14, %s8805_s14   ;;  %s7089_s13 = sphi %s7176_s13, %s8804_s13  }
   0xe   : > { %8777 = sst [smem:[#allocation17_spill]] %s7101_s16  ;;  %s4556_s20 = sadd.s32 4294967294, %s7109_s18  }
   0xf   : > { %p60_p0 = scmp.ne.s32.totalorder %s7093_s14, %s7089_s13  ;;  %p7210_p1 = scmp.eq.s32.totalorder %s4555_s19, 0 }
  0x10   : > { %p7214_p2 = scmp.eq.s32.totalorder %s4555_s19, 1  ;;  %p281_p3 = scmp.eq.s32.totalorder %s4556_s20, 1 }
  0x11   : > { %s8778_s21 = scalar_select %p7210_p1, 1, 0 }
  0x12   : > { %s8779_s22 = scalar_select %p7214_p2, 1, 0 }
  0x13   : > { %p7220_p4 = por %p7210_p1, %p60_p0  ;;  %p4557_p5 = scmp.ge.s32.totalorder %s7109_s18, 1 }
  0x14   : > { %p7225_p6 = por %p281_p3, %p60_p0  ;;  %p288_p7 = scmp.lt.s32.totalorder %s7109_s18, 3 }
  0x15   : > { %s8780_s23 = scalar_select %p7220_p4, 1, 0 }
  0x16   : > { %s8781_s24 = scalar_select %p7225_p6, 1, 0 }
  0x17   : > { %p7230_p8 = pnand %p4557_p5, %p288_p7  ;;  %s7111_s26 = smov [#allocation6]  }
  0x18   : > { %8782 = sst [smem:[#allocation18_spill]] %s8781_s24  ;;  %s300_s27 = sshll.u32 %s7111_s26, 4  ;;  %s7234_s27 = int_to_ptr.vmem [resolvable:$true] %s300_s27 }
  0x19   : > { %s8783_s25 = scalar_select %p7230_p8, 1, 0 }
  0x1a   : > { %p6789_p9 = pneg %p7230_p8  ;;  %s7112_s29 = smov [#allocation8]  }
  0x1b   : > { %s319_s30 = sshll.u32 %s7112_s29, 4  ;;  %s7113_s11 = smov [#allocation9]   ;;  %s7245_s30 = int_to_ptr.vmem [resolvable:$true] %s319_s30 }
  0x1c   : > { %p7241_p11 = pnand %p6789_p9, %p7210_p1  ;;  %s7247_s12 = sshll.u32 %s7113_s11, 4  ;;  %s339_s12 = int_to_ptr.vmem [resolvable:$true] %s7247_s12 }
  0x1d   : > { %s6905_s26 = scalar_lea.hbm %s8752_s1, 2048 }
  0x1e   : > { %p6906_p12 = scmp.ne.s32.totalorder %s8752_s1, %s6905_s26  ;;  %p7257_p13 = pneg %p7241_p11 }
  0x1f   : > { %p6912_p5 = scmp.lt.u32.totalorder %s6905_s26, %s8752_s1 }
  0x20   : > { %p6908_p0 = pnand %p7257_p13, %p6906_p12 }
  0x22   : > { %p6909_p3 = pneg %p6908_p0 }
  0x24   : > { %p6914_p7 = pnand %p6912_p5, %p6909_p3 }
  0x26   : > { %6917 = shalt.err (!%p6914_p7)
}
  0x27   : > { %s6918_s13 = scalar_lea.vmem %s7234_s27, 2048  ;;  %p6926_p1 = scmp.lt.s32.totalorder %s7234_s27, %s7234_s27 }
  0x28   : > { %p6919_p9 = scmp.ne.s32.totalorder %s7234_s27, %s6918_s13  ;;  %p6927_p4 = scmp.lt.s32.totalorder %s6918_s13, %s6918_s13 }
  0x2a   : > { %p6921_p10 = pnand %p6919_p9, %p7257_p13  ;;  %p6928_p12 = por %p6927_p4, %p6926_p1 }
  0x2c   : > { %p6922_p6 = pneg %p6921_p10 }
  0x2e   : > { %p6929_p0 = pnand %p6928_p12, %p6922_p6 }
  0x30   : > { %6932 = shalt.err (!%p6929_p0)
}
  0x31   : > { %s8770_s24 = smov 128   ;;  %s7115_s19 = smov 8  }
  0x32   : > { %6792 = dma.hbm_to_vmem [thread:$0]  (!%p7241_p11), %s8752_s1, 2048, %s7234_s27, [#allocation7], %s8770_s24, %s8770_s24, %s7115_s19  }
  0x33   : > { %s6933_s13 = scalar_lea.hbm %s8755_s4, 18432 }
  0x34   : > { %p6934_p1 = scmp.ne.s32.totalorder %s8755_s4, %s6933_s13  ;;  %p6940_p10 = scmp.lt.u32.totalorder %s6933_s13, %s8755_s4 }
  0x36   : > { %p6936_p4 = pnand %p6934_p1, %p7257_p13 }
  0x38   : > { %p6937_p6 = pneg %p6936_p4 }
  0x3a   : > { %p6942_p3 = pnand %p6940_p10, %p6937_p6 }
  0x3c   : > { %6945 = shalt.err (!%p6942_p3)
}
  0x3d   : > { %s6946_s27 = scalar_lea.vmem %s7245_s30, 18432  ;;  %p6954_p12 = scmp.lt.s32.totalorder %s7245_s30, %s7245_s30 }
  0x3e   : > { %p6947_p5 = scmp.ne.s32.totalorder %s7245_s30, %s6946_s27  ;;  %p6955_p0 = scmp.lt.s32.totalorder %s6946_s27, %s6946_s27 }
  0x40   : > { %p6949_p7 = pnand %p6947_p5, %p7257_p13  ;;  %p6956_p1 = por %p6955_p0, %p6954_p12 }
  0x42   : > { %p6950_p9 = pneg %p6949_p7 }
  0x44   : > { %p6957_p4 = pnand %p6956_p1, %p6950_p9 }
  0x46   : > { %6960 = shalt.err (!%p6957_p4)
}
  0x47   : > { %6795 = dma.hbm_to_vmem [thread:$0]  (!%p7241_p11), %s8755_s4, 18432, %s7245_s30, [#allocation7], %s8770_s24, %s8770_s24, %s7115_s19  }
  0x48   : > { %s6961_s20 = scalar_lea.hbm %s8758_s7, 2048 }
  0x49   : > { %p6962_p6 = scmp.ne.s32.totalorder %s8758_s7, %s6961_s20  ;;  %p6968_p5 = scmp.lt.u32.totalorder %s6961_s20, %s8758_s7 }
  0x4b   : > { %p6964_p10 = pnand %p6962_p6, %p7257_p13 }
  0x4d   : > { %p6965_p3 = pneg %p6964_p10 }
  0x4f   : > { %p6970_p7 = pnand %p6968_p5, %p6965_p3 }
  0x51   : > { %6973 = shalt.err (!%p6970_p7)
}
  0x52   : > { %s6974_s27 = scalar_lea.vmem %s339_s12, 2048  ;;  %p6982_p1 = scmp.lt.s32.totalorder %s339_s12, %s339_s12 }
  0x53   : > { %p6975_p9 = scmp.ne.s32.totalorder %s339_s12, %s6974_s27  ;;  %p6983_p4 = scmp.lt.s32.totalorder %s6974_s27, %s6974_s27 }
  0x55   : > { %p6977_p12 = pnand %p6975_p9, %p7257_p13  ;;  %p6984_p8 = por %p6983_p4, %p6982_p1 }
  0x57   : > { %p6978_p0 = pneg %p6977_p12 }
  0x59   : > { %p6985_p2 = pnand %p6984_p8, %p6978_p0 }
  0x5b   : > { %6988 = shalt.err (!%p6985_p2)
}
  0x5c   : > { %6798 = dma.hbm_to_vmem [thread:$0]  (!%p7241_p11), %s8758_s7, 2048, %s339_s12, [#allocation10], %s8770_s24, %s8770_s24, %s7115_s19  }
  0x5d   : > { %s47_s10 = sadd.s32 1, %s7097_s15  ;;  %s40_s28 = sadd.s32 1, %s7105_s17 }
  0x5e   : > { %p54_p2 = scmp.ne.s32.totalorder %s7097_s15, %s7093_s14  ;;  %p42_p8 = scmp.ge.s32.totalorder %s40_s28, 2 }
  0x5f   : > { %p55_p13 = scmp.eq.s32.totalorder %s7109_s18, 0  ;;  %p8786_p6 = scmp.ne.s32.totalorder %s8779_s22, 0 }
  0x60   : > { %p6810_p3 = scmp.lt.s32.totalorder %s7109_s18, 2  ;;  %s8810_s28 = smov (%p42_p8, %s40_s28), 0 }
  0x61   : > { %p7336_p10 = por %p8786_p6, %p54_p2  ;;  %p56_p5 = por %p55_p13, %p54_p2 }
  0x62   : > { %s358_s9 = sand.u32 1, %s7097_s15   ;;  %s44_s16 = ssub.s32 %s7105_s17, %s8810_s28 }
  0x63   : > { %p45_p7 = scmp.eq.s32.totalorder %s44_s16, 0  ;;  %s6770_s12 = smul.u32 288, %s358_s9 }
  0x64   : > { %s6771_s20 = smul.u32 4608, %s7105_s17  ;;  %p7347_p11 = pnand %p6810_p3, %p56_p5 }
  0x65   : > { %s7352_s22 = scalar_select %p45_p7, %s7097_s15, %s47_s10  }
  0x66   : > { %s7357_s13 = scalar_lea.hbm %s8751_s0, %s6771_s20  ;;  %s362_s27 = scalar_lea.vmem [#allocation3], %s6770_s12 }
  0x67   : > { %s369_s30 = sshll.u32 %s362_s27, 4  ;;  %s7361_s6 = scalar_lea.sflag [#allocation4], %s358_s9  ;;  %s7359_s30 = int_to_ptr.vmem [resolvable:$true] %s369_s30 }
  0x68   : > { %s6989_s16 = scalar_lea.hbm %s7357_s13, 4608  ;;  %p6991_p12 = pneg %p7347_p11 }
  0x69   : > { %p6990_p9 = scmp.ne.s32.totalorder %s7357_s13, %s6989_s16  ;;  %s6994_s29 = scalar_lea.hbm %s8751_s0, 9216 }
  0x6a   : > { %p6995_p4 = scmp.lt.u32.totalorder %s7357_s13, %s8751_s0  ;;  %p6996_p2 = scmp.lt.u32.totalorder %s6994_s29, %s6989_s16 }
  0x6b   : > { %p6992_p0 = pnand %p6991_p12, %p6990_p9  ;;  %p6998_p13 = scmp.lt.u32.totalorder %s6989_s16, %s7357_s13 }
  0x6c   : > { %p6997_p8 = por %p6996_p2, %p6995_p4 }
  0x6d   : > { %p6993_p1 = pneg %p6992_p0 }
  0x6e   : > { %p6999_p6 = por %p6998_p13, %p6997_p8 }
  0x70   : > { %p7000_p3 = pnand %p6999_p6, %p6993_p1 }
  0x72   : > { %7003 = shalt.err (!%p7000_p3)
}
  0x73   : > { %s7004_s9 = scalar_lea.vmem %s7359_s30, 4608  ;;  %s7116_s12 = smov [#allocation3]  }
  0x74   : > { %p7005_p5 = scmp.ne.s32.totalorder %s7359_s30, %s7004_s9  ;;  %s7009_s27 = sshll.u32 %s7116_s12, 4  ;;  %s7010_s27 = int_to_ptr.vmem [resolvable:$false] %s7009_s27 }
  0x75   : > { %s7011_s24 = scalar_lea.vmem %s7010_s27, 9216  ;;  %p7012_p0 = scmp.lt.s32.totalorder %s7359_s30, %s7010_s27 }
  0x76   : > { %p7007_p7 = pnand %p7005_p5, %p6991_p12  ;;  %p7013_p4 = scmp.lt.s32.totalorder %s7011_s24, %s7004_s9 }
  0x78   : > { %p7008_p9 = pneg %p7007_p7  ;;  %p7014_p2 = por %p7013_p4, %p7012_p0 }
  0x7a   : > { %p7015_p8 = pnand %p7014_p2, %p7008_p9 }
  0x7c   : > { %7018 = shalt.err (!%p7015_p8)
}
  0x7d   : > { %s8789_s16 = smov 128   ;;  %p8790_p12 = scmp.ne.s32.totalorder %s8783_s25, 0 }
  0x7e   : > { %6802 = dma.hbm_to_vmem [thread:$0]  (!%p7347_p11), %s7357_s13, 4608, %s7359_s30, %s7361_s6, %s8789_s16, %s8789_s16, %s7115_s19  }
  0x7f   : > { %381 = sbr.rel (%p8790_p12) target bundleno = 1379 (0x563), region = 60 }
  0x86   : > { %s7395_s10 = sand.u32 1, %s7093_s14   ;;  %p8791_p1 = scmp.ne.s32.totalorder %s8780_s23, 0 }
  0x87   : > { %s6772_s20 = smul.u32 288, %s7395_s10  ;;  %s384_s29 = scalar_lea.sflag [#allocation4], %s7395_s10 }
  0x89   : > { %s7399_s11 = scalar_lea.vmem [#allocation3], %s6772_s20 }
  0x8a   : > { %7072 = dma.done.wait (%p8791_p1), %s384_s29, 4608  }
  0x8b   : > { %7074 = vsyncadd (%p8791_p1), %s384_s29, 4294962688  ;;  %p8792_p11 = scmp.ne.s32.totalorder %s8778_s21, 0 }
  0x8d   : > { %7076 = dma.done.wait (%p8792_p11), [#allocation7], 20480  }
  0x8e   : > { %7078 = vsyncadd (%p8792_p11), [#allocation7], 4294946816 }
  0x8f   : > { %7080 = dma.done.wait (%p8792_p11), [#allocation10], 2048  }
  0x90   : > { %7082 = vsyncadd (%p8792_p11), [#allocation10], 4294965248  ;;  %v458_v0 = vld [vmem:[#allocation6] sm:$0xff]  ;;  %v459_v1 = vld [vmem:[#allocation6 + $0x8] sm:$0xff]  ;;  %vm711_vm0 = vcmask 1040384   ;;  %vm776_vm1 = vcmask 1046528  }
  0x91   : > { %v460_v2 = vld [vmem:[#allocation6 + $0x10] sm:$0xff]  ;;  %v7413_v3 = vpack.c.bf16 %v459_v1, %v458_v0  ;;  %v461_v4 = vld [vmem:[#allocation6 + $0x18] sm:$0xff]  ;;  %v462_v6 = vld [vmem:[#allocation6 + $0x20] sm:$0xff]  ;;  %s8795_s27 = sld [smem:[#allocation20_spill]]  ;;  %s8796_s20 = sld [smem:[#allocation21_spill]] }
  0x92   : > { %v7415_v5 = vpack.c.bf16 %v461_v4, %v460_v2  ;;  %v463_v7 = vld [vmem:[#allocation6 + $0x28] sm:$0xff]  ;;  %v442_v9 = vld [vmem:[%s7399_s11] sm:$0xff]  ;;  %v464_v10 = vld [vmem:[#allocation6 + $0x30] sm:$0xff]  ;;  %s8797_s23 = sld [smem:[#allocation22_spill]]  ;;  %s4567_s25 = sshll.u32 %s7395_s10, 8 }
  0x93   : > { %6067 = vmatprep.subr.bf16.mxu0 %v7413_v3  ;;  %6099 = vmatprep.subr.bf16.mxu1 %v7413_v3  ;;  %v7422_v8 = vpack.c.bf16 %v463_v7, %v462_v6  ;;  %v465_v11 = vld [vmem:[#allocation6 + $0x38] sm:$0xff]  ;;  %v466_v13 = vld [vmem:[#allocation6 + $0x40] sm:$0xff]  ;;  %v467_v14 = vld [vmem:[#allocation6 + $0x48] sm:$0xff]  ;;  %s8455_s19 = scalar_lea.vmem [#allocation11], %s4567_s25  ;;  %s8798_s9 = sld [smem:[#allocation17_spill]] }
  0x94   : > { %6069 = vmatpush3.bf16.msra.mxu0 %v7413_v3  ;;  %6101 = vmatpush3.bf16.msra.mxu1 %v7413_v3  ;;  %v7429_v12 = vpack.c.bf16 %v465_v11, %v464_v10  ;;  %v4570_v15 = vld [vmem:[%s7399_s11 + $0x80] sm:$0xff]  ;;  %v7436_v16 = vpack.c.bf16 %v467_v14, %v466_v13  ;;  %v468_v17 = vld [vmem:[#allocation6 + $0x50] sm:$0xff]  ;;  %v469_v18 = vld [vmem:[#allocation6 + $0x58] sm:$0xff]  ;;  %s4424_s24 = sshll.u32 %s8455_s19, 4  ;;  %s8799_s29 = sld [smem:[#allocation23_spill]]  ;;  %s8700_s24 = int_to_ptr.vmem [resolvable:$true] %s4424_s24 }
  0x95   : > { %6071 = vmatprep.subr.bf16.mxu0 %v7415_v5  ;;  %6103 = vmatprep.subr.bf16.mxu1 %v7415_v5  ;;  %v7442_v19 = vpack.c.bf16 %v469_v18, %v468_v17  ;;  %v470_v20 = vld [vmem:[#allocation6 + $0x60] sm:$0xff]  ;;  %v471_v21 = vld [vmem:[#allocation6 + $0x68] sm:$0xff]  ;;  %v472_v23 = vld [vmem:[#allocation6 + $0x70] sm:$0xff]  ;;  %s7118_s25 = smov [#allocation11]  }
  0x96   : > { %5500 = vmatprep.mubr.f32.mxu0 %v442_v9  ;;  %5556 = vmatprep.mubr.f32.mxu1 %v4570_v15  ;;  %v7448_v22 = vpack.c.bf16 %v471_v21, %v470_v20  ;;  %v473_v24 = vld [vmem:[#allocation6 + $0x78] sm:$0xff]  ;;  %v1574_v26 = vld [vmem:[#allocation8 + $0x200] sm:$0xff]  ;;  %v1575_v27 = vld [vmem:[#allocation8 + $0x208] sm:$0xff]  ;;  %s7023_s26 = sshll.u32 %s7118_s25, 4  ;;  %s7024_s26 = int_to_ptr.vmem [resolvable:$false] %s7023_s26 }
  0x97   : > { %v7454_v25 = vpack.c.bf16 %v473_v24, %v472_v23  ;;  %v6162_v28 = vpack.c.bf16 %v1575_v27, %v1574_v26  ;;  %v1558_v29 = vld [vmem:[#allocation8 + $0x180] sm:$0xff]  ;;  %v1559_v30 = vld [vmem:[#allocation8 + $0x188] sm:$0xff]  ;;  %v1576_v31 = vld [vmem:[#allocation8 + $0x210] sm:$0xff]  ;;  %s7025_s13 = scalar_lea.vmem %s7024_s26, 8192  ;;  %p7026_p5 = scmp.lt.s32.totalorder %s8700_s24, %s7024_s26 }
  0x98   : > { %6073 = vmatpush3.bf16.msra.mxu0 %v7415_v5  ;;  %6105 = vmatpush3.bf16.msra.mxu1 %v7415_v5  ;;  %v1577_v32 = vld [vmem:[#allocation8 + $0x218] sm:$0xff]  ;;  %v443_v33 = vld [vmem:[%s7399_s11 + $0x8] sm:$0xff]  ;;  %v444_v35 = vld [vmem:[%s7399_s11 + $0x10] sm:$0xff]  ;;  %v6164_v37 = vpack.c.bf16 %v1559_v30, %v1558_v29 }
  0x99   : > { %6075 = vmatprep.subr.bf16.mxu0 %v7422_v8  ;;  %6107 = vmatprep.subr.bf16.mxu1 %v7422_v8  ;;  %v4571_v34 = vld [vmem:[%s7399_s11 + $0x88] sm:$0xff]  ;;  %v4572_v36 = vld [vmem:[%s7399_s11 + $0x90] sm:$0xff]  ;;  %v6166_v38 = vpack.c.bf16 %v1577_v32, %v1576_v31  ;;  %v1561_v40 = vld [vmem:[#allocation8 + $0x198] sm:$0xff]  ;;  %s4647_s12 = sshll.u32 %s8798_s9, 12 }
  0x9a   : > { %v1560_v39 = vld [vmem:[#allocation8 + $0x190] sm:$0xff]  ;;  %v1578_v41 = vld [vmem:[#allocation8 + $0x220] sm:$0xff]  ;;  %v1579_v42 = vld [vmem:[#allocation8 + $0x228] sm:$0xff]  ;;  %s8698_s21 = scalar_lea.hbm %s8799_s29, %s4647_s12 }
  0x9b   : > { %v445_v43 = vld [vmem:[%s7399_s11 + $0x18] sm:$0xff]  ;;  %v446_v45 = vld [vmem:[%s7399_s11 + $0x20] sm:$0xff]  ;;  %v6168_v47 = vpack.c.bf16 %v1561_v40, %v1560_v39  ;;  %v6170_v48 = vpack.c.bf16 %v1579_v42, %v1578_v41  ;;  %v1563_v50 = vld [vmem:[#allocation8 + $0x1a8] sm:$0xff]  ;;  %v7117_v39 = vmov 0.0  }
  0x9c   : > { %6077 = vmatpush3.bf16.msra.mxu0 %v7422_v8  ;;  %6109 = vmatpush3.bf16.msra.mxu1 %v7422_v8  ;;  %v4573_v44 = vld [vmem:[%s7399_s11 + $0x98] sm:$0xff]  ;;  %v4574_v46 = vld [vmem:[%s7399_s11 + $0xa0] sm:$0xff]  ;;  %v447_v51 = vld [vmem:[%s7399_s11 + $0x28] sm:$0xff]  ;;  %1399 = vst [vmem:[#allocation2 + $0x20] sm:$0xff] %v7117_v39 }
  0x9d   : > { %6079 = vmatprep.subr.bf16.mxu0 %v7429_v12  ;;  %6111 = vmatprep.subr.bf16.mxu1 %v7429_v12  ;;  %v1562_v49 = vld [vmem:[#allocation8 + $0x1a0] sm:$0xff]  ;;  %v4575_v52 = vld [vmem:[%s7399_s11 + $0xa8] sm:$0xff]  ;;  %v448_v53 = vld [vmem:[%s7399_s11 + $0x30] sm:$0xff]  ;;  %769 = vst [vmem:[#allocation2 + $0x30] sm:$0x1] %v7117_v39 }
  0x9e   : > { %v4576_v54 = vld [vmem:[%s7399_s11 + $0xb0] sm:$0xff]  ;;  %v6172_v55 = vpack.c.bf16 %v1563_v50, %v1562_v49  ;;  %v449_v56 = vld [vmem:[%s7399_s11 + $0x38] sm:$0xff]  ;;  %v450_v58 = vld [vmem:[%s7399_s11 + $0x40] sm:$0xff]  ;;  %770 = vst [vmem:[#allocation2 + $0x60] sm:$0x1] %v7117_v39 }
  0x9f   : > { %v4577_v57 = vld [vmem:[%s7399_s11 + $0xb8] sm:$0xff]  ;;  %v4578_v59 = vld [vmem:[%s7399_s11 + $0xc0] sm:$0xff]  ;;  %v451_v60 = vld [vmem:[%s7399_s11 + $0x48] sm:$0xff]  ;;  %771 = vst [vmem:[#allocation2 + $0x90] sm:$0x1] %v7117_v39 }
  0xa0   : > { %6081 = vmatpush3.bf16.msra.mxu0 %v7429_v12  ;;  %6113 = vmatpush3.bf16.msra.mxu1 %v7429_v12  ;;  %v4579_v61 = vld [vmem:[%s7399_s11 + $0xc8] sm:$0xff]  ;;  %v452_v62 = vld [vmem:[%s7399_s11 + $0x50] sm:$0xff]  ;;  %v453_v0 = vld [vmem:[%s7399_s11 + $0x58] sm:$0xff]  ;;  %772 = vst [vmem:[#allocation2 + $0xc0] sm:$0x1] %v7117_v39 }
  0xa1   : > { %6083 = vmatprep.subr.bf16.mxu0 %v7436_v16  ;;  %6115 = vmatprep.subr.bf16.mxu1 %v7436_v16  ;;  %v4580_v63 = vld [vmem:[%s7399_s11 + $0xd0] sm:$0xff]  ;;  %v4581_v1 = vld [vmem:[%s7399_s11 + $0xd8] sm:$0xff]  ;;  %v454_v2 = vld [vmem:[%s7399_s11 + $0x60] sm:$0xff]  ;;  %773 = vst [vmem:[#allocation2 + $0xf0] sm:$0x1] %v7117_v39 }
  0xa2   : > { %v455_v4 = vld [vmem:[%s7399_s11 + $0x68] sm:$0xff]  ;;  %v456_v6 = vld [vmem:[%s7399_s11 + $0x70] sm:$0xff]  ;;  %v457_v10 = vld [vmem:[%s7399_s11 + $0x78] sm:$0xff]  ;;  %774 = vst [vmem:[#allocation2 + $0x120] sm:$0x1] %v7117_v39 }
  0xa3   : > { %v4584_v7 = vld [vmem:[%s7399_s11 + $0xf0] sm:$0xff]  ;;  %v1591_v9 = vld [vmem:[#allocation8 + $0x288] sm:$0xff]  ;;  %v4585_v11 = vld [vmem:[%s7399_s11 + $0xf8] sm:$0xff]  ;;  %775 = vst [vmem:[#allocation2 + $0x150] sm:$0x1] %v7117_v39 }
  0xa4   : > { %6085 = vmatpush3.bf16.msra.mxu0 %v7436_v16  ;;  %6117 = vmatpush3.bf16.msra.mxu1 %v7436_v16  ;;  %v1592_v14 = vld [vmem:[#allocation8 + $0x290] sm:$0xff]  ;;  %v1593_v15 = vld [vmem:[#allocation8 + $0x298] sm:$0xff]  ;;  %v1594_v18 = vld [vmem:[#allocation8 + $0x2a0] sm:$0xff]  ;;  %834 = vst [vmem:[#allocation2 + $0x5f] sm:$0x1] %v7117_v39 }
  0xa5   : > { %6087 = vmatprep.subr.bf16.mxu0 %v7442_v19  ;;  %6119 = vmatprep.subr.bf16.mxu1 %v7442_v19  ;;  %v6198_v17 = vpack.c.bf16 %v1593_v15, %v1592_v14  ;;  %v1596_v21 = vld [vmem:[#allocation8 + $0x2b0] sm:$0xff]  ;;  %v1581_v24 = vld [vmem:[#allocation8 + $0x238] sm:$0xff]  ;;  %v1598_v30 = vld [vmem:[#allocation8 + $0x2c0] sm:$0xff]  ;;  %835 = vst [vmem:[#allocation2 + $0x8f] sm:$0x1] %v7117_v39 }
  0xa6   : > { %v1580_v23 = vld [vmem:[#allocation8 + $0x230] sm:$0xff]  ;;  %v1599_v31 = vld [vmem:[#allocation8 + $0x2c8] sm:$0xff]  ;;  %v1582_v32 = vld [vmem:[#allocation8 + $0x240] sm:$0xff]  ;;  %836 = vst [vmem:[#allocation2 + $0xbf] sm:$0x1] %v7117_v39 }
  0xa7   : > { %v6174_v27 = vpack.c.bf16 %v1581_v24, %v1580_v23  ;;  %837 = vst [vmem:[#allocation2 + $0xef] sm:$0x1] %v7117_v39  ;;  %838 = vst [vmem:[#allocation2 + $0x11f] sm:$0x1] %v7117_v39  ;;  %v1600_v40 = vld [vmem:[#allocation8 + $0x2d0] sm:$0xff]  ;;  %v1601_v41 = vld [vmem:[#allocation8 + $0x2d8] sm:$0xff] }
  0xa8   : > { %6089 = vmatpush3.bf16.msra.mxu0 %v7442_v19  ;;  %6121 = vmatpush3.bf16.msra.mxu1 %v7442_v19  ;;  %839 = vst [vmem:[#allocation2 + $0x14f] sm:$0x1] %v7117_v39  ;;  %840 = vst [vmem:[#allocation2 + $0x17f] sm:$0x1] %v7117_v39  ;;  %v1584_v42 = vld [vmem:[#allocation8 + $0x250] sm:$0xff]  ;;  %v1602_v49 = vld [vmem:[#allocation8 + $0x2e0] sm:$0xff] }
  0xa9   : > { %6091 = vmatprep.subr.bf16.mxu0 %v7448_v22  ;;  %6123 = vmatprep.subr.bf16.mxu1 %v7448_v22  ;;  %1158 = vst [vmem:[#allocation2 + $0x180] sm:$0x1] %v7117_v39  ;;  %1159 = vst [vmem:[#allocation2 + $0x1b0] sm:$0x1] %v7117_v39  ;;  %v1603_v50 = vld [vmem:[#allocation8 + $0x2e8] sm:$0xff] }
  0xaa   : > { %1160 = vst [vmem:[#allocation2 + $0x1e0] sm:$0x1] %v7117_v39  ;;  %1161 = vst [vmem:[#allocation2 + $0x210] sm:$0x1] %v7117_v39 }
  0xab   : > { %1162 = vst [vmem:[#allocation2 + $0x240] sm:$0x1] %v7117_v39  ;;  %1163 = vst [vmem:[#allocation2 + $0x270] sm:$0x1] %v7117_v39 }
  0xac   : > { %6093 = vmatpush3.bf16.msra.mxu0 %v7448_v22  ;;  %6125 = vmatpush3.bf16.msra.mxu1 %v7448_v22  ;;  %1164 = vst [vmem:[#allocation2 + $0x2a0] sm:$0x1] %v7117_v39  ;;  %1165 = vst [vmem:[#allocation2 + $0x2d0] sm:$0x1] %v7117_v39 }
  0xad   : > { %6095 = vmatprep.subr.bf16.mxu0 %v7454_v25  ;;  %6127 = vmatprep.subr.bf16.mxu1 %v7454_v25  ;;  %1222 = vst [vmem:[#allocation2 + $0x1af] sm:$0x1] %v7117_v39  ;;  %1223 = vst [vmem:[#allocation2 + $0x1df] sm:$0x1] %v7117_v39 }
  0xae   : > { %1224 = vst [vmem:[#allocation2 + $0x20f] sm:$0x1] %v7117_v39  ;;  %1225 = vst [vmem:[#allocation2 + $0x23f] sm:$0x1] %v7117_v39 }
  0xaf   : > { %1226 = vst [vmem:[#allocation2 + $0x26f] sm:$0x1] %v7117_v39  ;;  %1227 = vst [vmem:[#allocation2 + $0x29f] sm:$0x1] %v7117_v39 }
  0xb0   : > { %6097 = vmatpush3.bf16.msra.mxu0 %v7454_v25  ;;  %6129 = vmatpush3.bf16.msra.mxu1 %v7454_v25  ;;  %1228 = vst [vmem:[#allocation2 + $0x2cf] sm:$0x1] %v7117_v39  ;;  %1229 = vst [vmem:[#allocation2 + $0x2ff] sm:$0x1] %v7117_v39 }
  0xb1   : > { %6131 = vmatprep.subr.bf16.mxu0 %v7413_v3  ;;  %6163 = vmatprep.subr.bf16.mxu1 %v6162_v28  ;;  %v1564_v28 = vld [vmem:[#allocation8 + $0x1b0] sm:$0xff]  ;;  %1373 = vst [vmem:[#allocation2 + $0x300] sm:$0x1] %v7117_v39  ;;  %1389 = vst [vmem:[#allocation2 + $0x32f] sm:$0x1] %v7117_v39 }
  0xb3   : > { %5501 = vmatmul.mubr.f32.vlgmr.msra.gmra.mrb[0].mxu0 %v443_v33  ;;  %5557 = vmatmul.mubr.f32.vlgmr.msra.gmra.mrb[0].mxu1 %v4571_v34  ;;  %v1583_v33 = vld [vmem:[#allocation8 + $0x248] sm:$0xff]  ;;  %v6210_v34 = vpack.c.bf16 %v1599_v31, %v1598_v30 }
  0xb4   : > { %5503 = vmatprep.mubr.f32.mxu0 %v444_v35  ;;  %5559 = vmatprep.mubr.f32.mxu1 %v4572_v36  ;;  %v6178_v35 = vpack.c.bf16 %v1583_v33, %v1582_v32  ;;  %v1566_v36 = vld [vmem:[#allocation8 + $0x1c0] sm:$0xff] }
  0xb5   : > { %6133 = vmatpush3.bf16.msra.mxu0 %v7413_v3  ;;  %6165 = vmatpush3.bf16.msra.mxu1 %v6164_v37  ;;  %v4582_v3 = vld [vmem:[%s7399_s11 + $0xe0] sm:$0xff]  ;;  %v1567_v37 = vld [vmem:[#allocation8 + $0x1c8] sm:$0xff] }
  0xb6   : > { %6135 = vmatprep.subr.bf16.mxu0 %v7415_v5  ;;  %6167 = vmatprep.subr.bf16.mxu1 %v6166_v38  ;;  %v6180_v38 = vpack.c.bf16 %v1567_v37, %v1566_v36 }
  0xb7   : > { %5504 = vmatmul.mubr.f32.gmra.mrb[2].mxu0 %v445_v43  ;;  %5560 = vmatmul.mubr.f32.gmra.mrb[2].mxu1 %v4573_v44  ;;  %v1585_v43 = vld [vmem:[#allocation8 + $0x258] sm:$0xff]  ;;  %v6214_v44 = vpack.c.bf16 %v1601_v41, %v1600_v40 }
  0xb8   : > { %5506 = vmatprep.mubr.f32.mxu0 %v446_v45  ;;  %5562 = vmatprep.mubr.f32.mxu1 %v4574_v46  ;;  %v6182_v45 = vpack.c.bf16 %v1585_v43, %v1584_v42  ;;  %v1568_v46 = vld [vmem:[#allocation8 + $0x1d0] sm:$0xff] }
  0xb9   : > { %6137 = vmatpush3.bf16.msra.mxu0 %v7415_v5  ;;  %6169 = vmatpush3.bf16.msra.mxu1 %v6168_v47  ;;  %v4583_v5 = vld [vmem:[%s7399_s11 + $0xe8] sm:$0xff]  ;;  %v1569_v47 = vld [vmem:[#allocation8 + $0x1d8] sm:$0xff] }
  0xba   : > { %6139 = vmatprep.subr.bf16.mxu0 %v7422_v8  ;;  %6171 = vmatprep.subr.bf16.mxu1 %v6170_v48  ;;  %v6184_v48 = vpack.c.bf16 %v1569_v47, %v1568_v46 }
  0xbb   : > { %5507 = vmatmul.mubr.f32.gmra.mrb[4].mxu0 %v447_v51  ;;  %5563 = vmatmul.mubr.f32.gmra.mrb[4].mxu1 %v4575_v52  ;;  %v1586_v51 = vld [vmem:[#allocation8 + $0x260] sm:$0xff]  ;;  %v1587_v52 = vld [vmem:[#allocation8 + $0x268] sm:$0xff] }
  0xbc   : > { %5509 = vmatprep.mubr.f32.mxu0 %v448_v53  ;;  %5565 = vmatprep.mubr.f32.mxu1 %v4576_v54  ;;  %v6218_v53 = vpack.c.bf16 %v1603_v50, %v1602_v49  ;;  %v6186_v54 = vpack.c.bf16 %v1587_v52, %v1586_v51 }
  0xbd   : > { %6141 = vmatpush3.bf16.msra.mxu0 %v7422_v8  ;;  %6173 = vmatpush3.bf16.msra.mxu1 %v6172_v55  ;;  %v1590_v8 = vld [vmem:[#allocation8 + $0x280] sm:$0xff] }
  0xbe   : > { %6143 = vmatprep.subr.bf16.mxu0 %v7429_v12  ;;  %v6194_v13 = vpack.c.bf16 %v1591_v9, %v1590_v8  ;;  %6175 = vmatprep.subr.bf16.mxu1 %v6174_v27  ;;  %v1570_v55 = vld [vmem:[#allocation8 + $0x1e0] sm:$0xff]  ;;  %v2253_v9 = vld [vmem:[#allocation8 + $0x388] sm:$0xff] }
  0xbf   : > { %5510 = vmatmul.mubr.f32.gmra.mrb[6].mxu0 %v449_v56  ;;  %5566 = vmatmul.mubr.f32.gmra.mrb[6].mxu1 %v4577_v57  ;;  %v1571_v56 = vld [vmem:[#allocation8 + $0x1e8] sm:$0xff]  ;;  %v4588_v57 = vld [vmem:[%s7399_s11 + $0x110] sm:$0xff]  ;;  %v2252_v8 = vld [vmem:[#allocation8 + $0x380] sm:$0xff] }
  0xc0   : > { %5512 = vmatprep.mubr.f32.mxu0 %v450_v58  ;;  %5568 = vmatprep.mubr.f32.mxu1 %v4578_v59  ;;  %v6188_v58 = vpack.c.bf16 %v1571_v56, %v1570_v55  ;;  %v4589_v59 = vld [vmem:[%s7399_s11 + $0x118] sm:$0xff] }
  0xc1   : > { %6145 = vmatpush3.bf16.msra.mxu0 %v7429_v12  ;;  %v4586_v12 = vld [vmem:[%s7399_s11 + $0x100] sm:$0xff] }
  0xc2   : > { %6147 = vmatprep.subr.bf16.mxu0 %v7436_v16 }
  0xc3   : > { %5513 = vmatmul.mubr.f32.gmra.mrb[8].mxu0 %v451_v60  ;;  %5569 = vmatmul.mubr.f32.gmra.mrb[8].mxu1 %v4579_v61  ;;  %v1604_v60 = vld [vmem:[#allocation8 + $0x2f0] sm:$0xff]  ;;  %v1605_v61 = vld [vmem:[#allocation8 + $0x2f8] sm:$0xff] }
  0xc4   : > { %5515 = vmatprep.mubr.f32.mxu0 %v452_v62  ;;  %5571 = vmatprep.mubr.f32.mxu1 %v4580_v63  ;;  %v1588_v62 = vld [vmem:[#allocation8 + $0x270] sm:$0xff]  ;;  %v1589_v63 = vld [vmem:[#allocation8 + $0x278] sm:$0xff] }
  0xc5   : > { %6149 = vmatpush3.bf16.msra.mxu0 %v7436_v16  ;;  %v4587_v16 = vld [vmem:[%s7399_s11 + $0x108] sm:$0xff] }
  0xc6   : > { %6151 = vmatprep.subr.bf16.mxu0 %v7442_v19 }
  0xc7   : > { %5516 = vmatmul.mubr.f32.gmra.mrb[10].mxu0 %v453_v0  ;;  %5572 = vmatmul.mubr.f32.gmra.mrb[10].mxu1 %v4581_v1  ;;  %v6222_v0 = vpack.c.bf16 %v1605_v61, %v1604_v60  ;;  %v6190_v1 = vpack.c.bf16 %v1589_v63, %v1588_v62 }
  0xc8   : > { %5518 = vmatprep.mubr.f32.mxu0 %v454_v2  ;;  %5574 = vmatprep.mubr.f32.mxu1 %v4582_v3  ;;  %v1572_v2 = vld [vmem:[#allocation8 + $0x1f0] sm:$0xff]  ;;  %v1573_v3 = vld [vmem:[#allocation8 + $0x1f8] sm:$0xff] }
  0xc9   : > { %6153 = vmatpush3.bf16.msra.mxu0 %v7442_v19  ;;  %v1595_v19 = vld [vmem:[#allocation8 + $0x2a8] sm:$0xff] }
  0xca   : > { %6155 = vmatprep.subr.bf16.mxu0 %v7448_v22  ;;  %v6202_v20 = vpack.c.bf16 %v1595_v19, %v1594_v18 }
  0xcb   : > { %5519 = vmatmul.mubr.f32.gmra.mrb[12].mxu0 %v455_v4  ;;  %5575 = vmatmul.mubr.f32.gmra.mrb[12].mxu1 %v4583_v5  ;;  %v6192_v4 = vpack.c.bf16 %v1573_v3, %v1572_v2  ;;  %v1476_v5 = vld [vmem:[#allocation8 + $0x80] sm:$0xff] }
  0xcc   : > { %5521 = vmatprep.mubr.f32.mxu0 %v456_v6  ;;  %5577 = vmatprep.mubr.f32.mxu1 %v4584_v7  ;;  %v1477_v6 = vld [vmem:[#allocation8 + $0x88] sm:$0xff] }
  0xcd   : > { %6157 = vmatpush3.bf16.msra.mxu0 %v7448_v22  ;;  %v1597_v22 = vld [vmem:[#allocation8 + $0x2b8] sm:$0xff]  ;;  %v6226_v7 = vpack.c.bf16 %v1477_v6, %v1476_v5 }
  0xce   : > { %6159 = vmatprep.subr.bf16.mxu0 %v7454_v25  ;;  %v6206_v26 = vpack.c.bf16 %v1597_v22, %v1596_v21  ;;  %v7571_v5 = vld [vmem:[#allocation8 + $0x98] sm:$0xff] }
  0xcf   : > { %5522 = vmatmul.mubr.f32.gmra.mrb[14].mxu0 %v457_v10  ;;  %5578 = vmatmul.mubr.f32.gmra.mrb[14].mxu1 %v4585_v11  ;;  %v6290_v10 = vpack.c.bf16 %v2253_v9, %v2252_v8  ;;  %v7516_v11 = vld [vmem:[%s8753_s2] ss:$0 sm:$0xff] }
  0xd0   : > { %5612 = vmatprep.mubr.f32.mxu0 %v4586_v12  ;;  %v7521_v12 = vld [vmem:[%s8754_s3] ss:$0 sm:$0xff] }
  0xd1   : > { %6161 = vmatpush3.bf16.msra.mxu0 %v7454_v25  ;;  %v1565_v25 = vld [vmem:[#allocation8 + $0x1b8] sm:$0xff] }
  0xd2   : > { %6195 = vmatprep.subr.bf16.mxu0 %v6194_v13  ;;  %v6176_v29 = vpack.c.bf16 %v1565_v25, %v1564_v28 }
  0xd4   : > { %5613 = vmatmul.mubr.f32.vlgmr.msra.gmra.mrb[16].mxu0 %v4587_v16  ;;  %6177 = vmatpush3.bf16.msra.mxu1 %v6176_v29  ;;  %v7523_v16 = vld [vmem:[#allocation8] sm:$0xff] }
  0xd5   : > { %6197 = vmatpush3.bf16.msra.mxu0 %v6194_v13  ;;  %6179 = vmatprep.subr.bf16.mxu1 %v6178_v35 }
  0xd6   : > { %6199 = vmatprep.subr.bf16.mxu0 %v6198_v17  ;;  %5615 = vmatprep.mubr.f32.mxu0 %v4588_v57 }
  0xd8   : > { %6181 = vmatpush3.bf16.msra.mxu1 %v6180_v38  ;;  %5616 = vmatmul.mubr.f32.gmra.mrb[18].mxu0 %v4589_v59 }
  0xd9   : > { %6201 = vmatpush3.bf16.msra.mxu0 %v6198_v17  ;;  %6183 = vmatprep.subr.bf16.mxu1 %v6182_v45  ;;  %v7525_v17 = vld [vmem:[#allocation8 + $0x8] sm:$0xff] }
  0xda   : > { %6203 = vmatprep.subr.bf16.mxu0 %v6202_v20  ;;  %v6228_v23 = vpack.c.bf16 %v7525_v17, %v7523_v16 }
  0xdc   : > { %6185 = vmatpush3.bf16.msra.mxu1 %v6184_v48 }
  0xdd   : > { %6205 = vmatpush3.bf16.msra.mxu0 %v6202_v20  ;;  %6187 = vmatprep.subr.bf16.mxu1 %v6186_v54 }
  0xde   : > { %6207 = vmatprep.subr.bf16.mxu0 %v6206_v26 }
  0xe0   : > { %6189 = vmatpush3.bf16.msra.mxu1 %v6188_v58 }
  0xe1   : > { %6209 = vmatpush3.bf16.msra.mxu0 %v6206_v26  ;;  %6191 = vmatprep.subr.bf16.mxu1 %v6190_v1 }
  0xe2   : > { %6211 = vmatprep.subr.bf16.mxu0 %v6210_v34 }
  0xe4   : > { %6193 = vmatpush3.bf16.msra.mxu1 %v6192_v4  ;;  %v7569_v4 = vld [vmem:[#allocation8 + $0x90] sm:$0xff] }
  0xe5   : > { %6213 = vmatpush3.bf16.msra.mxu0 %v6210_v34  ;;  %6291 = vmatprep.subr.bf16.mxu1 %v6290_v10 }
  0xe6   : > { %6215 = vmatprep.subr.bf16.mxu0 %v6214_v44 }
  0xe9   : > { %6217 = vmatpush3.bf16.msra.mxu0 %v6214_v44 }
  0xea   : > { %6219 = vmatprep.subr.bf16.mxu0 %v6218_v53 }
  0xed   : > { %6221 = vmatpush3.bf16.msra.mxu0 %v6218_v53 }
  0xee   : > { %6223 = vmatprep.subr.bf16.mxu0 %v6222_v0 }
  0xf1   : > { %6225 = vmatpush3.bf16.msra.mxu0 %v6222_v0 }
  0xf2   : > { %6227 = vmatprep.subr.bf16.mxu0 %v6226_v7 }
 0x186   : > { %v5502_v13 = vpop.f32.mrb[0].mxu0  ;;  %v5558_v14 = vpop.f32.mrb[0].mxu1 }
 0x187   : > { %v540_v15 = vpop.f32.mrb[1].mxu0  ;;  %v1022_v18 = vmul.f32 %v5558_v14, %v7516_v11  ;;  %v942_v19 = vpop.f32.mrb[1].mxu1 }
 0x188   : > { %v1021_v20 = vmul.f32 %v7516_v11, %v942_v19 }
 0x189   : > { %v1038_v21 = vadd.f32 %v7521_v12, %v1022_v18 }
 0x18a   : > { %v5505_v22 = vpop.f32.mrb[2].mxu0  ;;  %v1037_v24 = vadd.f32 %v7521_v12, %v1021_v20  ;;  %v5561_v26 = vpop.f32.mrb[2].mxu1 }
 0x18b   : > { %v628_v27 = vmul.f32 %v5505_v22, %v7516_v11  ;;  %v550_v28 = vpop.f32.mrb[3].mxu0  ;;  %v1054_v25 = vmax.f32 %v1038_v21, 0.0  ;;  %v1024_v29 = vmul.f32 %v5561_v26, %v7516_v11  ;;  %v952_v30 = vpop.f32.mrb[3].mxu1  ;;  %v6230_v22 = vpack.c.bf16 %v7571_v5, %v7569_v4  ;;  %v7586_v26 = vld [vmem:[#allocation8 + $0x300] sm:$0xff]  ;;  %v7641_v4 = vld [vmem:[#allocation8 + $0x3a8] sm:$0xff] }
 0x18c   : > { %v627_v31 = vmul.f32 %v7516_v11, %v550_v28  ;;  %v1053_v32 = vmax.f32 %v1037_v24, 0.0  ;;  %v1023_v33 = vmul.f32 %v7516_v11, %v952_v30  ;;  %v7584_v24 = vld [vmem:[#allocation8 + $0x10] sm:$0xff] }
 0x18d   : > { %v650_v34 = vadd.f32 %v7521_v12, %v628_v27  ;;  %1071 = vst [vmem:[#allocation2 + $0x1a0] sm:$0xff] %v1054_v25  ;;  %v1103_v35 = vrot.slane %v1054_v25, 7  ;;  %v1167_v36 = vrot.slane %v1054_v25, 1  ;;  %v1040_v44 = vadd.f32 %v7521_v12, %v1024_v29  ;;  %v2237_v27 = vld [vmem:[#allocation8 + $0x308] sm:$0xff] }
 0x18e   : > { %v649_v37 = vadd.f32 %v7521_v12, %v627_v31  ;;  %v5508_v38 = vpop.f32.mrb[4].mxu0  ;;  %1070 = vst [vmem:[#allocation2 + $0x188] sm:$0xff] %v1053_v32  ;;  %v1102_v39 = vrot.slane %v1053_v32, 7  ;;  %v1166_v40 = vrot.slane %v1053_v32, 1  ;;  %v1039_v45 = vadd.f32 %v7521_v12, %v1023_v33  ;;  %v7596_v32 = vld [vmem:[#allocation8 + $0x18] sm:$0xff]  ;;  %v2254_v33 = vld [vmem:[#allocation8 + $0x390] sm:$0xff] }
 0x18f   : > { %v7539_v41 = vmax.f32 %v650_v34, 0.0  ;;  %v630_v42 = vmul.f32 %v5508_v38, %v7516_v11  ;;  %v560_v43 = vpop.f32.mrb[5].mxu0  ;;  %1207 = vst [vmem:[#allocation2 + $0x1a8] sm:$0x7f] %v1167_v36  ;;  %v1056_v53 = vmax.f32 %v1040_v44, 0.0  ;;  %v2255_v34 = vld [vmem:[#allocation8 + $0x398] sm:$0xff] }
 0x190   : > { %v7544_v46 = vmax.f32 %v649_v37, 0.0  ;;  %v629_v47 = vmul.f32 %v7516_v11, %v560_v43  ;;  %v1104_v48 = vsel %vm711_vm0, %v1102_v39, %v1103_v35  ;;  %1142 = vst [vmem:[#allocation2 + $0x180] sm:$0xfe] %v1102_v39  ;;  %v7549_v49 = vsel %vm776_vm1, %v1166_v40, %v1167_v36  ;;  %v7601_v38 = vld [vmem:[#allocation8 + $0xa0] sm:$0xff] }
 0x191   : > { %v716_v50 = vrot.slane %v7539_v41, 7  ;;  %v781_v51 = vrot.slane %v7539_v41, 1  ;;  %v652_v52 = vadd.f32 %v7521_v12, %v630_v42  ;;  %1143 = vst [vmem:[#allocation2 + $0x198] sm:$0xff] %v1104_v48  ;;  %1206 = vst [vmem:[#allocation2 + $0x190] sm:$0xff] %v7549_v49  ;;  %v1055_v58 = vmax.f32 %v1039_v45, 0.0  ;;  %v7611_v48 = vld [vmem:[#allocation8 + $0x20] sm:$0xff] }
 0x192   : > { %v715_v54 = vrot.slane %v7544_v46, 7  ;;  %v780_v55 = vrot.slane %v7544_v46, 1  ;;  %v651_v56 = vadd.f32 %v7521_v12, %v629_v47  ;;  %v5511_v57 = vpop.f32.mrb[6].mxu0  ;;  %1670 = vmatprep.mubr.f32.mxu1 %v7544_v46  ;;  %1073 = vst [vmem:[#allocation2 + $0x1d0] sm:$0xff] %v1056_v53  ;;  %v1106_v62 = vrot.slane %v1056_v53, 7  ;;  %v7609_v47 = vld [vmem:[#allocation8 + $0xa8] sm:$0xff] }
 0x193   : > { %820 = vst [vmem:[#allocation2 + $0x58] sm:$0x7f] %v781_v51  ;;  %v7559_v59 = vmax.f32 %v652_v52, 0.0  ;;  %v632_v60 = vmul.f32 %v5511_v57, %v7516_v11  ;;  %v570_v61 = vpop.f32.mrb[7].mxu0  ;;  %v1170_v63 = vrot.slane %v1056_v53, 1  ;;  %1072 = vst [vmem:[#allocation2 + $0x1b8] sm:$0xff] %v1055_v58  ;;  %v6234_v16 = vpack.c.bf16 %v7609_v47, %v7601_v38 }
 0x194   : > { %v7563_v0 = vsel %vm711_vm0, %v715_v54, %v716_v50  ;;  %754 = vst [vmem:[#allocation2 + $0x30] sm:$0xfe] %v715_v54  ;;  %v782_v1 = vsel %vm776_vm1, %v780_v55, %v781_v51  ;;  %v7566_v2 = vmax.f32 %v651_v56, 0.0  ;;  %v631_v3 = vmul.f32 %v7516_v11, %v570_v61  ;;  %v7622_v57 = vld [vmem:[#allocation8 + $0x310] sm:$0xff] }
 0x195   : > { %819 = vst [vmem:[#allocation2 + $0x40] sm:$0xff] %v782_v1  ;;  %v719_v6 = vrot.slane %v7559_v59, 7  ;;  %v784_v7 = vrot.slane %v7559_v59, 1  ;;  %v654_v8 = vadd.f32 %v7521_v12, %v632_v60  ;;  %5650 = vmatprep.mubr.f32.mxu0 %v782_v1  ;;  %1209 = vst [vmem:[#allocation2 + $0x1d8] sm:$0x7f] %v1170_v63  ;;  %v1105_v9 = vrot.slane %v1055_v58, 7 }
 0x196   : > { %v718_v10 = vrot.slane %v7566_v2, 7  ;;  %v783_v13 = vrot.slane %v7566_v2, 1  ;;  %v653_v14 = vadd.f32 %v7521_v12, %v631_v3  ;;  %v5514_v15 = vpop.f32.mrb[8].mxu0  ;;  %v1169_v18 = vrot.slane %v1055_v58, 1  ;;  %v7624_v58 = vld [vmem:[#allocation8 + $0x318] sm:$0xff]  ;;  %v7637_v1 = vld [vmem:[#allocation8 + $0x28] sm:$0xff] }
 0x197   : > { %822 = vst [vmem:[#allocation2 + $0x88] sm:$0x7f] %v784_v7  ;;  %v7579_v19 = vmax.f32 %v654_v8, 0.0  ;;  %v634_v20 = vmul.f32 %v5514_v15, %v7516_v11  ;;  %v580_v21 = vpop.f32.mrb[9].mxu0  ;;  %v1107_v28 = vsel %vm711_vm0, %v1105_v9, %v1106_v62  ;;  %1144 = vst [vmem:[#allocation2 + $0x1b0] sm:$0xfe] %v1105_v9  ;;  %v6292_v50 = vpack.c.bf16 %v2237_v27, %v7586_v26 }
 0x198   : > { %v7590_v25 = vsel %vm711_vm0, %v718_v10, %v719_v6  ;;  %756 = vst [vmem:[#allocation2 + $0x60] sm:$0xfe] %v718_v10  ;;  %v785_v29 = vsel %vm776_vm1, %v783_v13, %v784_v7  ;;  %v7593_v30 = vmax.f32 %v653_v14, 0.0  ;;  %v633_v31 = vmul.f32 %v7516_v11, %v580_v21  ;;  %1145 = vst [vmem:[#allocation2 + $0x1c8] sm:$0xff] %v1107_v28  ;;  %v7639_v3 = vld [vmem:[#allocation8 + $0x3a0] sm:$0xff]  ;;  %v7654_v13 = vld [vmem:[#allocation8 + $0xb0] sm:$0xff] }
 0x199   : > { %821 = vst [vmem:[#allocation2 + $0x70] sm:$0xff] %v785_v29  ;;  %v722_v35 = vrot.slane %v7579_v19, 7  ;;  %v787_v36 = vrot.slane %v7579_v19, 1  ;;  %v656_v37 = vadd.f32 %v7521_v12, %v634_v20  ;;  %v1171_v39 = vsel %vm776_vm1, %v1169_v18, %v1170_v63  ;;  %v7656_v14 = vld [vmem:[#allocation8 + $0xb8] sm:$0xff]  ;;  %v7670_v27 = vld [vmem:[#allocation8 + $0x320] sm:$0xff]  ;;  %v7672_v28 = vld [vmem:[#allocation8 + $0x328] sm:$0xff] }
 0x19a   : > { %v721_v40 = vrot.slane %v7593_v30, 7  ;;  %v786_v42 = vrot.slane %v7593_v30, 1  ;;  %v655_v43 = vadd.f32 %v7521_v12, %v633_v31  ;;  %v5517_v44 = vpop.f32.mrb[10].mxu0  ;;  %v7607_v45 = vld [vmem:[#allocation2 + $0x58] sm:$0xff]  ;;  %1208 = vst [vmem:[#allocation2 + $0x1c0] sm:$0xff] %v1171_v39  ;;  %v6232_v55 = vpack.c.bf16 %v7596_v32, %v7584_v24  ;;  %v7666_v24 = vld [vmem:[#allocation8 + $0x30] sm:$0xff] }
 0x19b   : > { %824 = vst [vmem:[#allocation2 + $0xb8] sm:$0x7f] %v787_v36  ;;  %v7614_v51 = vmax.f32 %v656_v37, 0.0  ;;  %v636_v52 = vmul.f32 %v5517_v44, %v7516_v11  ;;  %v590_v53 = vpop.f32.mrb[11].mxu0  ;;  %v7617_v54 = vld [vmem:[#allocation2 + $0x30] sm:$0xff]  ;;  %5651 = vmatmul.mubr.f32.vlgmr.msra.gmra.mrb[20].mxu0 %v7607_v45  ;;  %v6294_v56 = vpack.c.bf16 %v2255_v34, %v2254_v33  ;;  %v6296_v15 = vpack.c.bf16 %v7624_v58, %v7622_v57  ;;  %v7682_v34 = vld [vmem:[#allocation8 + $0x38] sm:$0xff] }
 0x19c   : > { %v7627_v60 = vsel %vm711_vm0, %v721_v40, %v722_v35  ;;  %758 = vst [vmem:[#allocation2 + $0x90] sm:$0xfe] %v721_v40  ;;  %v788_v61 = vsel %vm776_vm1, %v786_v42, %v787_v36  ;;  %v7630_v62 = vmax.f32 %v655_v43, 0.0  ;;  %v635_v63 = vmul.f32 %v7516_v11, %v590_v53  ;;  %1671 = vmatmul.mubr.f32.vlgmr.msra.gmra.mrb[16].mxu1 %v7617_v54  ;;  %v2258_v35 = vld [vmem:[#allocation8 + $0x3b0] sm:$0xff]  ;;  %v2259_v36 = vld [vmem:[#allocation8 + $0x3b8] sm:$0xff] }
 0x19d   : > { %6229 = vmatpush3.bf16.msra.mxu0 %v6228_v23  ;;  %823 = vst [vmem:[#allocation2 + $0xa0] sm:$0xff] %v788_v61  ;;  %v725_v5 = vrot.slane %v7614_v51, 7  ;;  %v790_v6 = vrot.slane %v7614_v51, 1  ;;  %v658_v7 = vadd.f32 %v7521_v12, %v636_v52  ;;  %1675 = vmatprep.mubr.f32.mxu1 %v7539_v41  ;;  %v6298_v26 = vpack.c.bf16 %v7641_v4, %v7639_v3  ;;  %v7697_v52 = vld [vmem:[#allocation8 + $0xc8] sm:$0xff]  ;;  %v2243_v3 = vld [vmem:[#allocation8 + $0x338] sm:$0xff] }
 0x19e   : > { %5653 = vmatprep.mubr.f32.mxu0 %v785_v29  ;;  %v724_v17 = vrot.slane %v7630_v62, 7  ;;  %v789_v23 = vrot.slane %v7630_v62, 1  ;;  %v657_v8 = vadd.f32 %v7521_v12, %v635_v63  ;;  %v5520_v9 = vpop.f32.mrb[12].mxu0  ;;  %6231 = vmatprep.subr.bf16.mxu0 %v6230_v22  ;;  %v7652_v10 = vld [vmem:[#allocation2 + $0x88] sm:$0xff]  ;;  %v6236_v22 = vpack.c.bf16 %v7637_v1, %v7611_v48  ;;  %v2242_v1 = vld [vmem:[#allocation8 + $0x330] sm:$0xff] }
 0x19f   : > { %6293 = vmatpush3.bf16.msra.mxu1 %v6292_v50  ;;  %826 = vst [vmem:[#allocation2 + $0xe8] sm:$0x7f] %v790_v6  ;;  %v7660_v18 = vmax.f32 %v658_v7, 0.0  ;;  %v638_v20 = vmul.f32 %v5520_v9, %v7516_v11  ;;  %v600_v21 = vpop.f32.mrb[13].mxu0  ;;  %5654 = vmatmul.mubr.f32.gmra.mrb[22].mxu0 %v7652_v10  ;;  %v6238_v40 = vpack.c.bf16 %v7656_v14, %v7654_v13  ;;  %v7695_v50 = vld [vmem:[#allocation8 + $0xc0] sm:$0xff] }
 0x1a0   : > { %6295 = vmatprep.subr.bf16.mxu1 %v6294_v56  ;;  %v7675_v29 = vsel %vm711_vm0, %v724_v17, %v725_v5  ;;  %760 = vst [vmem:[#allocation2 + $0xc0] sm:$0xfe] %v724_v17  ;;  %v791_v31 = vsel %vm776_vm1, %v789_v23, %v790_v6  ;;  %v7678_v32 = vmax.f32 %v657_v8, 0.0  ;;  %v637_v33 = vmul.f32 %v7516_v11, %v600_v21  ;;  %v7704_v58 = vld [vmem:[#allocation2 + $0x60] sm:$0xff]  ;;  %v2261_v17 = vld [vmem:[#allocation8 + $0x3c8] sm:$0xff] }
 0x1a1   : > { %1676 = vmatmul.mubr.f32.gmra.mrb[18].mxu1 %v7563_v0  ;;  %6233 = vmatpush3.bf16.msra.mxu0 %v6232_v55  ;;  %825 = vst [vmem:[#allocation2 + $0xd0] sm:$0xff] %v791_v31  ;;  %v728_v37 = vrot.slane %v7660_v18, 7  ;;  %v793_v38 = vrot.slane %v7660_v18, 1  ;;  %v660_v39 = vadd.f32 %v7521_v12, %v638_v20  ;;  %v6300_v53 = vpack.c.bf16 %v7672_v28, %v7670_v27  ;;  %v1468_v14 = vld [vmem:[#allocation8 + $0x40] sm:$0xff]  ;;  %v7733_v27 = vld [vmem:[#allocation8 + $0xd8] sm:$0xff] }
 0x1a2   : > { %1680 = vmatprep.mubr.f32.mxu1 %v7566_v2  ;;  %5656 = vmatprep.mubr.f32.mxu0 %v788_v61  ;;  %v727_v42 = vrot.slane %v7678_v32, 7  ;;  %v792_v43 = vrot.slane %v7678_v32, 1  ;;  %v659_v44 = vadd.f32 %v7521_v12, %v637_v33  ;;  %v5523_v47 = vpop.f32.mrb[14].mxu0  ;;  %v7693_v48 = vld [vmem:[#allocation2 + $0xb8] sm:$0xff]  ;;  %v6240_v61 = vpack.c.bf16 %v7682_v34, %v7666_v24  ;;  %v7738_v33 = vld [vmem:[#allocation8 + $0x50] sm:$0xff] }
 0x1a3   : > { %6235 = vmatprep.subr.bf16.mxu0 %v6234_v16  ;;  %6297 = vmatpush3.bf16.msra.mxu1 %v6296_v15  ;;  %828 = vst [vmem:[#allocation2 + $0x118] sm:$0x7f] %v793_v38  ;;  %v7701_v55 = vmax.f32 %v660_v39, 0.0  ;;  %v640_v56 = vmul.f32 %v5523_v47, %v7516_v11  ;;  %v610_v57 = vpop.f32.mrb[15].mxu0  ;;  %v6302_v63 = vpack.c.bf16 %v2259_v36, %v2258_v35  ;;  %v2260_v16 = vld [vmem:[#allocation8 + $0x3c0] sm:$0xff]  ;;  %v1469_v15 = vld [vmem:[#allocation8 + $0x48] sm:$0xff] }
 0x1a4   : > { %5657 = vmatmul.mubr.f32.gmra.mrb[24].mxu0 %v7693_v48  ;;  %6299 = vmatprep.subr.bf16.mxu1 %v6298_v26  ;;  %v7710_v4 = vsel %vm711_vm0, %v727_v42, %v728_v37  ;;  %762 = vst [vmem:[#allocation2 + $0xf0] sm:$0xfe] %v727_v42  ;;  %v7713_v5 = vsel %vm776_vm1, %v792_v43, %v793_v38  ;;  %v7715_v6 = vmax.f32 %v659_v44, 0.0  ;;  %v7731_v26 = vld [vmem:[#allocation8 + $0xd0] sm:$0xff]  ;;  %v2244_v35 = vld [vmem:[#allocation8 + $0x340] sm:$0xff]  ;;  %v2245_v36 = vld [vmem:[#allocation8 + $0x348] sm:$0xff] }
 0x1a5   : > { %v639_v7 = vmul.f32 %v7516_v11, %v610_v57  ;;  %1681 = vmatmul.mubr.f32.gmra.mrb[20].mxu1 %v7704_v58  ;;  %6237 = vmatpush3.bf16.msra.mxu0 %v6236_v22  ;;  %827 = vst [vmem:[#allocation2 + $0x100] sm:$0xff] %v7713_v5  ;;  %v731_v23 = vrot.slane %v7701_v55, 7  ;;  %v796_v8 = vrot.slane %v7701_v55, 1  ;;  %v662_v9 = vadd.f32 %v7521_v12, %v640_v56  ;;  %v7749_v42 = vld [vmem:[#allocation8 + $0x58] sm:$0xff]  ;;  %v2262_v43 = vld [vmem:[#allocation8 + $0x3d0] sm:$0xff]  ;;  %v5564_v47 = vpop.f32.mrb[4].mxu1 }
 0x1a6   : > { %1685 = vmatprep.mubr.f32.mxu1 %v7559_v59  ;;  %5659 = vmatprep.mubr.f32.mxu0 %v791_v31  ;;  %v6242_v13 = vpack.c.bf16 %v7697_v52, %v7695_v50  ;;  %v730_v20 = vrot.slane %v7715_v6, 7  ;;  %v795_v21 = vrot.slane %v7715_v6, 1  ;;  %v7729_v24 = vld [vmem:[#allocation2 + $0xe8] sm:$0xff]  ;;  %v6304_v28 = vpack.c.bf16 %v2243_v3, %v2242_v1  ;;  %v2263_v44 = vld [vmem:[#allocation8 + $0x3d8] sm:$0xff]  ;;  %v7763_v1 = vld [vmem:[#allocation8 + $0xe0] sm:$0xff] }
 0x1a7   : > { %v661_v22 = vadd.f32 %v7521_v12, %v639_v7  ;;  %6239 = vmatprep.subr.bf16.mxu0 %v6238_v40  ;;  %6301 = vmatpush3.bf16.msra.mxu1 %v6300_v53  ;;  %830 = vst [vmem:[#allocation2 + $0x148] sm:$0x7f] %v796_v8  ;;  %v7735_v31 = vmax.f32 %v662_v9, 0.0  ;;  %v6306_v34 = vpack.c.bf16 %v2261_v17, %v2260_v16  ;;  %v7765_v3 = vld [vmem:[#allocation8 + $0xe8] sm:$0xff]  ;;  %v7767_v16 = vld [vmem:[#allocation2 + $0x90] sm:$0xff]  ;;  %v2247_v9 = vld [vmem:[#allocation8 + $0x358] sm:$0xff] }
 0x1a8   : > { %5660 = vmatmul.mubr.f32.gmra.mrb[26].mxu0 %v7729_v24  ;;  %6303 = vmatprep.subr.bf16.mxu1 %v6302_v63  ;;  %v7741_v37 = vsel %vm711_vm0, %v730_v20, %v731_v23  ;;  %764 = vst [vmem:[#allocation2 + $0x120] sm:$0xfe] %v730_v20  ;;  %v7744_v38 = vsel %vm776_vm1, %v795_v21, %v796_v8  ;;  %v2246_v8 = vld [vmem:[#allocation8 + $0x350] sm:$0xff]  ;;  %v7780_v21 = vld [vmem:[#allocation8 + $0x60] sm:$0xff] }
 0x1a9   : > { %v7746_v39 = vmax.f32 %v661_v22, 0.0  ;;  %1686 = vmatmul.mubr.f32.gmra.mrb[22].mxu1 %v7590_v25  ;;  %6241 = vmatpush3.bf16.msra.mxu0 %v6240_v61  ;;  %v6244_v40 = vpack.c.bf16 %v1469_v15, %v1468_v14  ;;  %829 = vst [vmem:[#allocation2 + $0x130] sm:$0xff] %v7744_v38  ;;  %v734_v50 = vrot.slane %v7735_v31, 7  ;;  %v799_v52 = vrot.slane %v7735_v31, 1  ;;  %v962_v14 = vpop.f32.mrb[5].mxu1  ;;  %v2264_v22 = vld [vmem:[#allocation8 + $0x3e0] sm:$0xff] }
 0x1aa   : > { %1690 = vmatprep.mubr.f32.mxu1 %v7593_v30  ;;  %5662 = vmatprep.mubr.f32.mxu0 %v7713_v5  ;;  %v1026_v53 = vmul.f32 %v5564_v47, %v7516_v11  ;;  %v7759_v61 = vld [vmem:[#allocation2 + $0x118] sm:$0xff]  ;;  %v6246_v63 = vpack.c.bf16 %v7733_v27, %v7731_v26  ;;  %v6308_v7 = vpack.c.bf16 %v2245_v36, %v2244_v35  ;;  %v2265_v26 = vld [vmem:[#allocation8 + $0x3e8] sm:$0xff] }
 0x1ab   : > { %v733_v56 = vrot.slane %v7746_v39, 7  ;;  %v798_v57 = vrot.slane %v7746_v39, 1  ;;  %6243 = vmatprep.subr.bf16.mxu0 %v6242_v13  ;;  %6305 = vmatpush3.bf16.msra.mxu1 %v6304_v28  ;;  %832 = vst [vmem:[#allocation2 + $0x178] sm:$0x7f] %v799_v52  ;;  %v6248_v17 = vpack.c.bf16 %v7749_v42, %v7738_v33  ;;  %v6310_v23 = vpack.c.bf16 %v2263_v44, %v2262_v43  ;;  %v5567_v28 = vpop.f32.mrb[6].mxu1  ;;  %v1473_v33 = vld [vmem:[#allocation8 + $0x68] sm:$0xff] }
 0x1ac   : > { %5663 = vmatmul.mubr.f32.gmra.mrb[28].mxu0 %v7759_v61  ;;  %6307 = vmatprep.subr.bf16.mxu1 %v6306_v34  ;;  %v1042_v13 = vadd.f32 %v7521_v12, %v1026_v53  ;;  %v1025_v27 = vmul.f32 %v7516_v11, %v962_v14  ;;  %v7786_v34 = vld [vmem:[#allocation8 + $0xf0] sm:$0xff]  ;;  %v7788_v35 = vld [vmem:[#allocation8 + $0xf8] sm:$0xff]  ;;  %v6250_v43 = vpack.c.bf16 %v7765_v3, %v7763_v1  ;;  %v972_v3 = vpop.f32.mrb[7].mxu1 }
 0x1ad   : > { %v7774_v15 = vsel %vm711_vm0, %v733_v56, %v734_v50  ;;  %766 = vst [vmem:[#allocation2 + $0x150] sm:$0xfe] %v733_v56  ;;  %v7777_v20 = vsel %vm776_vm1, %v798_v57, %v799_v52  ;;  %1691 = vmatmul.mubr.f32.gmra.mrb[24].mxu1 %v7767_v16  ;;  %6245 = vmatpush3.bf16.msra.mxu0 %v6244_v40  ;;  %v7797_v44 = vld [vmem:[#allocation8 + $0x70] sm:$0xff]  ;;  %v7799_v47 = vld [vmem:[#allocation8 + $0x78] sm:$0xff]  ;;  %v2248_v56 = vld [vmem:[#allocation8 + $0x360] sm:$0xff] }
 0x1ae   : > { %8793 = vst [vmem:[#allocation19_spill] sm:$0xff] %v7777_v20  ;;  %831 = vst [vmem:[#allocation2 + $0x160] sm:$0xff] %v7777_v20  ;;  %1695 = vmatprep.mubr.f32.mxu1 %v7579_v19  ;;  %5665 = vmatprep.mubr.f32.mxu0 %v7744_v38  ;;  %v7790_v36 = vmax.f32 %v1042_v13, 0.0  ;;  %v1028_v40 = vmul.f32 %v5567_v28, %v7516_v11  ;;  %v7793_v42 = vld [vmem:[#allocation2 + $0x148] sm:$0xff]  ;;  %v6312_v50 = vpack.c.bf16 %v2247_v9, %v2246_v8  ;;  %v2266_v8 = vld [vmem:[#allocation8 + $0x3f0] sm:$0xff] }
 0x1af   : > { %6247 = vmatprep.subr.bf16.mxu0 %v6246_v63  ;;  %6309 = vmatpush3.bf16.msra.mxu1 %v6308_v7  ;;  %v1041_v52 = vadd.f32 %v7521_v12, %v1025_v27  ;;  %v6314_v53 = vpack.c.bf16 %v2265_v26, %v2264_v22  ;;  %v2249_v57 = vld [vmem:[#allocation8 + $0x368] sm:$0xff]  ;;  %v6252_v7 = vpack.c.bf16 %v1473_v33, %v7780_v21  ;;  %v2267_v9 = vld [vmem:[#allocation8 + $0x3f8] sm:$0xff]  ;;  %v5570_v22 = vpop.f32.mrb[8].mxu1  ;;  %v1492_v33 = vld [vmem:[#allocation8 + $0x100] sm:$0xff] }
 0x1b0   : > { %5666 = vmatmul.mubr.f32.gmra.mrb[30].mxu0 %v7793_v42  ;;  %6311 = vmatprep.subr.bf16.mxu1 %v6310_v23  ;;  %1075 = vst [vmem:[#allocation2 + $0x200] sm:$0xff] %v7790_v36  ;;  %v1173_v63 = vrot.slane %v7790_v36, 1  ;;  %v1044_v1 = vadd.f32 %v7521_v12, %v1028_v40  ;;  %v1109_v13 = vrot.slane %v7790_v36, 7  ;;  %v1027_v14 = vmul.f32 %v7516_v11, %v972_v3  ;;  %v1493_v36 = vld [vmem:[#allocation8 + $0x108] sm:$0xff] }
 0x1b1   : > { %1696 = vmatmul.mubr.f32.gmra.mrb[26].mxu1 %v7627_v60  ;;  %6249 = vmatpush3.bf16.msra.mxu0 %v6248_v17  ;;  %v1057_v23 = vmax.f32 %v1041_v52, 0.0  ;;  %v6254_v26 = vpack.c.bf16 %v7788_v35, %v7786_v34  ;;  %v6256_v17 = vpack.c.bf16 %v7799_v47, %v7797_v44  ;;  %v1030_v27 = vmul.f32 %v5570_v22, %v7516_v11  ;;  %v7820_v34 = vld [vmem:[#allocation2 + $0xc0] sm:$0xff]  ;;  %v2250_v44 = vld [vmem:[#allocation8 + $0x370] sm:$0xff]  ;;  %v2251_v47 = vld [vmem:[#allocation8 + $0x378] sm:$0xff] }
 0x1b2   : > { %1700 = vmatprep.mubr.f32.mxu1 %v7630_v62  ;;  %5668 = vmatprep.mubr.f32.mxu0 %v7777_v20  ;;  %1211 = vst [vmem:[#allocation2 + $0x208] sm:$0x7f] %v1173_v63  ;;  %v1060_v21 = vmax.f32 %v1044_v1, 0.0  ;;  %v7817_v28 = vld [vmem:[#allocation2 + $0x178] sm:$0xff]  ;;  %v6316_v40 = vpack.c.bf16 %v2249_v57, %v2248_v56  ;;  %v1043_v20 = vadd.f32 %v7521_v12, %v1027_v14  ;;  %v7825_v56 = vld [vmem:[#allocation2 + $0x1a8] sm:$0xff] }
 0x1b3   : > { %6251 = vmatprep.subr.bf16.mxu0 %v6250_v43  ;;  %6313 = vmatpush3.bf16.msra.mxu1 %v6312_v50  ;;  %1074 = vst [vmem:[#allocation2 + $0x1e8] sm:$0xff] %v1057_v23  ;;  %v1108_v52 = vrot.slane %v1057_v23, 7  ;;  %v1172_v3 = vrot.slane %v1057_v23, 1  ;;  %v6318_v35 = vpack.c.bf16 %v2267_v9, %v2266_v8  ;;  %v1046_v22 = vadd.f32 %v7521_v12, %v1030_v27  ;;  %v982_v50 = vpop.f32.mrb[9].mxu1 }
 0x1b4   : > { %5669 = vmatmul.mubr.f32.gmra.mrb[32].mxu0 %v7817_v28  ;;  %6315 = vmatprep.subr.bf16.mxu1 %v6314_v53  ;;  %1077 = vst [vmem:[#allocation2 + $0x230] sm:$0xff] %v1060_v21  ;;  %v1112_v43 = vrot.slane %v1060_v21, 7  ;;  %v1176_v1 = vrot.slane %v1060_v21, 1  ;;  %v1059_v53 = vmax.f32 %v1043_v20, 0.0  ;;  %v1029_v8 = vmul.f32 %v7516_v11, %v982_v50  ;;  %v5573_v9 = vpop.f32.mrb[10].mxu1 }
 0x1b5   : > { %1701 = vmatmul.mubr.f32.gmra.mrb[28].mxu1 %v7820_v34  ;;  %6253 = vmatpush3.bf16.msra.mxu0 %v6252_v7  ;;  %v1110_v57 = vsel %vm711_vm0, %v1108_v52, %v1109_v13  ;;  %1146 = vst [vmem:[#allocation2 + $0x1e0] sm:$0xfe] %v1108_v52  ;;  %v7829_v23 = vsel %vm776_vm1, %v1172_v3, %v1173_v63  ;;  %v1062_v7 = vmax.f32 %v1046_v22, 0.0  ;;  %v1494_v52 = vld [vmem:[#allocation8 + $0x110] sm:$0xff]  ;;  %v992_v22 = vpop.f32.mrb[11].mxu1 }
 0x1b6   : > { %1705 = vmatprep.mubr.f32.mxu1 %v7614_v51  ;;  %5671 = vmatprep.mubr.f32.mxu0 %v7549_v49  ;;  %v6258_v14 = vpack.c.bf16 %v1493_v36, %v1492_v33  ;;  %1147 = vst [vmem:[#allocation2 + $0x1f8] sm:$0xff] %v1110_v57  ;;  %1210 = vst [vmem:[#allocation2 + $0x1f0] sm:$0xff] %v7829_v23  ;;  %v1032_v13 = vmul.f32 %v5573_v9, %v7516_v11  ;;  %v1111_v20 = vrot.slane %v1059_v53, 7  ;;  %v1495_v49 = vld [vmem:[#allocation8 + $0x118] sm:$0xff]  ;;  %v5576_v50 = vpop.f32.mrb[12].mxu1  ;;  %v7852_v9 = vld [vmem:[#allocation2 + $0xf0] sm:$0xff] }
 0x1b7   : > { %1213 = vst [vmem:[#allocation2 + $0x238] sm:$0x7f] %v1176_v1  ;;  %6255 = vmatprep.subr.bf16.mxu0 %v6254_v26  ;;  %6317 = vmatpush3.bf16.msra.mxu1 %v6316_v40  ;;  %v6320_v63 = vpack.c.bf16 %v2251_v47, %v2250_v44  ;;  %1076 = vst [vmem:[#allocation2 + $0x218] sm:$0xff] %v1059_v53  ;;  %v1175_v21 = vrot.slane %v1059_v53, 1  ;;  %v1045_v27 = vadd.f32 %v7521_v12, %v1029_v8 }
 0x1b8   : > { %5672 = vmatmul.mubr.f32.gmra.mrb[34].mxu0 %v7825_v56  ;;  %6319 = vmatprep.subr.bf16.mxu1 %v6318_v35  ;;  %1079 = vst [vmem:[#allocation2 + $0x260] sm:$0xff] %v1062_v7  ;;  %v1115_v33 = vrot.slane %v1062_v7, 7  ;;  %v1179_v36 = vrot.slane %v1062_v7, 1  ;;  %v1048_v3 = vadd.f32 %v7521_v12, %v1032_v13  ;;  %v1113_v26 = vsel %vm711_vm0, %v1111_v20, %v1112_v43  ;;  %v7846_v35 = vld [vmem:[#allocation2 + $0x20] sm:$0xff]  ;;  %v1497_v13 = vld [vmem:[#allocation8 + $0x128] sm:$0xff] }
 0x1b9   : > { %1706 = vmatmul.mubr.f32.gmra.mrb[30].mxu1 %v7675_v29  ;;  %6257 = vmatpush3.bf16.msra.mxu0 %v6256_v17  ;;  %1148 = vst [vmem:[#allocation2 + $0x210] sm:$0xfe] %v1111_v20  ;;  %v7842_v40 = vsel %vm776_vm1, %v1175_v21, %v1176_v1  ;;  %v1061_v44 = vmax.f32 %v1045_v27, 0.0  ;;  %v1031_v47 = vmul.f32 %v7516_v11, %v992_v22  ;;  %1149 = vst [vmem:[#allocation2 + $0x228] sm:$0xff] %v1113_v26  ;;  %v1496_v7 = vld [vmem:[#allocation8 + $0x120] sm:$0xff] }
 0x1ba   : > { %1710 = vmatprep.mubr.f32.mxu1 %v7678_v32  ;;  %1960 = vmatprep.mubr.f32.mxu0 %v7846_v35  ;;  %1212 = vst [vmem:[#allocation2 + $0x220] sm:$0xff] %v7842_v40  ;;  %1215 = vst [vmem:[#allocation2 + $0x268] sm:$0x7f] %v1179_v36  ;;  %v1064_v17 = vmax.f32 %v1048_v3, 0.0  ;;  %v1034_v43 = vmul.f32 %v5576_v50, %v7516_v11  ;;  %v6262_v1 = vpack.c.bf16 %v1495_v49, %v1494_v52  ;;  %v1002_v3 = vpop.f32.mrb[13].mxu1 }
 0x1bb   : > { %6259 = vmatprep.subr.bf16.mxu0 %v6258_v14  ;;  %6321 = vmatpush3.bf16.msra.mxu1 %v6320_v63  ;;  %1078 = vst [vmem:[#allocation2 + $0x248] sm:$0xff] %v1061_v44  ;;  %v1114_v57 = vrot.slane %v1061_v44, 7  ;;  %v1178_v53 = vrot.slane %v1061_v44, 1  ;;  %v1047_v8 = vadd.f32 %v7521_v12, %v1031_v47  ;;  %v1033_v22 = vmul.f32 %v7516_v11, %v1002_v3  ;;  %v5579_v26 = vpop.f32.mrb[14].mxu1 }
 0x1bc   : > { %1961 = vmatmul.mubr.f32.vlgmr.msra.gmra.mrb[36].mxu0 %v7846_v35  ;;  %1081 = vst [vmem:[#allocation2 + $0x290] sm:$0xff] %v1064_v17  ;;  %v1118_v20 = vrot.slane %v1064_v17, 7  ;;  %v1182_v21 = vrot.slane %v1064_v17, 1  ;;  %v1050_v27 = vadd.f32 %v7521_v12, %v1034_v43  ;;  %v1498_v17 = vld [vmem:[#allocation8 + $0x130] sm:$0xff]  ;;  %v1499_v43 = vld [vmem:[#allocation8 + $0x138] sm:$0xff]  ;;  %v1012_v3 = vpop.f32.mrb[15].mxu1 }
 0x1bd   : > { %1711 = vmatmul.mubr.f32.gmra.mrb[32].mxu1 %v7852_v9  ;;  %6261 = vmatpush3.bf16.msra.mxu0 %v6258_v14  ;;  %v1116_v63 = vsel %vm711_vm0, %v1114_v57, %v1115_v33  ;;  %1150 = vst [vmem:[#allocation2 + $0x240] sm:$0xfe] %v1114_v57  ;;  %v7859_v52 = vsel %vm776_vm1, %v1178_v53, %v1179_v36  ;;  %v1063_v49 = vmax.f32 %v1047_v8, 0.0 }
 0x1be   : > { %1715 = vmatprep.mubr.f32.mxu1 %v7660_v18  ;;  %1965 = vmatprep.mubr.f32.mxu0 %v7846_v35  ;;  %1151 = vst [vmem:[#allocation2 + $0x258] sm:$0xff] %v1116_v63  ;;  %1214 = vst [vmem:[#allocation2 + $0x250] sm:$0xff] %v7859_v52  ;;  %v1066_v44 = vmax.f32 %v1050_v27, 0.0  ;;  %v1036_v14 = vmul.f32 %v5579_v26, %v7516_v11  ;;  %v6266_v33 = vpack.c.bf16 %v1497_v13, %v1496_v7 }
 0x1bf   : > { %1217 = vst [vmem:[#allocation2 + $0x298] sm:$0x7f] %v1182_v21  ;;  %6263 = vmatprep.subr.bf16.mxu0 %v6262_v1  ;;  %1080 = vst [vmem:[#allocation2 + $0x278] sm:$0xff] %v1063_v49  ;;  %v1117_v36 = vrot.slane %v1063_v49, 7  ;;  %v1181_v47 = vrot.slane %v1063_v49, 1  ;;  %v1049_v50 = vadd.f32 %v7521_v12, %v1033_v22  ;;  %v1035_v63 = vmul.f32 %v7516_v11, %v1012_v3  ;;  %v5614_v49 = vpop.f32.mrb[16].mxu0 }
 0x1c0   : > { %1966 = vmatmul.mubr.f32.gmra.mrb[38].mxu0 %v7846_v35  ;;  %1083 = vst [vmem:[#allocation2 + $0x2c0] sm:$0xff] %v1066_v44  ;;  %v1121_v57 = vrot.slane %v1066_v44, 7  ;;  %v1185_v53 = vrot.slane %v1066_v44, 1  ;;  %v1052_v8 = vadd.f32 %v7521_v12, %v1036_v14  ;;  %v6270_v22 = vpack.c.bf16 %v1499_v43, %v1498_v17  ;;  %v7888_v14 = vld [vmem:[#allocation2 + $0x120] sm:$0xff]  ;;  %v1319_v17 = vpop.f32.mrb[17].mxu0 }
 0x1c1   : > { %1716 = vmatmul.mubr.f32.gmra.mrb[34].mxu1 %v7710_v4  ;;  %1970 = vmatprep.mubr.f32.mxu0 %v7544_v46  ;;  %v7872_v7 = vsel %vm711_vm0, %v1117_v36, %v1118_v20  ;;  %1152 = vst [vmem:[#allocation2 + $0x270] sm:$0xfe] %v1117_v36  ;;  %v7875_v13 = vsel %vm776_vm1, %v1181_v47, %v1182_v21  ;;  %v7877_v27 = vmax.f32 %v1049_v50, 0.0  ;;  %v1501_v36 = vld [vmem:[#allocation8 + $0x148] sm:$0xff] }
 0x1c2   : > { %1720 = vmatprep.mubr.f32.mxu1 %v7715_v6  ;;  %6265 = vmatpush3.bf16.msra.mxu0 %v6262_v1  ;;  %1153 = vst [vmem:[#allocation2 + $0x288] sm:$0xff] %v7872_v7  ;;  %1216 = vst [vmem:[#allocation2 + $0x280] sm:$0xff] %v7875_v13  ;;  %v1068_v46 = vmax.f32 %v1052_v8, 0.0  ;;  %v1339_v20 = vmul.f32 %v5614_v49, %v7516_v11  ;;  %v1051_v44 = vadd.f32 %v7521_v12, %v1035_v63  ;;  %v1500_v1 = vld [vmem:[#allocation8 + $0x140] sm:$0xff] }
 0x1c3   : > { %1219 = vst [vmem:[#allocation2 + $0x2c8] sm:$0x7f] %v1185_v53  ;;  %6267 = vmatprep.subr.bf16.mxu0 %v6266_v33  ;;  %1082 = vst [vmem:[#allocation2 + $0x2a8] sm:$0xff] %v7877_v27  ;;  %v1120_v21 = vrot.slane %v7877_v27, 7  ;;  %v1184_v26 = vrot.slane %v7877_v27, 1  ;;  %v1338_v63 = vmul.f32 %v7516_v11, %v1319_v17  ;;  %v1505_v17 = vld [vmem:[#allocation8 + $0x168] sm:$0xff] }
 0x1c4   : > { %1971 = vmatmul.mubr.f32.gmra.mrb[40].mxu0 %v7617_v54  ;;  %1085 = vst [vmem:[#allocation2 + $0x2f0] sm:$0xff] %v1068_v46  ;;  %v1124_v47 = vrot.slane %v1068_v46, 7  ;;  %v1188_v50 = vrot.slane %v1068_v46, 1  ;;  %v1343_v8 = vadd.f32 %v7521_v12, %v1339_v20  ;;  %v7900_v54 = vmax.f32 %v1051_v44, 0.0  ;;  %v6872_v11 = vld [vmem:[%s8754_s3] ss:$0 sm:$0xff] }
 0x1c5   : > { %1721 = vmatmul.mubr.f32.gmra.mrb[36].mxu1 %v7888_v14  ;;  %1975 = vmatprep.mubr.f32.mxu0 %v7539_v41  ;;  %v7895_v43 = vsel %vm711_vm0, %v1120_v21, %v1121_v57  ;;  %1154 = vst [vmem:[#allocation2 + $0x2a0] sm:$0xfe] %v1120_v21  ;;  %v7898_v3 = vsel %vm776_vm1, %v1184_v26, %v1185_v53  ;;  %v1503_v46 = vld [vmem:[#allocation8 + $0x158] sm:$0xff] }
 0x1c6   : > { %1725 = vmatprep.mubr.f32.mxu1 %v7701_v55  ;;  %6269 = vmatpush3.bf16.msra.mxu0 %v6266_v33  ;;  %1155 = vst [vmem:[#allocation2 + $0x2b8] sm:$0xff] %v7895_v43  ;;  %1218 = vst [vmem:[#allocation2 + $0x2b0] sm:$0xff] %v7898_v3  ;;  %v1347_v12 = vmax.f32 %v1343_v8, 0.0  ;;  %v6274_v41 = vpack.c.bf16 %v1501_v36, %v1500_v1  ;;  %v1123_v57 = vrot.slane %v7900_v54, 7  ;;  %v1187_v53 = vrot.slane %v7900_v54, 1  ;;  %v1502_v33 = vld [vmem:[#allocation8 + $0x150] sm:$0xff] }
 0x1c7   : > { %1221 = vst [vmem:[#allocation2 + $0x2f8] sm:$0x7f] %v1188_v50  ;;  %6271 = vmatprep.subr.bf16.mxu0 %v6270_v22  ;;  %1084 = vst [vmem:[#allocation2 + $0x2d8] sm:$0xff] %v7900_v54  ;;  %v1342_v49 = vadd.f32 %v6872_v11, %v1338_v63  ;;  %v7924_v8 = vld [vmem:[#allocation2 + $0x150] sm:$0xff]  ;;  %v7938_v11 = vld [vmem:[#allocation2 + $0x188] sm:$0xff] }
 0x1c8   : > { %1976 = vmatmul.mubr.f32.gmra.mrb[42].mxu0 %v7563_v0  ;;  %1352 = vst [vmem:[#allocation2 + $0x320] sm:$0xff] %v1347_v12  ;;  %v1376_v20 = vrot.slane %v1347_v12, 1  ;;  %v7916_v21 = vsel %vm711_vm0, %v1123_v57, %v1124_v47  ;;  %1156 = vst [vmem:[#allocation2 + $0x2d0] sm:$0xfe] %v1123_v57  ;;  %v7919_v26 = vsel %vm776_vm1, %v1187_v53, %v1188_v50  ;;  %v1360_v44 = vrot.slane %v1347_v12, 7  ;;  %v1504_v50 = vld [vmem:[#allocation8 + $0x160] sm:$0xff] }
 0x1c9   : > { %1726 = vmatmul.mubr.f32.gmra.mrb[38].mxu1 %v7741_v37  ;;  %1980 = vmatprep.mubr.f32.mxu0 %v7566_v2  ;;  %v1346_v1 = vmax.f32 %v1342_v49, 0.0  ;;  %1157 = vst [vmem:[#allocation2 + $0x2e8] sm:$0xff] %v7916_v21  ;;  %1220 = vst [vmem:[#allocation2 + $0x2e0] sm:$0xff] %v7919_v26  ;;  %v6278_v0 = vpack.c.bf16 %v1503_v46, %v1502_v33  ;;  %v6282_v12 = vpack.c.bf16 %v1505_v17, %v1504_v50  ;;  %v1506_v57 = vld [vmem:[#allocation8 + $0x170] sm:$0xff]  ;;  %v1507_v53 = vld [vmem:[#allocation8 + $0x178] sm:$0xff] }
 0x1ca   : > { %1730 = vmatprep.mubr.f32.mxu1 %v7746_v39  ;;  %6273 = vmatpush3.bf16.msra.mxu0 %v6270_v22  ;;  %1386 = vst [vmem:[#allocation2 + $0x328] sm:$0x7f] %v1376_v20  ;;  %v7941_v49 = vld [vmem:[#allocation2 + $0x180] sm:$0xff]  ;;  %v2269_v46 = vld [vmem:[#allocation8 + $0x408] sm:$0xff]  ;;  %v8014_v17 = vld [vmem:[#allocation2 + $0x1d0] sm:$0xff] }
 0x1cb   : > { %6275 = vmatprep.subr.bf16.mxu0 %v6274_v41  ;;  %1351 = vst [vmem:[#allocation2 + $0x308] sm:$0xff] %v1346_v1  ;;  %v1359_v36 = vrot.slane %v1346_v1, 7  ;;  %v1375_v47 = vrot.slane %v1346_v1, 1  ;;  %v2268_v33 = vld [vmem:[#allocation8 + $0x400] sm:$0xff]  ;;  %v7950_v1 = vld [vmem:[#allocation2 + $0x198] sm:$0xff] }
 0x1cc   : > { %1981 = vmatmul.mubr.f32.gmra.mrb[44].mxu0 %v7704_v58  ;;  %v8794_v50 = vld [vmem:[#allocation19_spill] sm:$0xff] }
 0x1cd   : > { %1731 = vmatmul.mubr.f32.gmra.mrb[40].mxu1 %v7924_v8  ;;  %1985 = vmatprep.mubr.f32.mxu0 %v7559_v59  ;;  %v1361_v22 = vsel %vm711_vm0, %v1359_v36, %v1360_v44  ;;  %1369 = vst [vmem:[#allocation2 + $0x300] sm:$0xfe] %v1359_v36  ;;  %v7931_v63 = vsel %vm776_vm1, %v1375_v47, %v1376_v20  ;;  %v7946_v20 = vld [vmem:[#allocation2 + $0x1a0] sm:$0xff]  ;;  %v8009_v36 = vld [vmem:[#allocation2 + $0x1b0] sm:$0xff] }
 0x1ce   : > { %1735 = vmatprep.mubr.f32.mxu1 %v7735_v31  ;;  %6277 = vmatpush3.bf16.msra.mxu0 %v6274_v41  ;;  %1370 = vst [vmem:[#allocation2 + $0x318] sm:$0xff] %v1361_v22  ;;  %1385 = vst [vmem:[#allocation2 + $0x310] sm:$0xff] %v7931_v63  ;;  %v6286_v41 = vpack.c.bf16 %v1507_v53, %v1506_v57  ;;  %v6322_v44 = vpack.c.bf16 %v2269_v46, %v2268_v33  ;;  %v3101_v22 = vld [vmem:[#allocation8 + $0x290] sm:$0xff]  ;;  %v8018_v57 = vld [vmem:[#allocation2 + $0x1c8] sm:$0xff] }
 0x1cf   : > { %6279 = vmatprep.subr.bf16.mxu0 %v6278_v0  ;;  %v3105_v46 = vld [vmem:[#allocation8 + $0x2b0] sm:$0xff] }
 0x1d0   : > { %1986 = vmatmul.mubr.f32.gmra.mrb[46].mxu0 %v7590_v25 }
 0x1d1   : > { %1736 = vmatmul.mubr.f32.gmra.mrb[42].mxu1 %v7774_v15  ;;  %1990 = vmatprep.mubr.f32.mxu0 %v7593_v30 }
 0x1d2   : > { %1740 = vmatprep.mubr.f32.mxu1 %v7938_v11  ;;  %6281 = vmatpush3.bf16.msra.mxu0 %v6278_v0  ;;  %v8006_v0 = vld [vmem:[#allocation2 + $0x1b8] sm:$0xff] }
 0x1d3   : > { %6283 = vmatprep.subr.bf16.mxu0 %v6282_v12 }
 0x1d4   : > { %1991 = vmatmul.mubr.f32.gmra.mrb[48].mxu0 %v7767_v16 }
 0x1d5   : > { %1741 = vmatmul.mubr.f32.gmra.mrb[44].mxu1 %v7941_v49  ;;  %1995 = vmatprep.mubr.f32.mxu0 %v7579_v19 }
 0x1d6   : > { %1745 = vmatprep.mubr.f32.mxu1 %v7946_v20  ;;  %6285 = vmatpush3.bf16.msra.mxu0 %v6282_v12  ;;  %v3102_v12 = vld [vmem:[#allocation8 + $0x298] sm:$0xff] }
 0x1d7   : > { %6287 = vmatprep.subr.bf16.mxu0 %v6286_v41  ;;  %v6422_v53 = vpack.c.bf16 %v3102_v12, %v3101_v22  ;;  %v2975_v22 = vld [vmem:[#allocation8 + $0x28] sm:$0xff]  ;;  %v2992_v12 = vld [vmem:[#allocation8 + $0xb0] sm:$0xff] }
 0x1d8   : > { %1996 = vmatmul.mubr.f32.gmra.mrb[50].mxu0 %v7627_v60 }
 0x1d9   : > { %1746 = vmatmul.mubr.f32.gmra.mrb[46].mxu1 %v7950_v1  ;;  %2000 = vmatprep.mubr.f32.mxu0 %v7630_v62 }
 0x1da   : > { %2348 = vmatprep.mubr.f32.mxu1 %v7566_v2  ;;  %6289 = vmatpush3.bf16.msra.mxu0 %v6286_v41  ;;  %v3104_v41 = vld [vmem:[#allocation8 + $0x2a8] sm:$0xff] }
 0x1db   : > { %6323 = vmatprep.subr.bf16.mxu0 %v6322_v44 }
 0x1dc   : > { %2001 = vmatmul.mubr.f32.gmra.mrb[52].mxu0 %v7820_v34 }
 0x1dd   : > { %2349 = vmatmul.mubr.f32.vlgmr.msra.gmra.mrb[48].mxu1 %v7704_v58  ;;  %2005 = vmatprep.mubr.f32.mxu0 %v7614_v51  ;;  %v1426_v58 = vld [vmem:[#allocation2 + $0x70] sm:$0xff] }
 0x1de   : > { %2353 = vmatprep.mubr.f32.mxu1 %v7559_v59  ;;  %v5617_v59 = vpop.f32.mrb[18].mxu0 }
 0x1df   : > { %v1329_v2 = vpop.f32.mrb[19].mxu0  ;;  %v3108_v59 = vld [vmem:[#allocation8 + $0x2c8] sm:$0xff] }
 0x1e0   : > { %2006 = vmatmul.mubr.f32.gmra.mrb[54].mxu0 %v7675_v29  ;;  %v2207_v2 = vld [vmem:[#allocation2 + $0x100] sm:$0xff] }
 0x1e1   : > { %2354 = vmatmul.mubr.f32.gmra.mrb[50].mxu1 %v7590_v25  ;;  %2010 = vmatprep.mubr.f32.mxu0 %v7678_v32  ;;  %v2271_v25 = vld [vmem:[#allocation8 + $0x418] sm:$0xff] }
 0x1e2   : > { %2358 = vmatprep.mubr.f32.mxu1 %v7593_v30 }
 0x1e4   : > { %2011 = vmatmul.mubr.f32.gmra.mrb[56].mxu0 %v7852_v9 }
 0x1e5   : > { %2359 = vmatmul.mubr.f32.gmra.mrb[52].mxu1 %v7767_v16  ;;  %2015 = vmatprep.mubr.f32.mxu0 %v7660_v18  ;;  %v1432_v16 = vld [vmem:[#allocation2 + $0xa0] sm:$0xff] }
 0x1e6   : > { %2363 = vmatprep.mubr.f32.mxu1 %v7579_v19  ;;  %v2270_v19 = vld [vmem:[#allocation8 + $0x410] sm:$0xff] }
 0x1e7   : > { %v6326_v30 = vpack.c.bf16 %v2271_v25, %v2270_v19  ;;  %v3109_v25 = vld [vmem:[#allocation8 + $0x2d0] sm:$0xff] }
 0x1e8   : > { %2016 = vmatmul.mubr.f32.gmra.mrb[58].mxu0 %v7710_v4 }
 0x1e9   : > { %2364 = vmatmul.mubr.f32.gmra.mrb[54].mxu1 %v7627_v60  ;;  %2020 = vmatprep.mubr.f32.mxu0 %v7715_v6  ;;  %v2273_v60 = vld [vmem:[#allocation8 + $0x428] sm:$0xff] }
 0x1ea   : > { %2368 = vmatprep.mubr.f32.mxu1 %v7630_v62  ;;  %v1420_v62 = vld [vmem:[#allocation2 + $0x40] sm:$0xff] }
 0x1ec   : > { %2021 = vmatmul.mubr.f32.gmra.mrb[60].mxu0 %v7888_v14 }
 0x1ed   : > { %2369 = vmatmul.mubr.f32.gmra.mrb[56].mxu1 %v7820_v34  ;;  %2025 = vmatprep.mubr.f32.mxu0 %v7701_v55  ;;  %v1438_v34 = vld [vmem:[#allocation2 + $0xd0] sm:$0xff] }
 0x1ee   : > { %2373 = vmatprep.mubr.f32.mxu1 %v7614_v51  ;;  %v2272_v51 = vld [vmem:[#allocation8 + $0x420] sm:$0xff] }
 0x1f0   : > { %2026 = vmatmul.mubr.f32.gmra.mrb[62].mxu0 %v7741_v37 }
 0x1f1   : > { %2374 = vmatmul.mubr.f32.gmra.mrb[58].mxu1 %v7675_v29  ;;  %2030 = vmatprep.mubr.f32.mxu0 %v7746_v39  ;;  %v2274_v29 = vld [vmem:[#allocation8 + $0x430] sm:$0xff] }
 0x1f2   : > { %2378 = vmatprep.mubr.f32.mxu1 %v7678_v32  ;;  %v2275_v32 = vld [vmem:[#allocation8 + $0x438] sm:$0xff] }
 0x1f4   : > { %2031 = vmatmul.mubr.f32.gmra.mrb[64].mxu0 %v7924_v8 }
 0x1f5   : > { %2379 = vmatmul.mubr.f32.gmra.mrb[60].mxu1 %v7852_v9  ;;  %2035 = vmatprep.mubr.f32.mxu0 %v7735_v31  ;;  %v2282_v9 = vld [vmem:[#allocation8 + $0x470] sm:$0xff] }
 0x1f6   : > { %2383 = vmatprep.mubr.f32.mxu1 %v7660_v18  ;;  %v6330_v18 = vpack.c.bf16 %v2273_v60, %v2272_v51  ;;  %v2213_v51 = vld [vmem:[#allocation2 + $0x130] sm:$0xff]  ;;  %v3111_v60 = vld [vmem:[#allocation8 + $0x2e0] sm:$0xff] }
 0x1f8   : > { %2036 = vmatmul.mubr.f32.gmra.mrb[66].mxu0 %v7774_v15 }
 0x1f9   : > { %2384 = vmatmul.mubr.f32.gmra.mrb[62].mxu1 %v7710_v4  ;;  %5706 = vmatprep.mubr.f32.mxu0 %v7846_v35  ;;  %v6334_v4 = vpack.c.bf16 %v2275_v32, %v2274_v29  ;;  %v3113_v29 = vld [vmem:[#allocation8 + $0x2f0] sm:$0xff]  ;;  %v3114_v32 = vld [vmem:[#allocation8 + $0x2f8] sm:$0xff] }
 0x1fa   : > { %2388 = vmatprep.mubr.f32.mxu1 %v7715_v6  ;;  %v2276_v6 = vld [vmem:[#allocation8 + $0x440] sm:$0xff] }
 0x1fc   : > { %5707 = vmatmul.mubr.f32.vlgmr.msra.gmra.mrb[20].mxu0 %v7846_v35  ;;  %v2280_v35 = vld [vmem:[#allocation8 + $0x460] sm:$0xff] }
 0x1fd   : > { %2389 = vmatmul.mubr.f32.gmra.mrb[64].mxu1 %v7888_v14  ;;  %6325 = vmatpush3.bf16.msra.mxu0 %v6322_v44  ;;  %v2283_v14 = vld [vmem:[#allocation8 + $0x478] sm:$0xff] }
 0x1fe   : > { %2393 = vmatprep.mubr.f32.mxu1 %v7701_v55  ;;  %5709 = vmatprep.mubr.f32.mxu0 %v1420_v62  ;;  %v2277_v55 = vld [vmem:[#allocation8 + $0x448] sm:$0xff]  ;;  %v6350_v47 = vpack.c.bf16 %v2283_v14, %v2282_v9  ;;  %v2650_v9 = vld [vmem:[#allocation9] sm:$0xff] }
 0x1ff   : > { %6327 = vmatprep.subr.bf16.mxu0 %v6326_v30  ;;  %v3112_v62 = vld [vmem:[#allocation8 + $0x2e8] sm:$0xff] }
 0x200   : > { %5710 = vmatmul.mubr.f32.gmra.mrb[22].mxu0 %v7607_v45  ;;  %v6338_v45 = vpack.c.bf16 %v2277_v55, %v2276_v6  ;;  %v2987_v6 = vld [vmem:[#allocation8 + $0x88] sm:$0xff] }
 0x201   : > { %2394 = vmatmul.mubr.f32.gmra.mrb[66].mxu1 %v7741_v37  ;;  %6329 = vmatpush3.bf16.msra.mxu0 %v6326_v30  ;;  %v2278_v37 = vld [vmem:[#allocation8 + $0x450] sm:$0xff]  ;;  %v3110_v30 = vld [vmem:[#allocation8 + $0x2d8] sm:$0xff]  ;;  %v2651_v14 = vld [vmem:[#allocation9 + $0x8] sm:$0xff] }
 0x202   : > { %2398 = vmatprep.mubr.f32.mxu1 %v7746_v39  ;;  %5712 = vmatprep.mubr.f32.mxu0 %v1426_v58  ;;  %v2279_v39 = vld [vmem:[#allocation8 + $0x458] sm:$0xff] }
 0x203   : > { %6331 = vmatprep.subr.bf16.mxu0 %v6330_v18 }
 0x204   : > { %5713 = vmatmul.mubr.f32.gmra.mrb[24].mxu0 %v7652_v10  ;;  %v6342_v10 = vpack.c.bf16 %v2279_v39, %v2278_v37  ;;  %v8030_v37 = vld [vmem:[#allocation2 + $0x1d8] sm:$0xff] }
 0x205   : > { %2399 = vmatmul.mubr.f32.gmra.mrb[68].mxu1 %v7924_v8  ;;  %6333 = vmatpush3.bf16.msra.mxu0 %v6330_v18  ;;  %v3100_v8 = vld [vmem:[#allocation8 + $0x288] sm:$0xff]  ;;  %v2219_v18 = vld [vmem:[#allocation2 + $0x160] sm:$0xff]  ;;  %v2989_v39 = vld [vmem:[#allocation8 + $0x98] sm:$0xff] }
 0x206   : > { %2403 = vmatprep.mubr.f32.mxu1 %v7735_v31  ;;  %5715 = vmatprep.mubr.f32.mxu0 %v1432_v16  ;;  %v2281_v31 = vld [vmem:[#allocation8 + $0x468] sm:$0xff] }
 0x207   : > { %6335 = vmatprep.subr.bf16.mxu0 %v6334_v4 }
 0x208   : > { %5716 = vmatmul.mubr.f32.gmra.mrb[26].mxu0 %v7693_v48 }
 0x209   : > { %2404 = vmatmul.mubr.f32.gmra.mrb[70].mxu1 %v7774_v15  ;;  %6337 = vmatpush3.bf16.msra.mxu0 %v6334_v4  ;;  %v6346_v15 = vpack.c.bf16 %v2281_v31, %v2280_v35  ;;  %v2986_v4 = vld [vmem:[#allocation8 + $0x80] sm:$0xff]  ;;  %v2972_v35 = vld [vmem:[#allocation8 + $0x10] sm:$0xff] }
 0x20a   : > { %2408 = vmatprep.mubr.f32.mxu1 %v7938_v11  ;;  %5718 = vmatprep.mubr.f32.mxu0 %v1438_v34  ;;  %v3103_v11 = vld [vmem:[#allocation8 + $0x2a0] sm:$0xff]  ;;  %v6450_v55 = vpack.c.bf16 %v2987_v6, %v2986_v4  ;;  %v2655_v4 = vld [vmem:[#allocation9 + $0x28] sm:$0xff] }
 0x20b   : > { %6339 = vmatprep.subr.bf16.mxu0 %v6338_v45  ;;  %v6426_v33 = vpack.c.bf16 %v3104_v41, %v3103_v11  ;;  %v2990_v31 = vld [vmem:[#allocation8 + $0xa0] sm:$0xff]  ;;  %v8039_v11 = vld [vmem:[#allocation2 + $0x238] sm:$0xff]  ;;  %v8051_v6 = vld [vmem:[#allocation2 + $0x2c8] sm:$0xff] }
 0x20c   : > { %5719 = vmatmul.mubr.f32.gmra.mrb[28].mxu0 %v7729_v24 }
 0x20d   : > { %2409 = vmatmul.mubr.f32.gmra.mrb[72].mxu1 %v7941_v49  ;;  %6341 = vmatpush3.bf16.msra.mxu0 %v6338_v45  ;;  %v6880_v49 = vld [vmem:[#allocation2 + $0x88] sm:$0xff] }
 0x20e   : > { %2413 = vmatprep.mubr.f32.mxu1 %v7946_v20  ;;  %5721 = vmatprep.mubr.f32.mxu0 %v7713_v5  ;;  %v3099_v5 = vld [vmem:[#allocation8 + $0x280] sm:$0xff]  ;;  %v3106_v20 = vld [vmem:[#allocation8 + $0x2b8] sm:$0xff]  ;;  %v2971_v45 = vld [vmem:[#allocation8 + $0x8] sm:$0xff] }
 0x20f   : > { %6343 = vmatprep.subr.bf16.mxu0 %v6342_v10  ;;  %v6430_v44 = vpack.c.bf16 %v3106_v20, %v3105_v46  ;;  %v2994_v46 = vld [vmem:[#allocation8 + $0xc0] sm:$0xff]  ;;  %v2995_v20 = vld [vmem:[#allocation8 + $0xc8] sm:$0xff] }
 0x210   : > { %5722 = vmatmul.mubr.f32.gmra.mrb[30].mxu0 %v7759_v61 }
 0x211   : > { %2414 = vmatmul.mubr.f32.gmra.mrb[74].mxu1 %v7950_v1  ;;  %6345 = vmatpush3.bf16.msra.mxu0 %v6342_v10  ;;  %v3107_v1 = vld [vmem:[#allocation8 + $0x2c0] sm:$0xff] }
 0x212   : > { %5724 = vmatprep.mubr.f32.mxu0 %v7744_v38  ;;  %2418 = vmatprep.mubr.f32.mxu1 %v8006_v0  ;;  %v6418_v38 = vpack.c.bf16 %v3100_v8, %v3099_v5  ;;  %v6434_v19 = vpack.c.bf16 %v3108_v59, %v3107_v1  ;;  %v6354_v8 = vpack.c.bf16 %v2651_v14, %v2650_v9  ;;  %v2653_v1 = vld [vmem:[#allocation9 + $0x18] sm:$0xff]  ;;  %v8043_v59 = vld [vmem:[#allocation2 + $0x268] sm:$0xff]  ;;  %v2656_v9 = vld [vmem:[#allocation9 + $0x30] sm:$0xff] }
 0x213   : > { %6347 = vmatprep.subr.bf16.mxu0 %v6346_v15  ;;  %v2657_v14 = vld [vmem:[#allocation9 + $0x38] sm:$0xff] }
 0x214   : > { %5725 = vmatmul.mubr.f32.gmra.mrb[32].mxu0 %v7793_v42  ;;  %6355 = vmatprep.subr.bf16.mxu1 %v6354_v8 }
 0x215   : > { %2419 = vmatmul.mubr.f32.gmra.mrb[76].mxu1 %v8009_v36  ;;  %6349 = vmatpush3.bf16.msra.mxu0 %v6346_v15  ;;  %v2991_v15 = vld [vmem:[#allocation8 + $0xa8] sm:$0xff] }
 0x216   : > { %5727 = vmatprep.mubr.f32.mxu0 %v8794_v50  ;;  %2423 = vmatprep.mubr.f32.mxu1 %v8014_v17  ;;  %v6458_v50 = vpack.c.bf16 %v2991_v15, %v2990_v31  ;;  %v3002_v31 = vld [vmem:[#allocation8 + $0x100] sm:$0xff]  ;;  %v3003_v15 = vld [vmem:[#allocation8 + $0x108] sm:$0xff] }
 0x217   : > { %6351 = vmatprep.subr.bf16.mxu0 %v6350_v47  ;;  %6357 = vmatpush3.bf16.msra.mxu1 %v6354_v8 }
 0x218   : > { %5728 = vmatmul.mubr.f32.gmra.mrb[34].mxu0 %v7817_v28 }
 0x219   : > { %2424 = vmatmul.mubr.f32.gmra.mrb[78].mxu1 %v8018_v57  ;;  %6353 = vmatpush3.bf16.msra.mxu0 %v6350_v47  ;;  %v8035_v47 = vld [vmem:[#allocation2 + $0x208] sm:$0xff] }
 0x21a   : > { %5762 = vmatprep.mubr.f32.mxu0 %v1426_v58  ;;  %6419 = vmatprep.subr.bf16.mxu0 %v6418_v38  ;;  %v8026_v58 = vld [vmem:[#allocation2 + $0x190] sm:$0xff] }
 0x21c   : > { %5763 = vmatmul.mubr.f32.vlgmr.msra.gmra.mrb[20].mxu0 %v6880_v49  ;;  %v2976_v49 = vld [vmem:[#allocation8 + $0x30] sm:$0xff] }
 0x21d   : > { %5765 = vmatprep.mubr.f32.mxu0 %v1432_v16  ;;  %6421 = vmatpush3.bf16.msra.mxu0 %v6418_v38  ;;  %v2970_v16 = vld [vmem:[#allocation8] sm:$0xff] }
 0x21e   : > { %6423 = vmatprep.subr.bf16.mxu0 %v6422_v53  ;;  %v2974_v38 = vld [vmem:[#allocation8 + $0x20] sm:$0xff] }
 0x220   : > { %5766 = vmatmul.mubr.f32.gmra.mrb[22].mxu0 %v7693_v48  ;;  %v6438_v48 = vpack.c.bf16 %v3110_v30, %v3109_v25  ;;  %v2978_v25 = vld [vmem:[#allocation8 + $0x40] sm:$0xff]  ;;  %v2979_v30 = vld [vmem:[#allocation8 + $0x48] sm:$0xff] }
 0x221   : > { %5768 = vmatprep.mubr.f32.mxu0 %v1438_v34  ;;  %6425 = vmatpush3.bf16.msra.mxu0 %v6422_v53  ;;  %v6452_v34 = vpack.c.bf16 %v2971_v45, %v2970_v16  ;;  %v2993_v53 = vld [vmem:[#allocation8 + $0xb8] sm:$0xff]  ;;  %v2982_v16 = vld [vmem:[#allocation8 + $0x60] sm:$0xff]  ;;  %v2983_v45 = vld [vmem:[#allocation8 + $0x68] sm:$0xff] }
 0x222   : > { %6427 = vmatprep.subr.bf16.mxu0 %v6426_v33  ;;  %v6462_v41 = vpack.c.bf16 %v2993_v53, %v2992_v12  ;;  %v2923_v12 = vld [vmem:[#allocation2 + $0x188] sm:$0xff] }
 0x224   : > { %5769 = vmatmul.mubr.f32.gmra.mrb[24].mxu0 %v7729_v24  ;;  %v6442_v24 = vpack.c.bf16 %v3112_v62, %v3111_v60  ;;  %v8047_v60 = vld [vmem:[#allocation2 + $0x298] sm:$0xff] }
 0x225   : > { %5771 = vmatprep.mubr.f32.mxu0 %v2207_v2  ;;  %6429 = vmatpush3.bf16.msra.mxu0 %v6426_v33  ;;  %v2977_v33 = vld [vmem:[#allocation8 + $0x38] sm:$0xff] }
 0x226   : > { %6431 = vmatprep.subr.bf16.mxu0 %v6430_v44  ;;  %v6464_v2 = vpack.c.bf16 %v2977_v33, %v2976_v49  ;;  %v2926_v49 = vld [vmem:[#allocation2 + $0x1a0] sm:$0xff] }
 0x227   : > { %v2658_v33 = vld [vmem:[#allocation9 + $0x40] sm:$0xff] }
 0x228   : > { %5772 = vmatmul.mubr.f32.gmra.mrb[26].mxu0 %v7759_v61  ;;  %v6446_v61 = vpack.c.bf16 %v3114_v32, %v3113_v29  ;;  %v2998_v29 = vld [vmem:[#allocation8 + $0xe0] sm:$0xff]  ;;  %v2999_v32 = vld [vmem:[#allocation8 + $0xe8] sm:$0xff] }
 0x229   : > { %5774 = vmatprep.mubr.f32.mxu0 %v2213_v51  ;;  %6433 = vmatpush3.bf16.msra.mxu0 %v6430_v44  ;;  %v2652_v44 = vld [vmem:[#allocation9 + $0x10] sm:$0xff] }
 0x22a   : > { %6435 = vmatprep.subr.bf16.mxu0 %v6434_v19  ;;  %v2996_v51 = vld [vmem:[#allocation8 + $0xd0] sm:$0xff] }
 0x22c   : > { %5775 = vmatmul.mubr.f32.gmra.mrb[28].mxu0 %v7793_v42  ;;  %v6881_v42 = vld [vmem:[#allocation2 + $0x1c0] sm:$0xff] }
 0x22d   : > { %5777 = vmatprep.mubr.f32.mxu0 %v2219_v18  ;;  %6437 = vmatpush3.bf16.msra.mxu0 %v6434_v19  ;;  %v6466_v19 = vpack.c.bf16 %v2995_v20, %v2994_v46  ;;  %v2980_v18 = vld [vmem:[#allocation8 + $0x50] sm:$0xff]  ;;  %v2659_v46 = vld [vmem:[#allocation9 + $0x48] sm:$0xff] }
 0x22e   : > { %6439 = vmatprep.subr.bf16.mxu0 %v6438_v48  ;;  %v6370_v20 = vpack.c.bf16 %v2659_v46, %v2658_v33  ;;  %v6888_v33 = vld [vmem:[#allocation2 + $0x248] sm:$0xff]  ;;  %v2946_v46 = vld [vmem:[#allocation2 + $0x240] sm:$0xff] }
 0x230   : > { %5778 = vmatmul.mubr.f32.gmra.mrb[30].mxu0 %v7817_v28  ;;  %v2988_v28 = vld [vmem:[#allocation8 + $0x90] sm:$0xff] }
 0x231   : > { %5780 = vmatprep.mubr.f32.mxu0 %v8026_v58  ;;  %6441 = vmatpush3.bf16.msra.mxu0 %v6438_v48  ;;  %v6454_v10 = vpack.c.bf16 %v2989_v39, %v2988_v28  ;;  %v2997_v48 = vld [vmem:[#allocation8 + $0xd8] sm:$0xff]  ;;  %v3000_v28 = vld [vmem:[#allocation8 + $0xf0] sm:$0xff] }
 0x232   : > { %6443 = vmatprep.subr.bf16.mxu0 %v6442_v24  ;;  %v6470_v62 = vpack.c.bf16 %v2997_v48, %v2996_v51  ;;  %v3001_v39 = vld [vmem:[#allocation8 + $0xf8] sm:$0xff]  ;;  %v2660_v51 = vld [vmem:[#allocation9 + $0x50] sm:$0xff] }
 0x233   : > { %v2661_v48 = vld [vmem:[#allocation9 + $0x58] sm:$0xff] }
 0x234   : > { %5781 = vmatmul.mubr.f32.gmra.mrb[32].mxu0 %v7825_v56  ;;  %v2973_v56 = vld [vmem:[#allocation8 + $0x18] sm:$0xff] }
 0x235   : > { %5783 = vmatprep.mubr.f32.mxu0 %v6881_v42  ;;  %6445 = vmatpush3.bf16.msra.mxu0 %v6442_v24  ;;  %v6456_v5 = vpack.c.bf16 %v2973_v56, %v2972_v35  ;;  %v2981_v24 = vld [vmem:[#allocation8 + $0x58] sm:$0xff]  ;;  %v2984_v35 = vld [vmem:[#allocation8 + $0x70] sm:$0xff] }
 0x236   : > { %6447 = vmatprep.subr.bf16.mxu0 %v6446_v61  ;;  %v2985_v56 = vld [vmem:[#allocation8 + $0x78] sm:$0xff] }
 0x237   : > { %v6480_v8 = vpack.c.bf16 %v2985_v56, %v2984_v35 }
 0x238   : > { %5784 = vmatmul.mubr.f32.gmra.mrb[34].mxu0 %v8030_v37 }
 0x239   : > { %6449 = vmatpush3.bf16.msra.mxu0 %v6446_v61  ;;  %5874 = vmatprep.mubr.f32.mxu0 %v6881_v42  ;;  %v2654_v61 = vld [vmem:[#allocation9 + $0x20] sm:$0xff]  ;;  %v6472_v42 = vpack.c.bf16 %v2981_v24, %v2980_v18  ;;  %v3012_v18 = vld [vmem:[#allocation8 + $0x150] sm:$0xff]  ;;  %v3013_v24 = vld [vmem:[#allocation8 + $0x158] sm:$0xff] }
 0x23a   : > { %6451 = vmatprep.subr.bf16.mxu0 %v6450_v55  ;;  %v6474_v55 = vpack.c.bf16 %v2999_v32, %v2998_v29  ;;  %v2934_v29 = vld [vmem:[#allocation2 + $0x1e0] sm:$0xff] }
 0x23b   : > { %v3014_v32 = vld [vmem:[#allocation8 + $0x160] sm:$0xff] }
 0x23c   : > { %5875 = vmatmul.mubr.f32.vlgmr.msra.gmra.mrb[68].mxu0 %v8030_v37 }
 0x23d   : > { %6453 = vmatpush3.bf16.msra.mxu0 %v6452_v34  ;;  %5877 = vmatprep.mubr.f32.mxu0 %v7829_v23  ;;  %v6460_v23 = vpack.c.bf16 %v2975_v22, %v2974_v38  ;;  %v8055_v34 = vld [vmem:[#allocation2 + $0x2f8] sm:$0xff]  ;;  %v3004_v38 = vld [vmem:[#allocation8 + $0x110] sm:$0xff] }
 0x23e   : > { %6455 = vmatprep.subr.bf16.mxu0 %v6454_v10  ;;  %v6478_v10 = vpack.c.bf16 %v3001_v39, %v3000_v28  ;;  %v3005_v22 = vld [vmem:[#allocation8 + $0x118] sm:$0xff] }
 0x23f   : > { %v6486_v53 = vpack.c.bf16 %v3005_v22, %v3004_v38  ;;  %v6884_v28 = vld [vmem:[#allocation2 + $0x1f8] sm:$0xff] }
 0x240   : > { %5878 = vmatmul.mubr.f32.gmra.mrb[70].mxu0 %v8035_v47 }
 0x241   : > { %6457 = vmatpush3.bf16.msra.mxu0 %v6456_v5  ;;  %5880 = vmatprep.mubr.f32.mxu0 %v7842_v40  ;;  %v6358_v40 = vpack.c.bf16 %v2653_v1, %v2652_v44  ;;  %v8059_v5 = vld [vmem:[#allocation2 + $0x328] sm:$0xff]  ;;  %v2925_v1 = vld [vmem:[#allocation2 + $0x198] sm:$0xff] }
 0x242   : > { %6459 = vmatprep.subr.bf16.mxu0 %v6458_v50  ;;  %v6482_v50 = vpack.c.bf16 %v3003_v15, %v3002_v31  ;;  %v3776_v31 = vld [vmem:[#allocation8 + $0x400] sm:$0xff]  ;;  %v3777_v15 = vld [vmem:[#allocation8 + $0x408] sm:$0xff] }
 0x243   : > { %6359 = vmatprep.subr.bf16.mxu1 %v6358_v40 }
 0x244   : > { %5881 = vmatmul.mubr.f32.gmra.mrb[72].mxu0 %v8039_v11  ;;  %6361 = vmatpush3.bf16.msra.mxu1 %v6358_v40  ;;  %v3009_v40 = vld [vmem:[#allocation8 + $0x138] sm:$0xff] }
 0x245   : > { %6461 = vmatpush3.bf16.msra.mxu0 %v6460_v23  ;;  %5883 = vmatprep.mubr.f32.mxu0 %v7859_v52  ;;  %v6468_v52 = vpack.c.bf16 %v2979_v30, %v2978_v25  ;;  %v2922_v23 = vld [vmem:[#allocation2 + $0x180] sm:$0xff]  ;;  %v3011_v30 = vld [vmem:[#allocation8 + $0x148] sm:$0xff] }
 0x246   : > { %6463 = vmatprep.subr.bf16.mxu0 %v6462_v41  ;;  %v3006_v41 = vld [vmem:[#allocation8 + $0x120] sm:$0xff] }
 0x247   : > { %v3010_v25 = vld [vmem:[#allocation8 + $0x140] sm:$0xff] }
 0x248   : > { %5884 = vmatmul.mubr.f32.gmra.mrb[74].mxu0 %v8043_v59 }
 0x249   : > { %6465 = vmatpush3.bf16.msra.mxu0 %v6464_v2  ;;  %5886 = vmatprep.mubr.f32.mxu0 %v7875_v13  ;;  %v6362_v13 = vpack.c.bf16 %v2655_v4, %v2654_v61  ;;  %v3008_v2 = vld [vmem:[#allocation8 + $0x130] sm:$0xff]  ;;  %v3015_v61 = vld [vmem:[#allocation8 + $0x168] sm:$0xff] }
 0x24a   : > { %6467 = vmatprep.subr.bf16.mxu0 %v6466_v19  ;;  %v6494_v19 = vpack.c.bf16 %v3009_v40, %v3008_v2  ;;  %v2663_v4 = vld [vmem:[#allocation9 + $0x68] sm:$0xff]  ;;  %v6889_v40 = vld [vmem:[#allocation2 + $0x260] sm:$0xff] }
 0x24b   : > { %6363 = vmatprep.subr.bf16.mxu1 %v6362_v13 }
 0x24c   : > { %5887 = vmatmul.mubr.f32.gmra.mrb[76].mxu0 %v8047_v60  ;;  %6365 = vmatpush3.bf16.msra.mxu1 %v6362_v13 }
 0x24d   : > { %6469 = vmatpush3.bf16.msra.mxu0 %v6468_v52  ;;  %5889 = vmatprep.mubr.f32.mxu0 %v7898_v3  ;;  %v6476_v3 = vpack.c.bf16 %v2983_v45, %v2982_v16  ;;  %v6374_v52 = vpack.c.bf16 %v2661_v48, %v2660_v51  ;;  %v3016_v16 = vld [vmem:[#allocation8 + $0x170] sm:$0xff]  ;;  %v6891_v48 = vld [vmem:[#allocation2 + $0x278] sm:$0xff] }
 0x24e   : > { %6471 = vmatprep.subr.bf16.mxu0 %v6470_v62  ;;  %v6498_v62 = vpack.c.bf16 %v3011_v30, %v3010_v25  ;;  %v6890_v30 = vld [vmem:[#allocation2 + $0x258] sm:$0xff] }
 0x250   : > { %5890 = vmatmul.mubr.f32.gmra.mrb[78].mxu0 %v8051_v6 }
 0x251   : > { %6473 = vmatpush3.bf16.msra.mxu0 %v6472_v42  ;;  %5892 = vmatprep.mubr.f32.mxu0 %v7919_v26  ;;  %v6366_v26 = vpack.c.bf16 %v2657_v14, %v2656_v9  ;;  %v6883_v42 = vld [vmem:[#allocation2 + $0x200] sm:$0xff]  ;;  %v2664_v14 = vld [vmem:[#allocation9 + $0x70] sm:$0xff] }
 0x252   : > { %6475 = vmatprep.subr.bf16.mxu0 %v6474_v55  ;;  %v6506_v55 = vpack.c.bf16 %v3015_v61, %v3014_v32  ;;  %v2958_v61 = vld [vmem:[#allocation2 + $0x2a0] sm:$0xff] }
 0x253   : > { %6367 = vmatprep.subr.bf16.mxu1 %v6366_v26 }
 0x254   : > { %5893 = vmatmul.mubr.f32.gmra.mrb[80].mxu0 %v8055_v34  ;;  %6369 = vmatpush3.bf16.msra.mxu1 %v6366_v26 }
 0x255   : > { %6477 = vmatpush3.bf16.msra.mxu0 %v6476_v3  ;;  %5895 = vmatprep.mubr.f32.mxu0 %v7931_v63  ;;  %v3007_v63 = vld [vmem:[#allocation8 + $0x128] sm:$0xff]  ;;  %v6885_v3 = vld [vmem:[#allocation2 + $0x218] sm:$0xff] }
 0x256   : > { %6479 = vmatprep.subr.bf16.mxu0 %v6478_v10  ;;  %v6490_v44 = vpack.c.bf16 %v3007_v63, %v3006_v41  ;;  %6371 = vmatprep.subr.bf16.mxu1 %v6370_v20  ;;  %v2940_v10 = vld [vmem:[#allocation2 + $0x210] sm:$0xff]  ;;  %v3083_v41 = vld [vmem:[#allocation8 + $0x200] sm:$0xff]  ;;  %v3084_v63 = vld [vmem:[#allocation8 + $0x208] sm:$0xff] }
 0x258   : > { %5896 = vmatmul.mubr.f32.gmra.mrb[82].mxu0 %v8059_v5  ;;  %6373 = vmatpush3.bf16.msra.mxu1 %v6370_v20  ;;  %v6386_v20 = vpack.c.bf16 %v3084_v63, %v3083_v41 }
 0x259   : > { %6481 = vmatpush3.bf16.msra.mxu0 %v6480_v8  ;;  %3469 = vmatprep.mubr.f32.mxu0 %v2923_v12  ;;  %v2665_v8 = vld [vmem:[#allocation9 + $0x78] sm:$0xff]  ;;  %v8070_v12 = vpack.c.bf16 %v3777_v15, %v3776_v31 }
 0x25a   : > { %6483 = vmatprep.subr.bf16.mxu0 %v6482_v50  ;;  %6375 = vmatprep.subr.bf16.mxu1 %v6374_v52  ;;  %v6382_v38 = vpack.c.bf16 %v2665_v8, %v2664_v14  ;;  %v6894_v14 = vld [vmem:[#allocation2 + $0x2f0] sm:$0xff] }
 0x25c   : > { %3470 = vmatmul.mubr.f32.vlgmr.msra.gmra.mrb[84].mxu0 %v2922_v23  ;;  %6377 = vmatpush3.bf16.msra.mxu1 %v6374_v52  ;;  %v6887_v23 = vld [vmem:[#allocation2 + $0x228] sm:$0xff]  ;;  %v2952_v52 = vld [vmem:[#allocation2 + $0x270] sm:$0xff] }
 0x25d   : > { %3474 = vmatprep.mubr.f32.mxu0 %v2926_v49  ;;  %6485 = vmatpush3.bf16.msra.mxu0 %v6482_v50  ;;  %v6886_v50 = vld [vmem:[#allocation2 + $0x230] sm:$0xff] }
 0x25e   : > { %6487 = vmatprep.subr.bf16.mxu0 %v6486_v53 }
 0x260   : > { %3475 = vmatmul.mubr.f32.gmra.mrb[86].mxu0 %v2925_v1 }
 0x261   : > { %3479 = vmatprep.mubr.f32.mxu0 %v8006_v0  ;;  %6489 = vmatpush3.bf16.msra.mxu0 %v6486_v53  ;;  %v6882_v0 = vld [vmem:[#allocation2 + $0x1e8] sm:$0xff] }
 0x262   : > { %6491 = vmatprep.subr.bf16.mxu0 %v6490_v44 }
 0x264   : > { %3480 = vmatmul.mubr.f32.gmra.mrb[88].mxu0 %v8009_v36  ;;  %v6502_v36 = vpack.c.bf16 %v3013_v24, %v3012_v18 }
 0x265   : > { %3484 = vmatprep.mubr.f32.mxu0 %v8014_v17  ;;  %6493 = vmatpush3.bf16.msra.mxu0 %v6490_v44  ;;  %v2662_v17 = vld [vmem:[#allocation9 + $0x60] sm:$0xff] }
 0x266   : > { %6495 = vmatprep.subr.bf16.mxu0 %v6494_v19  ;;  %v6378_v13 = vpack.c.bf16 %v2663_v4, %v2662_v17 }
 0x268   : > { %3485 = vmatmul.mubr.f32.gmra.mrb[90].mxu0 %v8018_v57  ;;  %v3017_v57 = vld [vmem:[#allocation8 + $0x178] sm:$0xff]  ;;  %6379 = vmatprep.subr.bf16.mxu1 %v6378_v13 }
 0x269   : > { %3489 = vmatprep.mubr.f32.mxu0 %v6882_v0  ;;  %6497 = vmatpush3.bf16.msra.mxu0 %v6494_v19  ;;  %v6510_v56 = vpack.c.bf16 %v3017_v57, %v3016_v16  ;;  %v6892_v0 = vld [vmem:[#allocation2 + $0x290] sm:$0xff] }
 0x26a   : > { %6499 = vmatprep.subr.bf16.mxu0 %v6498_v62  ;;  %6381 = vmatpush3.bf16.msra.mxu1 %v6378_v13  ;;  %v6893_v13 = vld [vmem:[#allocation2 + $0x2c0] sm:$0xff] }
 0x26b   : > { %6383 = vmatprep.subr.bf16.mxu1 %v6382_v38 }
 0x26c   : > { %3490 = vmatmul.mubr.f32.gmra.mrb[92].mxu0 %v2934_v29 }
 0x26d   : > { %3494 = vmatprep.mubr.f32.mxu0 %v6883_v42  ;;  %6501 = vmatpush3.bf16.msra.mxu0 %v6498_v62 }
 0x26e   : > { %6503 = vmatprep.subr.bf16.mxu0 %v6502_v36  ;;  %6385 = vmatpush3.bf16.msra.mxu1 %v6382_v38 }
 0x26f   : > { %v4764_v45 = vpop.f32.mrb[16].mxu1  ;;  %6387 = vmatprep.subr.bf16.mxu1 %v6386_v20  ;;  %v3781_v20 = vld [vmem:[#allocation8 + $0x428] sm:$0xff] }
 0x270   : > { %3495 = vmatmul.mubr.f32.gmra.mrb[94].mxu0 %v6884_v28  ;;  %v4765_v39 = vpop.f32.mrb[17].mxu1 }
 0x271   : > { %3499 = vmatprep.mubr.f32.mxu0 %v6885_v3  ;;  %6505 = vmatpush3.bf16.msra.mxu0 %v6502_v36  ;;  %v8066_v35 = vadd.f32 %v4765_v39, %v4764_v45 }
 0x272   : > { %6507 = vmatprep.subr.bf16.mxu0 %v6506_v55 }
 0x274   : > { %v4767_v9 = vpop.f32.mrb[18].mxu1  ;;  %3500 = vmatmul.mubr.f32.gmra.mrb[96].mxu0 %v2940_v10 }
 0x275   : > { %v4768_v26 = vpop.f32.mrb[19].mxu1  ;;  %3504 = vmatprep.mubr.f32.mxu0 %v6886_v50  ;;  %6509 = vmatpush3.bf16.msra.mxu0 %v6506_v55  ;;  %v3779_v50 = vld [vmem:[#allocation8 + $0x418] sm:$0xff] }
 0x276   : > { %v8068_v22 = vadd.f32 %v4768_v26, %v4767_v9  ;;  %6511 = vmatprep.subr.bf16.mxu0 %v6510_v56  ;;  %v3778_v26 = vld [vmem:[#allocation8 + $0x410] sm:$0xff] }
 0x277   : > { %v6550_v63 = vpack.c.bf16 %v3779_v50, %v3778_v26  ;;  %v6897_v26 = vld [vmem:[#allocation2 + $0x250] sm:$0xff] }
 0x278   : > { %v4770_v53 = vpop.f32.mrb[20].mxu1  ;;  %3505 = vmatmul.mubr.f32.gmra.mrb[98].mxu0 %v6887_v23 }
 0x279   : > { %v4771_v49 = vpop.f32.mrb[21].mxu1  ;;  %3509 = vmatprep.mubr.f32.mxu0 %v6888_v33  ;;  %6513 = vmatpush3.bf16.msra.mxu0 %v6510_v56 }
 0x27a   : > { %v8072_v44 = vadd.f32 %v4771_v49, %v4770_v53  ;;  %6547 = vmatprep.subr.bf16.mxu0 %v8070_v12 }
 0x27c   : > { %v4773_v1 = vpop.f32.mrb[22].mxu1  ;;  %3510 = vmatmul.mubr.f32.gmra.mrb[100].mxu0 %v2946_v46  ;;  %v3780_v46 = vld [vmem:[#allocation8 + $0x420] sm:$0xff] }
 0x27d   : > { %v4774_v2 = vpop.f32.mrb[23].mxu1  ;;  %3514 = vmatprep.mubr.f32.mxu0 %v6889_v40  ;;  %v2930_v40 = vld [vmem:[#allocation2 + $0x1c0] sm:$0xff] }
 0x27e   : > { %v8075_v19 = vadd.f32 %v4774_v2, %v4773_v1 }
 0x280   : > { %v4776_v25 = vpop.f32.mrb[24].mxu1  ;;  %3515 = vmatmul.mubr.f32.gmra.mrb[102].mxu0 %v6890_v30  ;;  %v6554_v30 = vpack.c.bf16 %v3781_v20, %v3780_v46  ;;  %v8131_v20 = vld [vmem:[#allocation2 + $0x280] sm:$0xff] }
 0x281   : > { %v4777_v51 = vpop.f32.mrb[25].mxu1  ;;  %3519 = vmatprep.mubr.f32.mxu0 %v6891_v48  ;;  %v3782_v48 = vld [vmem:[#allocation8 + $0x430] sm:$0xff] }
 0x282   : > { %v8077_v62 = vadd.f32 %v4777_v51, %v4776_v25 }
 0x284   : > { %v4779_v18 = vpop.f32.mrb[26].mxu1  ;;  %3520 = vmatmul.mubr.f32.gmra.mrb[104].mxu0 %v2952_v52  ;;  %v3783_v52 = vld [vmem:[#allocation8 + $0x438] sm:$0xff] }
 0x285   : > { %v4780_v24 = vpop.f32.mrb[27].mxu1  ;;  %3524 = vmatprep.mubr.f32.mxu0 %v6892_v0 }
 0x286   : > { %v8079_v29 = vadd.f32 %v4780_v24, %v4779_v18 }
 0x288   : > { %v4782_v36 = vpop.f32.mrb[28].mxu1  ;;  %3525 = vmatmul.mubr.f32.gmra.mrb[106].mxu0 %v7872_v7 }
 0x289   : > { %v4783_v32 = vpop.f32.mrb[29].mxu1  ;;  %3529 = vmatprep.mubr.f32.mxu0 %v7877_v27  ;;  %v2964_v27 = vld [vmem:[#allocation2 + $0x2d0] sm:$0xff] }
 0x28a   : > { %v8083_v17 = vadd.f32 %v4783_v32, %v4782_v36  ;;  %v6895_v32 = vld [vmem:[#allocation2 + $0x1f0] sm:$0xff] }
 0x28c   : > { %v4785_v4 = vpop.f32.mrb[30].mxu1  ;;  %3530 = vmatmul.mubr.f32.gmra.mrb[108].mxu0 %v2958_v61  ;;  %v6558_v61 = vpack.c.bf16 %v3783_v52, %v3782_v48 }
 0x28d   : > { %v4786_v42 = vpop.f32.mrb[31].mxu1  ;;  %3534 = vmatprep.mubr.f32.mxu0 %v6893_v13  ;;  %v3785_v13 = vld [vmem:[#allocation8 + $0x448] sm:$0xff] }
 0x28e   : > { %v8085_v55 = vadd.f32 %v4786_v42, %v4785_v4  ;;  %v3784_v42 = vld [vmem:[#allocation8 + $0x440] sm:$0xff] }
 0x28f   : > { %v4876_v16 = vpop.f32.mrb[36].mxu0 }
 0x290   : > { %v4788_v57 = vpop.f32.mrb[32].mxu1  ;;  %v4877_v45 = vpop.f32.mrb[37].mxu0  ;;  %3535 = vmatmul.mubr.f32.gmra.mrb[110].mxu0 %v7895_v43 }
 0x291   : > { %v4789_v28 = vpop.f32.mrb[33].mxu1  ;;  %v4878_v7 = vadd.f32 %v4877_v45, %v4876_v16  ;;  %3539 = vmatprep.mubr.f32.mxu0 %v7900_v54 }
 0x292   : > { %v8089_v39 = vadd.f32 %v4789_v28, %v4788_v57  ;;  %v6896_v28 = vld [vmem:[#allocation2 + $0x220] sm:$0xff] }
 0x293   : > { %v8092_v3 = vadd.f32 %v4878_v7, %v8066_v35  ;;  %v4879_v10 = vpop.f32.mrb[38].mxu0 }
 0x294   : > { %v4791_v56 = vpop.f32.mrb[34].mxu1  ;;  %v4880_v31 = vpop.f32.mrb[39].mxu0  ;;  %3540 = vmatmul.mubr.f32.gmra.mrb[112].mxu0 %v2964_v27  ;;  %v6562_v27 = vpack.c.bf16 %v3785_v13, %v3784_v42 }
 0x295   : > { %v4792_v15 = vpop.f32.mrb[35].mxu1  ;;  %v4881_v9 = vadd.f32 %v4880_v31, %v4879_v10  ;;  %3544 = vmatprep.mubr.f32.mxu0 %v6894_v14  ;;  %v3787_v31 = vld [vmem:[#allocation8 + $0x458] sm:$0xff] }
 0x296   : > { %v8094_v8 = vadd.f32 %v4792_v15, %v4791_v56  ;;  %v3786_v56 = vld [vmem:[#allocation8 + $0x450] sm:$0xff] }
 0x297   : > { %v8097_v43 = vadd.f32 %v4881_v9, %v8068_v22  ;;  %v4882_v54 = vpop.f32.mrb[40].mxu0  ;;  %v2927_v22 = vld [vmem:[#allocation2 + $0x1a8] sm:$0xff] }
 0x298   : > { %v4794_v38 = vpop.f32.mrb[36].mxu1  ;;  %v4883_v53 = vpop.f32.mrb[41].mxu0  ;;  %3545 = vmatmul.mubr.f32.gmra.mrb[114].mxu0 %v7916_v21 }
 0x299   : > { %v4795_v35 = vpop.f32.mrb[37].mxu1  ;;  %v4884_v23 = vadd.f32 %v4883_v53, %v4882_v54  ;;  %5930 = vmatprep.mubr.f32.mxu0 %v8026_v58 }
 0x29a   : > { %v8101_v41 = vadd.f32 %v4795_v35, %v4794_v38  ;;  %v6566_v38 = vpack.c.bf16 %v3787_v31, %v3786_v56  ;;  %v3788_v35 = vld [vmem:[#allocation8 + $0x460] sm:$0xff] }
 0x29b   : > { %v8104_v49 = vadd.f32 %v4884_v23, %v8072_v44  ;;  %v4885_v33 = vpop.f32.mrb[42].mxu0  ;;  %v3789_v23 = vld [vmem:[#allocation8 + $0x468] sm:$0xff] }
 0x29c   : > { %v4797_v1 = vpop.f32.mrb[38].mxu1  ;;  %v4886_v2 = vpop.f32.mrb[43].mxu0  ;;  %5931 = vmatmul.mubr.f32.vlgmr.msra.gmra.mrb[68].mxu0 %v2927_v22 }
 0x29d   : > { %v4798_v25 = vpop.f32.mrb[39].mxu1  ;;  %v4887_v21 = vadd.f32 %v4886_v2, %v4885_v33  ;;  %5933 = vmatprep.mubr.f32.mxu0 %v2930_v40  ;;  %6549 = vmatpush3.bf16.msra.mxu0 %v8070_v12  ;;  %v6570_v2 = vpack.c.bf16 %v3789_v23, %v3788_v35 }
 0x29e   : > { %v8107_v58 = vadd.f32 %v4798_v25, %v4797_v1  ;;  %6551 = vmatprep.subr.bf16.mxu0 %v6550_v63  ;;  %v3790_v25 = vld [vmem:[#allocation8 + $0x470] sm:$0xff] }
 0x29f   : > { %v8110_v44 = vadd.f32 %v4887_v21, %v8075_v19  ;;  %v4888_v51 = vpop.f32.mrb[44].mxu0  ;;  %v3791_v21 = vld [vmem:[#allocation8 + $0x478] sm:$0xff] }
 0x2a0   : > { %v4800_v18 = vpop.f32.mrb[40].mxu1  ;;  %v4889_v24 = vpop.f32.mrb[45].mxu0  ;;  %5934 = vmatmul.mubr.f32.gmra.mrb[70].mxu0 %v8030_v37 }
 0x2a1   : > { %v4801_v0 = vpop.f32.mrb[41].mxu1  ;;  %v4890_v36 = vadd.f32 %v4889_v24, %v4888_v51  ;;  %5936 = vmatprep.mubr.f32.mxu0 %v6895_v32  ;;  %6553 = vmatpush3.bf16.msra.mxu0 %v6550_v63 }
 0x2a2   : > { %v8113_v12 = vadd.f32 %v4801_v0, %v4800_v18  ;;  %6555 = vmatprep.subr.bf16.mxu0 %v6554_v30  ;;  %v8140_v18 = vld [vmem:[#allocation2 + $0x2b0] sm:$0xff]  ;;  %v6574_v0 = vpack.c.bf16 %v3791_v21, %v3790_v25 }
 0x2a3   : > { %v8116_v4 = vadd.f32 %v4890_v36, %v8077_v62  ;;  %v4891_v19 = vpop.f32.mrb[46].mxu0 }
 0x2a4   : > { %v4803_v16 = vpop.f32.mrb[42].mxu1  ;;  %v4892_v57 = vpop.f32.mrb[47].mxu0  ;;  %5937 = vmatmul.mubr.f32.gmra.mrb[72].mxu0 %v8035_v47 }
 0x2a5   : > { %v4804_v37 = vpop.f32.mrb[43].mxu1  ;;  %v4893_v45 = vadd.f32 %v4892_v57, %v4891_v19  ;;  %5939 = vmatprep.mubr.f32.mxu0 %v6896_v28  ;;  %6557 = vmatpush3.bf16.msra.mxu0 %v6554_v30 }
 0x2a6   : > { %v8119_v7 = vadd.f32 %v4804_v37, %v4803_v16  ;;  %6559 = vmatprep.subr.bf16.mxu0 %v6558_v61  ;;  %v8150_v16 = vld [vmem:[#allocation2 + $0x2e0] sm:$0xff] }
 0x2a7   : > { %v8122_v10 = vadd.f32 %v4893_v45, %v8079_v29  ;;  %v4894_v62 = vpop.f32.mrb[48].mxu0 }
 0x2a8   : > { %v4806_v15 = vpop.f32.mrb[44].mxu1  ;;  %v4895_v9 = vpop.f32.mrb[49].mxu0  ;;  %5940 = vmatmul.mubr.f32.gmra.mrb[74].mxu0 %v8039_v11 }
 0x2a9   : > { %v4807_v14 = vpop.f32.mrb[45].mxu1  ;;  %v4896_v54 = vadd.f32 %v4895_v9, %v4894_v62  ;;  %5942 = vmatprep.mubr.f32.mxu0 %v6897_v26  ;;  %6561 = vmatpush3.bf16.msra.mxu0 %v6558_v61 }
 0x2aa   : > { %v8125_v50 = vadd.f32 %v4807_v14, %v4806_v15  ;;  %6563 = vmatprep.subr.bf16.mxu0 %v6562_v27 }
 0x2ab   : > { %v8128_v53 = vadd.f32 %v4896_v54, %v8083_v17  ;;  %v4897_v29 = vpop.f32.mrb[50].mxu0  ;;  %v3704_v54 = vld [vmem:[#allocation2 + $0x220] sm:$0xff] }
 0x2ac   : > { %v4809_v63 = vpop.f32.mrb[46].mxu1  ;;  %v4898_v33 = vpop.f32.mrb[51].mxu0  ;;  %5943 = vmatmul.mubr.f32.gmra.mrb[76].mxu0 %v8043_v59 }
 0x2ad   : > { %v4810_v22 = vpop.f32.mrb[47].mxu1  ;;  %v4899_v46 = vadd.f32 %v4898_v33, %v4897_v29  ;;  %5945 = vmatprep.mubr.f32.mxu0 %v8131_v20  ;;  %6565 = vmatpush3.bf16.msra.mxu0 %v6562_v27  ;;  %v3698_v27 = vld [vmem:[#allocation2 + $0x1f0] sm:$0xff] }
 0x2ae   : > { %v8134_v1 = vadd.f32 %v4810_v22, %v4809_v63  ;;  %6567 = vmatprep.subr.bf16.mxu0 %v6566_v38  ;;  %v3710_v33 = vld [vmem:[#allocation2 + $0x250] sm:$0xff] }
 0x2af   : > { %v8137_v17 = vadd.f32 %v4899_v46, %v8085_v55  ;;  %v4900_v40 = vpop.f32.mrb[52].mxu0 }
 0x2b0   : > { %v4988_v30 = vpop.f32.mrb[48].mxu1  ;;  %v4901_v51 = vpop.f32.mrb[53].mxu0  ;;  %5946 = vmatmul.mubr.f32.gmra.mrb[78].mxu0 %v8047_v60 }
 0x2b1   : > { %v4989_v48 = vpop.f32.mrb[49].mxu1  ;;  %v4902_v52 = vadd.f32 %v4901_v51, %v4900_v40  ;;  %5948 = vmatprep.mubr.f32.mxu0 %v8140_v18  ;;  %6569 = vmatpush3.bf16.msra.mxu0 %v6566_v38 }
 0x2b2   : > { %v4990_v24 = vadd.f32 %v4989_v48, %v4988_v30  ;;  %6571 = vmatprep.subr.bf16.mxu0 %v6570_v2 }
 0x2b3   : > { %v8144_v55 = vadd.f32 %v4902_v52, %v8089_v39  ;;  %v4903_v36 = vpop.f32.mrb[54].mxu0 }
 0x2b4   : > { %v4991_v32 = vpop.f32.mrb[50].mxu1  ;;  %v4904_v61 = vpop.f32.mrb[55].mxu0  ;;  %5949 = vmatmul.mubr.f32.gmra.mrb[80].mxu0 %v8051_v6  ;;  %v8148_v19 = vadd.f32 %v8092_v3, %v4990_v24 }
 0x2b5   : > { %v4992_v42 = vpop.f32.mrb[51].mxu1  ;;  %v4905_v13 = vadd.f32 %v4904_v61, %v4903_v36  ;;  %5951 = vmatprep.mubr.f32.mxu0 %v8150_v16  ;;  %6573 = vmatpush3.bf16.msra.mxu0 %v6570_v2 }
 0x2b6   : > { %v4993_v57 = vadd.f32 %v4992_v42, %v4991_v32  ;;  %6575 = vmatprep.subr.bf16.mxu0 %v6574_v0 }
 0x2b7   : > { %v8154_v39 = vadd.f32 %v4905_v13, %v8094_v8  ;;  %v4906_v37 = vpop.f32.mrb[56].mxu0 }
 0x2b8   : > { %v4994_v45 = vpop.f32.mrb[52].mxu1  ;;  %v4907_v28 = vpop.f32.mrb[57].mxu0  ;;  %5952 = vmatmul.mubr.f32.gmra.mrb[82].mxu0 %v8055_v34  ;;  %v8158_v3 = vadd.f32 %v8097_v43, %v4993_v57 }
 0x2b9   : > { %v4995_v62 = vpop.f32.mrb[53].mxu1  ;;  %v4908_v56 = vadd.f32 %v4907_v28, %v4906_v37  ;;  %6577 = vmatpush3.bf16.msra.mxu0 %v6574_v0  ;;  %5986 = vmatprep.mubr.f32.mxu0 %v3698_v27  ;;  %v6901_v37 = vld [vmem:[#allocation2 + $0x310] sm:$0xff]  ;;  %v8201_v28 = vld [vmem:[#allocation2 + $0x20] sm:$0xff] }
 0x2ba   : > { %v4996_v31 = vadd.f32 %v4995_v62, %v4994_v45 }
 0x2bb   : > { %v8161_v15 = vadd.f32 %v4908_v56, %v8101_v41  ;;  %v4909_v9 = vpop.f32.mrb[58].mxu0 }
 0x2bc   : > { %v4997_v8 = vpop.f32.mrb[54].mxu1  ;;  %v4910_v14 = vpop.f32.mrb[59].mxu0  ;;  %5987 = vmatmul.mubr.f32.vlgmr.msra.gmra.mrb[68].mxu0 %v8035_v47  ;;  %v8165_v26 = vadd.f32 %v8104_v49, %v4996_v31 }
 0x2bd   : > { %v4998_v38 = vpop.f32.mrb[55].mxu1  ;;  %v4911_v43 = vadd.f32 %v4910_v14, %v4909_v9  ;;  %5989 = vmatprep.mubr.f32.mxu0 %v3704_v54 }
 0x2be   : > { %v4999_v29 = vadd.f32 %v4998_v38, %v4997_v8 }
 0x2bf   : > { %v8168_v35 = vadd.f32 %v4911_v43, %v8107_v58  ;;  %v4912_v23 = vpop.f32.mrb[60].mxu0 }
 0x2c0   : > { %v5000_v63 = vpop.f32.mrb[56].mxu1  ;;  %v4913_v41 = vpop.f32.mrb[61].mxu0  ;;  %5990 = vmatmul.mubr.f32.gmra.mrb[70].mxu0 %v8039_v11  ;;  %v8172_v22 = vadd.f32 %v8110_v44, %v4999_v29 }
 0x2c1   : > { %v5001_v47 = vpop.f32.mrb[57].mxu1  ;;  %v4914_v46 = vadd.f32 %v4913_v41, %v4912_v23  ;;  %5992 = vmatprep.mubr.f32.mxu0 %v3710_v33 }
 0x2c2   : > { %v5002_v49 = vadd.f32 %v5001_v47, %v5000_v63 }
 0x2c3   : > { %v6649_v2 = vadd.f32 %v4914_v46, %v8113_v12  ;;  %v4915_v40 = vpop.f32.mrb[62].mxu0 }
 0x2c4   : > { %v5003_v25 = vpop.f32.mrb[58].mxu1  ;;  %v4916_v21 = vpop.f32.mrb[63].mxu0  ;;  %5993 = vmatmul.mubr.f32.gmra.mrb[72].mxu0 %v8043_v59  ;;  %v8177_v58 = vadd.f32 %v8116_v4, %v5002_v49 }
 0x2c5   : > { %v5004_v30 = vpop.f32.mrb[59].mxu1  ;;  %v4917_v11 = vadd.f32 %v4916_v21, %v4915_v40  ;;  %5995 = vmatprep.mubr.f32.mxu0 %v8131_v20 }
 0x2c6   : > { %v5005_v44 = vadd.f32 %v5004_v30, %v5003_v25  ;;  %v8231_v30 = vld [vmem:[%s8795_s27] ss:$0 sm:$0xff] }
 0x2c7   : > { %v6646_v51 = vadd.f32 %v4917_v11, %v8119_v7  ;;  %v4918_v48 = vpop.f32.mrb[64].mxu0 }
 0x2c8   : > { %v5006_v52 = vpop.f32.mrb[60].mxu1  ;;  %v4919_v24 = vpop.f32.mrb[65].mxu0  ;;  %5996 = vmatmul.mubr.f32.gmra.mrb[74].mxu0 %v8047_v60  ;;  %v8183_v12 = vadd.f32 %v8122_v10, %v5005_v44 }
 0x2c9   : > { %v5007_v0 = vpop.f32.mrb[61].mxu1  ;;  %v4920_v59 = vadd.f32 %v4919_v24, %v4918_v48  ;;  %5998 = vmatprep.mubr.f32.mxu0 %v8140_v18 }
 0x2ca   : > { %v5008_v4 = vadd.f32 %v5007_v0, %v5006_v52  ;;  %v3067_v0 = vld [vmem:[#allocation8 + $0x180] sm:$0xff] }
 0x2cb   : > { %v6655_v36 = vadd.f32 %v4920_v59, %v8125_v50  ;;  %v4921_v32 = vpop.f32.mrb[66].mxu0  ;;  %v3068_v59 = vld [vmem:[#allocation8 + $0x188] sm:$0xff] }
 0x2cc   : > { %v5009_v20 = vpop.f32.mrb[62].mxu1  ;;  %v4922_v61 = vpop.f32.mrb[67].mxu0  ;;  %5999 = vmatmul.mubr.f32.gmra.mrb[76].mxu0 %v8051_v6  ;;  %v8189_v7 = vadd.f32 %v8128_v53, %v5008_v4 }
 0x2cd   : > { %v5010_v42 = vpop.f32.mrb[63].mxu1  ;;  %v4923_v60 = vadd.f32 %v4922_v61, %v4921_v32  ;;  %6001 = vmatprep.mubr.f32.mxu0 %v8150_v16  ;;  %v3085_v32 = vld [vmem:[#allocation8 + $0x210] sm:$0xff] }
 0x2ce   : > { %v5011_v10 = vadd.f32 %v5010_v42, %v5009_v20  ;;  %v3086_v20 = vld [vmem:[#allocation8 + $0x218] sm:$0xff] }
 0x2cf   : > { %v6652_v13 = vadd.f32 %v4923_v60, %v8134_v1 }
 0x2d0   : > { %v5012_v57 = vpop.f32.mrb[64].mxu1  ;;  %6002 = vmatmul.mubr.f32.gmra.mrb[78].mxu0 %v8055_v34  ;;  %v8195_v50 = vadd.f32 %v8137_v17, %v5011_v10  ;;  %v6388_v10 = vpack.c.bf16 %v3068_v59, %v3067_v0  ;;  %v3092_v0 = vld [vmem:[#allocation8 + $0x248] sm:$0xff] }
 0x2d1   : > { %v5013_v18 = vpop.f32.mrb[65].mxu1  ;;  %6004 = vmatprep.mubr.f32.mxu0 %v6901_v37 }
 0x2d2   : > { %v5014_v6 = vadd.f32 %v5013_v18, %v5012_v57  ;;  %v6390_v18 = vpack.c.bf16 %v3086_v20, %v3085_v32 }
 0x2d4   : > { %v5015_v45 = vpop.f32.mrb[66].mxu1  ;;  %6005 = vmatmul.mubr.f32.gmra.mrb[80].mxu0 %v8059_v5  ;;  %v8199_v53 = vadd.f32 %v8144_v55, %v5014_v6  ;;  %v3069_v6 = vld [vmem:[#allocation8 + $0x190] sm:$0xff] }
 0x2d5   : > { %v5016_v16 = vpop.f32.mrb[67].mxu1  ;;  %6007 = vmatprep.mubr.f32.mxu0 %v8201_v28 }
 0x2d6   : > { %v5017_v1 = vadd.f32 %v5016_v16, %v5015_v45 }
 0x2d8   : > { %v5018_v34 = vpop.f32.mrb[68].mxu1  ;;  %6008 = vmatmul.mubr.f32.gmra.mrb[82].mxu0 %v8201_v28  ;;  %v8206_v17 = vadd.f32 %v8154_v39, %v5017_v1  ;;  %v3087_v1 = vld [vmem:[#allocation8 + $0x220] sm:$0xff] }
 0x2d9   : > { %v5019_v27 = vpop.f32.mrb[69].mxu1 }
 0x2da   : > { %v5020_v62 = vadd.f32 %v5019_v27, %v5018_v34  ;;  %v3088_v34 = vld [vmem:[#allocation8 + $0x228] sm:$0xff] }
 0x2dc   : > { %v5021_v56 = vpop.f32.mrb[70].mxu1  ;;  %v8209_v5 = vadd.f32 %v8161_v15, %v5020_v62 }
 0x2dd   : > { %v5022_v55 = vpop.f32.mrb[71].mxu1 }
 0x2de   : > { %v5023_v31 = vadd.f32 %v5022_v55, %v5021_v56 }
 0x2e0   : > { %v5024_v9 = vpop.f32.mrb[72].mxu1  ;;  %v8212_v8 = vadd.f32 %v8168_v35, %v5023_v31  ;;  %v8223_v35 = vld [vmem:[%s8756_s5] ss:$0 sm:$0xff] }
 0x2e1   : > { %v5025_v14 = vpop.f32.mrb[73].mxu1 }
 0x2e2   : > { %v5026_v54 = vadd.f32 %v5025_v14, %v5024_v9 }
 0x2e4   : > { %v5027_v38 = vpop.f32.mrb[74].mxu1  ;;  %v8214_v43 = vadd.f32 %v6649_v2, %v5026_v54 }
 0x2e5   : > { %v5028_v29 = vpop.f32.mrb[75].mxu1 }
 0x2e6   : > { %v5029_v39 = vadd.f32 %v5028_v29, %v5027_v38  ;;  %v3071_v38 = vld [vmem:[#allocation8 + $0x1a0] sm:$0xff]  ;;  %v3072_v29 = vld [vmem:[#allocation8 + $0x1a8] sm:$0xff] }
 0x2e8   : > { %v5030_v23 = vpop.f32.mrb[76].mxu1  ;;  %v8216_v63 = vadd.f32 %v6646_v51, %v5029_v39 }
 0x2e9   : > { %v5031_v41 = vpop.f32.mrb[77].mxu1 }
 0x2ea   : > { %v5032_v33 = vadd.f32 %v5031_v41, %v5030_v23  ;;  %v3089_v41 = vld [vmem:[#allocation8 + $0x230] sm:$0xff] }
 0x2ec   : > { %v5033_v15 = vpop.f32.mrb[78].mxu1  ;;  %v8218_v47 = vadd.f32 %v6655_v36, %v5032_v33  ;;  %v3090_v33 = vld [vmem:[#allocation8 + $0x238] sm:$0xff] }
 0x2ed   : > { %v5034_v46 = vpop.f32.mrb[79].mxu1 }
 0x2ee   : > { %v5035_v49 = vadd.f32 %v5034_v46, %v5033_v15 }
 0x2ef   : > { %v5764_v40 = vpop.f32.mrb[20].mxu0 }
 0x2f0   : > { %v6612_v2 = vadd.f32 %v8158_v3, %v5764_v40  ;;  %v2495_v25 = vpop.f32.mrb[21].mxu0  ;;  %v8226_v21 = vadd.f32 %v6652_v13, %v5035_v49  ;;  %v6396_v40 = vpack.c.bf16 %v3072_v29, %v3071_v38 }
 0x2f1   : > { %v6615_v11 = vadd.f32 %v8148_v19, %v2495_v25 }
 0x2f2   : > { %v2597_v44 = vmul.f32 %v6612_v2, %v8223_v35 }
 0x2f3   : > { %v2596_v51 = vmul.f32 %v6615_v11, %v8223_v35  ;;  %v5767_v48 = vpop.f32.mrb[22].mxu0 }
 0x2f4   : > { %v2619_v52 = vadd.f32 %v8231_v30, %v2597_v44  ;;  %v6618_v24 = vadd.f32 %v8172_v22, %v5767_v48  ;;  %v2505_v3 = vpop.f32.mrb[23].mxu0  ;;  %v3074_v48 = vld [vmem:[#allocation8 + $0x1b8] sm:$0xff] }
 0x2f5   : > { %v6621_v4 = vadd.f32 %v8165_v26, %v2505_v3  ;;  %v2618_v36 = vadd.f32 %v8231_v30, %v2596_v51  ;;  %v3070_v26 = vld [vmem:[#allocation8 + $0x198] sm:$0xff]  ;;  %v3073_v51 = vld [vmem:[#allocation8 + $0x1b0] sm:$0xff]  ;;  %v3091_v3 = vld [vmem:[#allocation8 + $0x240] sm:$0xff] }
 0x2f6   : > { %v2599_v19 = vmul.f32 %v6618_v24, %v8223_v35  ;;  %v2635_v13 = vmax.f32 %v2619_v52, 0.0  ;;  %v6392_v55 = vpack.c.bf16 %v3070_v26, %v3069_v6  ;;  %v6400_v32 = vpack.c.bf16 %v3074_v48, %v3073_v51  ;;  %v3081_v48 = vld [vmem:[#allocation8 + $0x1f0] sm:$0xff] }
 0x2f7   : > { %v2598_v61 = vmul.f32 %v6621_v4, %v8223_v35  ;;  %v5770_v42 = vpop.f32.mrb[24].mxu0  ;;  %v2634_v60 = vmax.f32 %v2618_v36, 0.0 }
 0x2f8   : > { %v6624_v57 = vadd.f32 %v8183_v12, %v5770_v42  ;;  %v2515_v22 = vpop.f32.mrb[25].mxu0  ;;  %v2621_v37 = vadd.f32 %v8231_v30, %v2599_v19 }
 0x2f9   : > { %v6627_v45 = vadd.f32 %v8177_v58, %v2515_v22  ;;  %5818 = vmatprep.mubr.f32.mxu1 %v2634_v60  ;;  %v2620_v16 = vadd.f32 %v8231_v30, %v2598_v61  ;;  %v6394_v58 = vpack.c.bf16 %v3088_v34, %v3087_v1  ;;  %v3075_v60 = vld [vmem:[#allocation8 + $0x1c0] sm:$0xff]  ;;  %v3093_v22 = vld [vmem:[#allocation8 + $0x250] sm:$0xff] }
 0x2fa   : > { %v2601_v27 = vmul.f32 %v6624_v57, %v8223_v35  ;;  %5819 = vmatmul.mubr.f32.vlgmr.msra.gmra.mrb[80].mxu1 %v2635_v13  ;;  %v2637_v14 = vmax.f32 %v2621_v37, 0.0 }
 0x2fb   : > { %v2600_v62 = vmul.f32 %v6627_v45, %v8223_v35  ;;  %6389 = vmatpush3.bf16.msra.mxu1 %v6388_v10  ;;  %v5773_v12 = vpop.f32.mrb[26].mxu0  ;;  %v2636_v56 = vmax.f32 %v2620_v16, 0.0  ;;  %v3076_v10 = vld [vmem:[#allocation8 + $0x1c8] sm:$0xff] }
 0x2fc   : > { %v6630_v31 = vadd.f32 %v8195_v50, %v5773_v12  ;;  %v2525_v9 = vpop.f32.mrb[27].mxu0  ;;  %6391 = vmatprep.subr.bf16.mxu1 %v6390_v18  ;;  %v2623_v54 = vadd.f32 %v8231_v30, %v2601_v27  ;;  %v3094_v18 = vld [vmem:[#allocation8 + $0x258] sm:$0xff]  ;;  %v6404_v45 = vpack.c.bf16 %v3076_v10, %v3075_v60  ;;  %v3019_v60 = vld [vmem:[#allocation2 + $0x1b0] sm:$0xff]  ;;  %v3764_v10 = vld [vmem:[#allocation8 + $0x3a0] sm:$0xff] }
 0x2fd   : > { %v6633_v39 = vadd.f32 %v8189_v7, %v2525_v9  ;;  %5821 = vmatprep.mubr.f32.mxu1 %v2636_v56  ;;  %v2622_v23 = vadd.f32 %v8231_v30, %v2600_v62  ;;  %v6398_v7 = vpack.c.bf16 %v3090_v33, %v3089_v41  ;;  %v3077_v62 = vld [vmem:[#allocation8 + $0x1d0] sm:$0xff]  ;;  %v3078_v12 = vld [vmem:[#allocation8 + $0x1d8] sm:$0xff]  ;;  %v3096_v9 = vld [vmem:[#allocation8 + $0x268] sm:$0xff] }
 0x2fe   : > { %v2603_v15 = vmul.f32 %v6630_v31, %v8223_v35  ;;  %5822 = vmatmul.mubr.f32.gmra.mrb[82].mxu1 %v2637_v14  ;;  %v2639_v11 = vmax.f32 %v2623_v54, 0.0  ;;  %v3095_v31 = vld [vmem:[#allocation8 + $0x260] sm:$0xff]  ;;  %v6408_v38 = vpack.c.bf16 %v3078_v12, %v3077_v62 }
 0x2ff   : > { %v2602_v50 = vmul.f32 %v6633_v39, %v8223_v35  ;;  %6393 = vmatpush3.bf16.msra.mxu1 %v6392_v55  ;;  %v5776_v46 = vpop.f32.mrb[28].mxu0  ;;  %v2638_v49 = vmax.f32 %v2622_v23, 0.0  ;;  %v3079_v33 = vld [vmem:[#allocation8 + $0x1e0] sm:$0xff] }
 0x300   : > { %v6636_v2 = vadd.f32 %v8206_v17, %v5776_v46  ;;  %v2535_v25 = vpop.f32.mrb[29].mxu0  ;;  %6395 = vmatprep.subr.bf16.mxu1 %v6394_v58  ;;  %v2625_v44 = vadd.f32 %v8231_v30, %v2603_v15  ;;  %v3080_v15 = vld [vmem:[#allocation8 + $0x1e8] sm:$0xff]  ;;  %v8283_v62 = vld [vmem:[#allocation2 + $0x1e0] sm:$0xff] }
 0x301   : > { %v6639_v52 = vadd.f32 %v8199_v53, %v2535_v25  ;;  %5824 = vmatprep.mubr.f32.mxu1 %v2638_v49  ;;  %v2624_v24 = vadd.f32 %v8231_v30, %v2602_v50  ;;  %v6402_v53 = vpack.c.bf16 %v3092_v0, %v3091_v3  ;;  %v3097_v49 = vld [vmem:[#allocation8 + $0x270] sm:$0xff]  ;;  %v3761_v3 = vld [vmem:[#allocation8 + $0x388] sm:$0xff]  ;;  %v3768_v12 = vld [vmem:[#allocation8 + $0x3c0] sm:$0xff] }
 0x302   : > { %v2605_v59 = vmul.f32 %v6636_v2, %v8223_v35  ;;  %5825 = vmatmul.mubr.f32.gmra.mrb[84].mxu1 %v2639_v11  ;;  %v2641_v61 = vmax.f32 %v2625_v44, 0.0  ;;  %v6412_v11 = vpack.c.bf16 %v3080_v15, %v3079_v33  ;;  %v8295_v33 = vld [vmem:[#allocation2 + $0x210] sm:$0xff]  ;;  %v3772_v15 = vld [vmem:[#allocation8 + $0x3e0] sm:$0xff] }
 0x303   : > { %v2604_v17 = vmul.f32 %v6639_v52, %v8223_v35  ;;  %6397 = vmatpush3.bf16.msra.mxu1 %v6396_v40  ;;  %v5779_v4 = vpop.f32.mrb[30].mxu0  ;;  %v2640_v36 = vmax.f32 %v2624_v24, 0.0  ;;  %v3098_v40 = vld [vmem:[#allocation8 + $0x278] sm:$0xff]  ;;  %v3760_v24 = vld [vmem:[#allocation8 + $0x380] sm:$0xff] }
 0x304   : > { %v6642_v20 = vadd.f32 %v8212_v8, %v5779_v4  ;;  %v2545_v19 = vpop.f32.mrb[31].mxu0  ;;  %6399 = vmatprep.subr.bf16.mxu1 %v6398_v7  ;;  %v2627_v42 = vadd.f32 %v8231_v30, %v2605_v59  ;;  %v6414_v44 = vpack.c.bf16 %v3098_v40, %v3097_v49  ;;  %v3744_v4 = vld [vmem:[#allocation8 + $0x300] sm:$0xff] }
 0x305   : > { %v6645_v13 = vadd.f32 %v8209_v5, %v2545_v19  ;;  %5827 = vmatprep.mubr.f32.mxu1 %v2640_v36  ;;  %v2626_v57 = vadd.f32 %v8231_v30, %v2604_v17  ;;  %v6406_v5 = vpack.c.bf16 %v3094_v18, %v3093_v22  ;;  %v6514_v17 = vpack.c.bf16 %v3761_v3, %v3760_v24  ;;  %v3745_v36 = vld [vmem:[#allocation8 + $0x308] sm:$0xff]  ;;  %v3020_v19 = vld [vmem:[#allocation2 + $0x1b8] sm:$0xff]  ;;  %v3758_v24 = vld [vmem:[#allocation8 + $0x370] sm:$0xff] }
 0x306   : > { %v2607_v37 = vmul.f32 %v6642_v20, %v8223_v35  ;;  %5828 = vmatmul.mubr.f32.gmra.mrb[86].mxu1 %v2641_v61  ;;  %v2643_v34 = vmax.f32 %v2627_v42, 0.0  ;;  %v3763_v20 = vld [vmem:[#allocation8 + $0x398] sm:$0xff]  ;;  %v6516_v61 = vpack.c.bf16 %v3745_v36, %v3744_v4 }
 0x307   : > { %v2606_v8 = vmul.f32 %v6645_v13, %v8223_v35  ;;  %6401 = vmatpush3.bf16.msra.mxu1 %v6400_v32  ;;  %v5782_v6 = vpop.f32.mrb[32].mxu0  ;;  %v2642_v26 = vmax.f32 %v2626_v57, 0.0  ;;  %v3762_v32 = vld [vmem:[#allocation8 + $0x390] sm:$0xff]  ;;  %v3747_v42 = vld [vmem:[#allocation8 + $0x318] sm:$0xff]  ;;  %v3765_v13 = vld [vmem:[#allocation8 + $0x3a8] sm:$0xff] }
 0x308   : > { %v6648_v16 = vadd.f32 %v8216_v63, %v5782_v6  ;;  %v2555_v1 = vpop.f32.mrb[33].mxu0  ;;  %6403 = vmatprep.subr.bf16.mxu1 %v6402_v53  ;;  %v2629_v27 = vadd.f32 %v8231_v30, %v2607_v37  ;;  %v3746_v53 = vld [vmem:[#allocation8 + $0x310] sm:$0xff]  ;;  %v6522_v18 = vpack.c.bf16 %v3765_v13, %v3764_v10  ;;  %v3748_v37 = vld [vmem:[#allocation8 + $0x320] sm:$0xff]  ;;  %v3022_v6 = vld [vmem:[#allocation2 + $0x1c8] sm:$0xff] }
 0x309   : > { %v6651_v56 = vadd.f32 %v8214_v43, %v2555_v1  ;;  %5830 = vmatprep.mubr.f32.mxu1 %v2642_v26  ;;  %v2628_v55 = vadd.f32 %v8231_v30, %v2606_v8  ;;  %v6410_v43 = vpack.c.bf16 %v3096_v9, %v3095_v31  ;;  %v3023_v57 = vld [vmem:[#allocation2 + $0x1d0] sm:$0xff]  ;;  %v6520_v22 = vpack.c.bf16 %v3747_v42, %v3746_v53  ;;  %v3749_v8 = vld [vmem:[#allocation8 + $0x328] sm:$0xff]  ;;  %v3759_v3 = vld [vmem:[#allocation8 + $0x378] sm:$0xff] }
 0x30a   : > { %v2609_v14 = vmul.f32 %v6648_v16, %v8223_v35  ;;  %5831 = vmatmul.mubr.f32.gmra.mrb[88].mxu1 %v2643_v34  ;;  %v2645_v23 = vmax.f32 %v2629_v27, 0.0  ;;  %v3766_v26 = vld [vmem:[#allocation8 + $0x3b0] sm:$0xff]  ;;  %v8280_v16 = vld [vmem:[#allocation2 + $0x1e8] sm:$0xff]  ;;  %v6524_v1 = vpack.c.bf16 %v3749_v8, %v3748_v37  ;;  %v3751_v27 = vld [vmem:[#allocation8 + $0x338] sm:$0xff]  ;;  %v6544_v4 = vpack.c.bf16 %v3759_v3, %v3758_v24 }
 0x30b   : > { %v2608_v63 = vmul.f32 %v6651_v56, %v8223_v35  ;;  %6405 = vmatpush3.bf16.msra.mxu1 %v6404_v45  ;;  %v5785_v58 = vpop.f32.mrb[34].mxu0  ;;  %v2644_v54 = vmax.f32 %v2628_v55, 0.0  ;;  %v3767_v45 = vld [vmem:[#allocation8 + $0x3b8] sm:$0xff]  ;;  %v3769_v56 = vld [vmem:[#allocation8 + $0x3c8] sm:$0xff]  ;;  %v8286_v55 = vld [vmem:[#allocation2 + $0x200] sm:$0xff] }
 0x30c   : > { %v6654_v29 = vadd.f32 %v8226_v21, %v5785_v58  ;;  %v2565_v39 = vpop.f32.mrb[35].mxu0  ;;  %6407 = vmatprep.subr.bf16.mxu1 %v6406_v5  ;;  %v2631_v41 = vadd.f32 %v8231_v30, %v2609_v14  ;;  %v6526_v34 = vpack.c.bf16 %v3767_v45, %v3766_v26  ;;  %v3750_v5 = vld [vmem:[#allocation8 + $0x330] sm:$0xff]  ;;  %v6530_v9 = vpack.c.bf16 %v3769_v56, %v3768_v12  ;;  %v3752_v14 = vld [vmem:[#allocation8 + $0x340] sm:$0xff]  ;;  %v8289_v58 = vld [vmem:[#allocation2 + $0x1f8] sm:$0xff] }
 0x30d   : > { %v6657_v50 = vadd.f32 %v8218_v47, %v2565_v39  ;;  %5833 = vmatprep.mubr.f32.mxu1 %v2644_v54  ;;  %v2630_v46 = vadd.f32 %v8231_v30, %v2608_v63  ;;  %v3082_v47 = vld [vmem:[#allocation8 + $0x1f8] sm:$0xff]  ;;  %v6528_v31 = vpack.c.bf16 %v3751_v27, %v3750_v5  ;;  %v3753_v63 = vld [vmem:[#allocation8 + $0x348] sm:$0xff]  ;;  %v3770_v54 = vld [vmem:[#allocation8 + $0x3d0] sm:$0xff] }
 0x30e   : > { %v2611_v2 = vmul.f32 %v6654_v29, %v8223_v35  ;;  %5834 = vmatmul.mubr.f32.gmra.mrb[90].mxu1 %v2645_v23  ;;  %v2647_v7 = vmax.f32 %v2631_v41, 0.0  ;;  %v6416_v59 = vpack.c.bf16 %v3082_v47, %v3081_v48  ;;  %v8292_v29 = vld [vmem:[#allocation2 + $0x218] sm:$0xff]  ;;  %v6532_v39 = vpack.c.bf16 %v3753_v63, %v3752_v14  ;;  %v8325_v42 = vld [vmem:[#allocation2 + $0x270] sm:$0xff]  ;;  %v8344_v45 = vld [vmem:[#allocation2 + $0x2c0] sm:$0xff] }
 0x30f   : > { %v2610_v21 = vmul.f32 %v6657_v50, %v8223_v35  ;;  %6409 = vmatpush3.bf16.msra.mxu1 %v6408_v38  ;;  %v2646_v25 = vmax.f32 %v2630_v46, 0.0  ;;  %v3771_v38 = vld [vmem:[#allocation8 + $0x3d8] sm:$0xff]  ;;  %v3773_v50 = vld [vmem:[#allocation8 + $0x3e8] sm:$0xff]  ;;  %v8298_v46 = vld [vmem:[#allocation2 + $0x230] sm:$0xff] }
 0x310   : > { %6411 = vmatprep.subr.bf16.mxu1 %v6410_v43  ;;  %v2633_v51 = vadd.f32 %v8231_v30, %v2611_v2  ;;  %v6534_v23 = vpack.c.bf16 %v3771_v38, %v3770_v54  ;;  %v3754_v43 = vld [vmem:[#allocation8 + $0x350] sm:$0xff]  ;;  %v3755_v41 = vld [vmem:[#allocation8 + $0x358] sm:$0xff]  ;;  %v6538_v40 = vpack.c.bf16 %v3773_v50, %v3772_v15  ;;  %v3756_v2 = vld [vmem:[#allocation8 + $0x360] sm:$0xff] }
 0x311   : > { %5836 = vmatprep.mubr.f32.mxu1 %v2646_v25  ;;  %v2632_v52 = vadd.f32 %v8231_v30, %v2610_v21  ;;  %v6518_v30 = vpack.c.bf16 %v3763_v20, %v3762_v32  ;;  %v6536_v49 = vpack.c.bf16 %v3755_v41, %v3754_v43  ;;  %v3757_v21 = vld [vmem:[#allocation8 + $0x368] sm:$0xff]  ;;  %v8317_v20 = vld [vmem:[#allocation2 + $0x258] sm:$0xff]  ;;  %v3059_v63 = vld [vmem:[#allocation2 + $0x2f0] sm:$0xff] }
 0x312   : > { %5837 = vmatmul.mubr.f32.gmra.mrb[92].mxu1 %v2647_v7  ;;  %v2649_v35 = vmax.f32 %v2633_v51, 0.0  ;;  %v8301_v25 = vld [vmem:[#allocation2 + $0x228] sm:$0xff]  ;;  %v3775_v7 = vld [vmem:[#allocation8 + $0x3f8] sm:$0xff]  ;;  %v6540_v48 = vpack.c.bf16 %v3757_v21, %v3756_v2  ;;  %v3061_v50 = vld [vmem:[#allocation2 + $0x300] sm:$0xff] }
 0x313   : > { %6413 = vmatpush3.bf16.msra.mxu1 %v6412_v11  ;;  %v2648_v0 = vmax.f32 %v2632_v52, 0.0  ;;  %v3774_v11 = vld [vmem:[#allocation8 + $0x3f0] sm:$0xff]  ;;  %v8347_v5 = vld [vmem:[#allocation2 + $0x2b8] sm:$0xff]  ;;  %v3062_v43 = vld [vmem:[#allocation2 + $0x308] sm:$0xff] }
 0x314   : > { %6415 = vmatprep.subr.bf16.mxu1 %v6414_v44  ;;  %v8304_v44 = vld [vmem:[#allocation2 + $0x248] sm:$0xff]  ;;  %v6542_v52 = vpack.c.bf16 %v3775_v7, %v3774_v11  ;;  %v8352_v12 = vld [vmem:[#allocation2 + $0x2d8] sm:$0xff] }
 0x315   : > { %5839 = vmatprep.mubr.f32.mxu1 %v2648_v0  ;;  %v3064_v11 = vld [vmem:[#allocation2 + $0x318] sm:$0xff] }
 0x316   : > { %5840 = vmatmul.mubr.f32.gmra.mrb[94].mxu1 %v2649_v35  ;;  %v8312_v35 = vld [vmem:[#allocation2 + $0x260] sm:$0xff] }
 0x317   : > { %6417 = vmatpush3.bf16.msra.mxu1 %v6416_v59  ;;  %3179 = vmatprep.mubr.f32.mxu1 %v3020_v19  ;;  %v8309_v59 = vld [vmem:[#allocation2 + $0x240] sm:$0xff]  ;;  %v8320_v19 = vld [vmem:[#allocation2 + $0x278] sm:$0xff] }
 0x318   : > { %6515 = vmatprep.subr.bf16.mxu1 %v6514_v17 }
 0x31a   : > { %3180 = vmatmul.mubr.f32.vlgmr.msra.gmra.mrb[96].mxu1 %v3019_v60  ;;  %v8328_v60 = vld [vmem:[#allocation2 + $0x290] sm:$0xff] }
 0x31b   : > { %6517 = vmatpush3.bf16.msra.mxu1 %v6516_v61  ;;  %3184 = vmatprep.mubr.f32.mxu1 %v3023_v57 }
 0x31c   : > { %6519 = vmatprep.subr.bf16.mxu1 %v6518_v30 }
 0x31e   : > { %3185 = vmatmul.mubr.f32.gmra.mrb[98].mxu1 %v3022_v6  ;;  %v8339_v6 = vld [vmem:[#allocation2 + $0x2a0] sm:$0xff] }
 0x31f   : > { %3189 = vmatprep.mubr.f32.mxu1 %v8280_v16  ;;  %6521 = vmatpush3.bf16.msra.mxu1 %v6520_v22  ;;  %v8333_v22 = vld [vmem:[#allocation2 + $0x288] sm:$0xff] }
 0x320   : > { %6523 = vmatprep.subr.bf16.mxu1 %v6522_v18  ;;  %v8336_v18 = vld [vmem:[#allocation2 + $0x2a8] sm:$0xff] }
 0x322   : > { %3190 = vmatmul.mubr.f32.gmra.mrb[100].mxu1 %v8283_v62 }
 0x323   : > { %3194 = vmatprep.mubr.f32.mxu1 %v8286_v55  ;;  %6525 = vmatpush3.bf16.msra.mxu1 %v6524_v1 }
 0x324   : > { %6527 = vmatprep.subr.bf16.mxu1 %v6526_v34 }
 0x326   : > { %3195 = vmatmul.mubr.f32.gmra.mrb[102].mxu1 %v8289_v58 }
 0x327   : > { %3199 = vmatprep.mubr.f32.mxu1 %v8292_v29  ;;  %6529 = vmatpush3.bf16.msra.mxu1 %v6528_v31 }
 0x328   : > { %6531 = vmatprep.subr.bf16.mxu1 %v6530_v9  ;;  %v3055_v9 = vld [vmem:[#allocation2 + $0x2d0] sm:$0xff] }
 0x32a   : > { %3200 = vmatmul.mubr.f32.gmra.mrb[104].mxu1 %v8295_v33 }
 0x32b   : > { %3204 = vmatprep.mubr.f32.mxu1 %v8298_v46  ;;  %6533 = vmatpush3.bf16.msra.mxu1 %v6532_v39  ;;  %v3058_v39 = vld [vmem:[#allocation2 + $0x2e8] sm:$0xff] }
 0x32c   : > { %6535 = vmatprep.subr.bf16.mxu1 %v6534_v23 }
 0x32e   : > { %3205 = vmatmul.mubr.f32.gmra.mrb[106].mxu1 %v8301_v25 }
 0x32f   : > { %3209 = vmatprep.mubr.f32.mxu1 %v8304_v44  ;;  %v5244_v51 = vpop.f32.mrb[84].mxu0  ;;  %6537 = vmatpush3.bf16.msra.mxu1 %v6536_v49 }
 0x330   : > { %v5245_v47 = vpop.f32.mrb[85].mxu0  ;;  %6539 = vmatprep.subr.bf16.mxu1 %v6538_v40  ;;  %v3065_v40 = vld [vmem:[#allocation2 + $0x320] sm:$0xff] }
 0x331   : > { %v8307_v0 = vadd.f32 %v5245_v47, %v5244_v51 }
 0x332   : > { %3210 = vmatmul.mubr.f32.gmra.mrb[108].mxu1 %v8309_v59 }
 0x333   : > { %3214 = vmatprep.mubr.f32.mxu1 %v8312_v35  ;;  %v5247_v17 = vpop.f32.mrb[86].mxu0  ;;  %6541 = vmatpush3.bf16.msra.mxu1 %v6540_v48 }
 0x334   : > { %v5248_v36 = vpop.f32.mrb[87].mxu0  ;;  %6543 = vmatprep.subr.bf16.mxu1 %v6542_v52 }
 0x335   : > { %v8315_v32 = vadd.f32 %v5248_v36, %v5247_v17 }
 0x336   : > { %3215 = vmatmul.mubr.f32.gmra.mrb[110].mxu1 %v8317_v20 }
 0x337   : > { %3219 = vmatprep.mubr.f32.mxu1 %v8320_v19  ;;  %v5250_v61 = vpop.f32.mrb[88].mxu0  ;;  %6545 = vmatpush3.bf16.msra.mxu1 %v6544_v4 }
 0x338   : > { %v5251_v30 = vpop.f32.mrb[89].mxu0 }
 0x339   : > { %v8323_v53 = vadd.f32 %v5251_v30, %v5250_v61 }
 0x33a   : > { %3220 = vmatmul.mubr.f32.gmra.mrb[112].mxu1 %v8325_v42 }
 0x33b   : > { %3224 = vmatprep.mubr.f32.mxu1 %v8328_v60  ;;  %v5253_v10 = vpop.f32.mrb[90].mxu0 }
 0x33c   : > { %v5254_v13 = vpop.f32.mrb[91].mxu0 }
 0x33d   : > { %v8331_v57 = vadd.f32 %v5254_v13, %v5253_v10  ;;  %v4147_v13 = vld [vmem:[#allocation9 + $0x8] sm:$0xff] }
 0x33e   : > { %3225 = vmatmul.mubr.f32.gmra.mrb[114].mxu1 %v8333_v22 }
 0x33f   : > { %3229 = vmatprep.mubr.f32.mxu1 %v8336_v18  ;;  %v5256_v37 = vpop.f32.mrb[92].mxu0 }
 0x340   : > { %v5257_v8 = vpop.f32.mrb[93].mxu0 }
 0x341   : > { %v8341_v26 = vadd.f32 %v5257_v8, %v5256_v37  ;;  %v4148_v8 = vld [vmem:[#allocation9 + $0x10] sm:$0xff] }
 0x342   : > { %3230 = vmatmul.mubr.f32.gmra.mrb[116].mxu1 %v8339_v6 }
 0x343   : > { %3234 = vmatprep.mubr.f32.mxu1 %v8344_v45  ;;  %v5259_v1 = vpop.f32.mrb[94].mxu0 }
 0x344   : > { %v5260_v34 = vpop.f32.mrb[95].mxu0 }
 0x345   : > { %v8349_v27 = vadd.f32 %v5260_v34, %v5259_v1  ;;  %v4150_v34 = vld [vmem:[#allocation9 + $0x20] sm:$0xff] }
 0x346   : > { %3235 = vmatmul.mubr.f32.gmra.mrb[118].mxu1 %v8347_v5 }
 0x347   : > { %3239 = vmatprep.mubr.f32.mxu1 %v8352_v12  ;;  %v5262_v56 = vpop.f32.mrb[96].mxu0 }
 0x348   : > { %v5263_v31 = vpop.f32.mrb[97].mxu0 }
 0x349   : > { %v8355_v14 = vadd.f32 %v5263_v31, %v5262_v56 }
 0x34a   : > { %3240 = vmatmul.mubr.f32.gmra.mrb[120].mxu1 %v3055_v9 }
 0x34b   : > { %3244 = vmatprep.mubr.f32.mxu1 %v3059_v63  ;;  %v5265_v54 = vpop.f32.mrb[98].mxu0 }
 0x34c   : > { %v5266_v38 = vpop.f32.mrb[99].mxu0 }
 0x34d   : > { %v8357_v23 = vadd.f32 %v5266_v38, %v5265_v54 }
 0x34e   : > { %3245 = vmatmul.mubr.f32.gmra.mrb[122].mxu1 %v3058_v39 }
 0x34f   : > { %3249 = vmatprep.mubr.f32.mxu1 %v3062_v43  ;;  %v5268_v41 = vpop.f32.mrb[100].mxu0 }
 0x350   : > { %v5269_v15 = vpop.f32.mrb[101].mxu0 }
 0x351   : > { %v8359_v49 = vadd.f32 %v5269_v15, %v5268_v41  ;;  %v4155_v41 = vld [vmem:[#allocation9 + $0x48] sm:$0xff] }
 0x352   : > { %3250 = vmatmul.mubr.f32.gmra.mrb[124].mxu1 %v3061_v50 }
 0x353   : > { %3254 = vmatprep.mubr.f32.mxu1 %v3065_v40  ;;  %v5271_v2 = vpop.f32.mrb[102].mxu0 }
 0x354   : > { %v5272_v21 = vpop.f32.mrb[103].mxu0 }
 0x355   : > { %v8361_v7 = vadd.f32 %v5272_v21, %v5271_v2  ;;  %v4158_v21 = vld [vmem:[#allocation9 + $0x60] sm:$0xff] }
 0x356   : > { %3255 = vmatmul.mubr.f32.gmra.mrb[126].mxu1 %v3064_v11 }
 0x357   : > { %3856 = vmatprep.mubr.f32.mxu1 %v8280_v16  ;;  %v5274_v51 = vpop.f32.mrb[104].mxu0 }
 0x358   : > { %v5275_v48 = vpop.f32.mrb[105].mxu0 }
 0x359   : > { %v8364_v47 = vadd.f32 %v5275_v48, %v5274_v51  ;;  %v4160_v48 = vld [vmem:[#allocation9 + $0x70] sm:$0xff] }
 0x35a   : > { %3857 = vmatmul.mubr.f32.vlgmr.msra.gmra.mrb[128].mxu1 %v8283_v62 }
 0x35b   : > { %3861 = vmatprep.mubr.f32.mxu1 %v8286_v55  ;;  %v5277_v52 = vpop.f32.mrb[106].mxu0 }
 0x35c   : > { %v5278_v24 = vpop.f32.mrb[107].mxu0 }
 0x35d   : > { %v8368_v3 = vadd.f32 %v5278_v24, %v5277_v52  ;;  %v4161_v52 = vld [vmem:[#allocation9 + $0x78] sm:$0xff] }
 0x35e   : > { %3862 = vmatmul.mubr.f32.gmra.mrb[130].mxu1 %v8289_v58  ;;  %v6606_v24 = vpack.c.bf16 %v4161_v52, %v4160_v48 }
 0x35f   : > { %3866 = vmatprep.mubr.f32.mxu1 %v8292_v29  ;;  %v5280_v17 = vpop.f32.mrb[108].mxu0 }
 0x360   : > { %v5281_v4 = vpop.f32.mrb[109].mxu0 }
 0x361   : > { %v8372_v36 = vadd.f32 %v5281_v4, %v5280_v17  ;;  %v8435_v17 = vld [vmem:[%s8796_s20] ss:$0 sm:$0xff] }
 0x362   : > { %3867 = vmatmul.mubr.f32.gmra.mrb[132].mxu1 %v8295_v33  ;;  %v8440_v4 = vld [vmem:[%s8797_s23] ss:$0 sm:$0xff]  ;;  %s7019_s23 = scalar_lea.vmem %s8700_s24, 4096 }
 0x363   : > { %3871 = vmatprep.mubr.f32.mxu1 %v8298_v46  ;;  %v5283_v16 = vpop.f32.mrb[110].mxu0  ;;  %p7020_p13 = scmp.ne.s32.totalorder %s8700_s24, %s7019_s23  ;;  %p7027_p7 = scmp.lt.s32.totalorder %s7025_s13, %s7019_s23 }
 0x364   : > { %v5284_v62 = vpop.f32.mrb[111].mxu0 }
 0x365   : > { %v8376_v61 = vadd.f32 %v5284_v62, %v5283_v16  ;;  %p7021_p6 = pnand %p7020_p13, %p7336_p10  ;;  %p7028_p9 = por %p7027_p7, %p7026_p5 }
 0x366   : > { %3872 = vmatmul.mubr.f32.gmra.mrb[134].mxu1 %v8301_v25 }
 0x367   : > { %3876 = vmatprep.mubr.f32.mxu1 %v8304_v44  ;;  %v5286_v55 = vpop.f32.mrb[112].mxu0  ;;  %p7022_p3 = pneg %p7021_p6 }
 0x368   : > { %v5287_v58 = vpop.f32.mrb[113].mxu0 }
 0x369   : > { %v8380_v30 = vadd.f32 %v5287_v58, %v5286_v55  ;;  %v4595_v58 = vld [vmem:[%s7399_s11 + $0x18] sm:$0xff]  ;;  %p7029_p0 = pnand %p7028_p9, %p7022_p3 }
 0x36a   : > { %3877 = vmatmul.mubr.f32.gmra.mrb[136].mxu1 %v8309_v59 }
 0x36b   : > { %3881 = vmatprep.mubr.f32.mxu1 %v8312_v35  ;;  %v5289_v29 = vpop.f32.mrb[114].mxu0 }
 0x36c   : > { %v5290_v33 = vpop.f32.mrb[115].mxu0 }
 0x36d   : > { %v8384_v10 = vadd.f32 %v5290_v33, %v5289_v29 }
 0x36e   : > { %3882 = vmatmul.mubr.f32.gmra.mrb[138].mxu1 %v8317_v20 }
 0x36f   : > { %3886 = vmatprep.mubr.f32.mxu1 %v8320_v19 }
 0x372   : > { %3887 = vmatmul.mubr.f32.gmra.mrb[140].mxu1 %v8325_v42 }
 0x373   : > { %3891 = vmatprep.mubr.f32.mxu1 %v8328_v60  ;;  %v4146_v60 = vld [vmem:[#allocation9] sm:$0xff] }
 0x376   : > { %3892 = vmatmul.mubr.f32.gmra.mrb[142].mxu1 %v8333_v22  ;;  %v6578_v22 = vpack.c.bf16 %v4147_v13, %v4146_v60  ;;  %v4594_v60 = vld [vmem:[%s7399_s11 + $0x10] sm:$0xff] }
 0x377   : > { %3896 = vmatprep.mubr.f32.mxu1 %v8336_v18 }
 0x378   : > { %6579 = vmatprep.subr.bf16.mxu1 %v6578_v22 }
 0x379   : > { %6581 = vmatpush3.bf16.msra.mxu1 %v6578_v22 }
 0x37a   : > { %3897 = vmatmul.mubr.f32.gmra.mrb[144].mxu1 %v8339_v6  ;;  %v4149_v6 = vld [vmem:[#allocation9 + $0x18] sm:$0xff] }
 0x37b   : > { %3901 = vmatprep.mubr.f32.mxu1 %v8344_v45 }
 0x37e   : > { %3902 = vmatmul.mubr.f32.gmra.mrb[146].mxu1 %v8347_v5  ;;  %v4151_v5 = vld [vmem:[#allocation9 + $0x28] sm:$0xff] }
 0x37f   : > { %3906 = vmatprep.mubr.f32.mxu1 %v8352_v12  ;;  %v6586_v12 = vpack.c.bf16 %v4151_v5, %v4150_v34  ;;  %v4597_v5 = vld [vmem:[%s7399_s11 + $0x28] sm:$0xff] }
 0x382   : > { %3907 = vmatmul.mubr.f32.gmra.mrb[148].mxu1 %v3055_v9  ;;  %v4152_v9 = vld [vmem:[#allocation9 + $0x30] sm:$0xff] }
 0x383   : > { %3911 = vmatprep.mubr.f32.mxu1 %v3059_v63  ;;  %v4153_v63 = vld [vmem:[#allocation9 + $0x38] sm:$0xff] }
 0x384   : > { %v6590_v54 = vpack.c.bf16 %v4153_v63, %v4152_v9 }
 0x386   : > { %3912 = vmatmul.mubr.f32.gmra.mrb[150].mxu1 %v3058_v39 }
 0x387   : > { %3916 = vmatprep.mubr.f32.mxu1 %v3062_v43  ;;  %v4154_v43 = vld [vmem:[#allocation9 + $0x40] sm:$0xff] }
 0x388   : > { %v6594_v15 = vpack.c.bf16 %v4155_v41, %v4154_v43 }
 0x38a   : > { %3917 = vmatmul.mubr.f32.gmra.mrb[152].mxu1 %v3061_v50  ;;  %v4156_v50 = vld [vmem:[#allocation9 + $0x50] sm:$0xff] }
 0x38b   : > { %3921 = vmatprep.mubr.f32.mxu1 %v3065_v40  ;;  %v4157_v40 = vld [vmem:[#allocation9 + $0x58] sm:$0xff] }
 0x38c   : > { %v6598_v2 = vpack.c.bf16 %v4157_v40, %v4156_v50 }
 0x38e   : > { %3922 = vmatmul.mubr.f32.gmra.mrb[154].mxu1 %v3064_v11  ;;  %v4159_v11 = vld [vmem:[#allocation9 + $0x68] sm:$0xff] }
 0x38f   : > { %v8396_v46 = vpop.f32.mrb[68].mxu0  ;;  %3926 = vmatprep.mubr.f32.mxu1 %v8201_v28  ;;  %v6602_v51 = vpack.c.bf16 %v4159_v11, %v4158_v21  ;;  %v4599_v11 = vld [vmem:[%s7399_s11 + $0x38] sm:$0xff] }
 0x390   : > { %v8399_v25 = vpop.f32.mrb[69].mxu0 }
 0x392   : > { %3927 = vmatmul.mubr.f32.gmra.mrb[156].mxu1 %v8201_v28 }
 0x393   : > { %v8402_v44 = vpop.f32.mrb[70].mxu0  ;;  %3931 = vmatprep.mubr.f32.mxu1 %v8201_v28 }
 0x394   : > { %v8405_v59 = vpop.f32.mrb[71].mxu0 }
 0x396   : > { %3932 = vmatmul.mubr.f32.gmra.mrb[158].mxu1 %v8201_v28  ;;  %v6582_v28 = vpack.c.bf16 %v4149_v6, %v4148_v8 }
 0x397   : > { %v8408_v35 = vpop.f32.mrb[72].mxu0 }
 0x398   : > { %v8410_v20 = vpop.f32.mrb[73].mxu0  ;;  %6583 = vmatprep.subr.bf16.mxu1 %v6582_v28 }
 0x399   : > { %6585 = vmatpush3.bf16.msra.mxu1 %v6582_v28 }
 0x39a   : > { %6587 = vmatprep.subr.bf16.mxu1 %v6586_v12 }
 0x39b   : > { %v8412_v19 = vpop.f32.mrb[74].mxu0 }
 0x39c   : > { %v8414_v42 = vpop.f32.mrb[75].mxu0 }
 0x39d   : > { %6589 = vmatpush3.bf16.msra.mxu1 %v6586_v12 }
 0x39e   : > { %6591 = vmatprep.subr.bf16.mxu1 %v6590_v54 }
 0x39f   : > { %v8416_v18 = vpop.f32.mrb[76].mxu0 }
 0x3a0   : > { %v8418_v37 = vpop.f32.mrb[77].mxu0 }
 0x3a1   : > { %6593 = vmatpush3.bf16.msra.mxu1 %v6590_v54  ;;  %v4596_v54 = vld [vmem:[%s7399_s11 + $0x20] sm:$0xff] }
 0x3a2   : > { %6595 = vmatprep.subr.bf16.mxu1 %v6594_v15 }
 0x3a3   : > { %v8420_v45 = vpop.f32.mrb[78].mxu0 }
 0x3a4   : > { %v8422_v1 = vpop.f32.mrb[79].mxu0 }
 0x3a5   : > { %6597 = vmatpush3.bf16.msra.mxu1 %v6594_v15 }
 0x3a6   : > { %6599 = vmatprep.subr.bf16.mxu1 %v6598_v2 }
 0x3a7   : > { %v8424_v56 = vpop.f32.mrb[80].mxu0 }
 0x3a8   : > { %v8426_v31 = vpop.f32.mrb[81].mxu0 }
 0x3a9   : > { %6601 = vmatpush3.bf16.msra.mxu1 %v6598_v2 }
 0x3aa   : > { %6603 = vmatprep.subr.bf16.mxu1 %v6602_v51 }
 0x3ab   : > { %v8428_v38 = vpop.f32.mrb[82].mxu0 }
 0x3ac   : > { %v8430_v39 = vpop.f32.mrb[83].mxu0 }
 0x3ad   : > { %6605 = vmatpush3.bf16.msra.mxu1 %v6602_v51 }
 0x3ae   : > { %6607 = vmatprep.subr.bf16.mxu1 %v6606_v24 }
 0x3b1   : > { %6609 = vmatpush3.bf16.msra.mxu1 %v6606_v24  ;;  %v4598_v24 = vld [vmem:[%s7399_s11 + $0x30] sm:$0xff] }
 0x3cd   : > { %v5820_v16 = vpop.f32.mrb[80].mxu1 }
 0x3ce   : > { %v2818_v62 = vmul.f32 %v5820_v16, %v8435_v17  ;;  %v2732_v55 = vpop.f32.mrb[81].mxu1 }
 0x3cf   : > { %v2817_v29 = vmul.f32 %v8435_v17, %v2732_v55 }
 0x3d0   : > { %v2840_v33 = vadd.f32 %v8440_v4, %v2818_v62 }
 0x3d1   : > { %v2839_v13 = vadd.f32 %v8440_v4, %v2817_v29  ;;  %v5823_v22 = vpop.f32.mrb[82].mxu1 }
 0x3d2   : > { %v2875_v8 = vadd.f32 %v4595_v58, %v2840_v33  ;;  %v2820_v6 = vmul.f32 %v5823_v22, %v8435_v17  ;;  %v2742_v28 = vpop.f32.mrb[83].mxu1 }
 0x3d3   : > { %v2874_v34 = vadd.f32 %v4594_v60, %v2839_v13  ;;  %v2819_v12 = vmul.f32 %v8435_v17, %v2742_v28  ;;  %v4601_v13 = vld [vmem:[%s7399_s11 + $0x48] sm:$0xff]  ;;  %v4600_v28 = vld [vmem:[%s7399_s11 + $0x40] sm:$0xff] }
 0x3d4   : > { %v2891_v9 = vmax.f32 %v2875_v8, 0.0  ;;  %v2842_v63 = vadd.f32 %v8440_v4, %v2820_v6 }
 0x3d5   : > { %v2890_v43 = vmax.f32 %v2874_v34, 0.0  ;;  %v2841_v41 = vadd.f32 %v8440_v4, %v2819_v12  ;;  %v5826_v15 = vpop.f32.mrb[84].mxu1 }
 0x3d6   : > { %2907 = vst [vmem:[%s8455_s19 + $0x8] sm:$0xff] %v2891_v9  ;;  %v2877_v50 = vadd.f32 %v4597_v5, %v2842_v63  ;;  %v2822_v40 = vmul.f32 %v5826_v15, %v8435_v17  ;;  %v2752_v2 = vpop.f32.mrb[85].mxu1 }
 0x3d7   : > { %2906 = vst [vmem:[%s8455_s19] sm:$0xff] %v2890_v43  ;;  %v2876_v21 = vadd.f32 %v4596_v54, %v2841_v41  ;;  %v2821_v51 = vmul.f32 %v8435_v17, %v2752_v2  ;;  %v4603_v41 = vld [vmem:[%s7399_s11 + $0x58] sm:$0xff]  ;;  %v4602_v2 = vld [vmem:[%s7399_s11 + $0x50] sm:$0xff] }
 0x3d8   : > { %v2893_v48 = vmax.f32 %v2877_v50, 0.0  ;;  %v2844_v52 = vadd.f32 %v8440_v4, %v2822_v40 }
 0x3d9   : > { %v2892_v16 = vmax.f32 %v2876_v21, 0.0  ;;  %v2843_v62 = vadd.f32 %v8440_v4, %v2821_v51  ;;  %v5829_v55 = vpop.f32.mrb[86].mxu1 }
 0x3da   : > { %2909 = vst [vmem:[%s8455_s19 + $0x18] sm:$0xff] %v2893_v48  ;;  %v2879_v58 = vadd.f32 %v4599_v11, %v2844_v52  ;;  %v2824_v29 = vmul.f32 %v5829_v55, %v8435_v17  ;;  %v2762_v33 = vpop.f32.mrb[87].mxu1 }
 0x3db   : > { %2908 = vst [vmem:[%s8455_s19 + $0x10] sm:$0xff] %v2892_v16  ;;  %v2878_v60 = vadd.f32 %v4598_v24, %v2843_v62  ;;  %v2823_v22 = vmul.f32 %v8435_v17, %v2762_v33  ;;  %v4605_v62 = vld [vmem:[%s7399_s11 + $0x68] sm:$0xff]  ;;  %v4604_v33 = vld [vmem:[%s7399_s11 + $0x60] sm:$0xff] }
 0x3dc   : > { %v2895_v8 = vmax.f32 %v2879_v58, 0.0  ;;  %v2846_v6 = vadd.f32 %v8440_v4, %v2824_v29 }
 0x3dd   : > { %v2894_v34 = vmax.f32 %v2878_v60, 0.0  ;;  %v2845_v5 = vadd.f32 %v8440_v4, %v2823_v22  ;;  %v5832_v12 = vpop.f32.mrb[88].mxu1 }
 0x3de   : > { %2911 = vst [vmem:[%s8455_s19 + $0x28] sm:$0xff] %v2895_v8  ;;  %v2881_v9 = vadd.f32 %v4601_v13, %v2846_v6  ;;  %v2826_v63 = vmul.f32 %v5832_v12, %v8435_v17  ;;  %v2772_v54 = vpop.f32.mrb[89].mxu1 }
 0x3df   : > { %2910 = vst [vmem:[%s8455_s19 + $0x20] sm:$0xff] %v2894_v34  ;;  %v2880_v43 = vadd.f32 %v4600_v28, %v2845_v5  ;;  %v2825_v15 = vmul.f32 %v8435_v17, %v2772_v54  ;;  %v4607_v5 = vld [vmem:[%s7399_s11 + $0x78] sm:$0xff]  ;;  %v4606_v54 = vld [vmem:[%s7399_s11 + $0x70] sm:$0xff] }
 0x3e0   : > { %v2897_v50 = vmax.f32 %v2881_v9, 0.0  ;;  %v2848_v40 = vadd.f32 %v8440_v4, %v2826_v63 }
 0x3e1   : > { %v2896_v21 = vmax.f32 %v2880_v43, 0.0  ;;  %v2847_v11 = vadd.f32 %v8440_v4, %v2825_v15  ;;  %v5835_v51 = vpop.f32.mrb[90].mxu1 }
 0x3e2   : > { %2913 = vst [vmem:[%s8455_s19 + $0x38] sm:$0xff] %v2897_v50  ;;  %v2883_v48 = vadd.f32 %v4603_v41, %v2848_v40  ;;  %v2828_v52 = vmul.f32 %v5835_v51, %v8435_v17  ;;  %v2782_v24 = vpop.f32.mrb[91].mxu1 }
 0x3e3   : > { %2912 = vst [vmem:[%s8455_s19 + $0x30] sm:$0xff] %v2896_v21  ;;  %v2882_v16 = vadd.f32 %v4602_v2, %v2847_v11  ;;  %v2827_v55 = vmul.f32 %v8435_v17, %v2782_v24  ;;  %v4609_v11 = vld [vmem:[%s7399_s11 + $0x88] sm:$0xff]  ;;  %v4608_v24 = vld [vmem:[%s7399_s11 + $0x80] sm:$0xff] }
 0x3e4   : > { %v2899_v58 = vmax.f32 %v2883_v48, 0.0  ;;  %v2850_v29 = vadd.f32 %v8440_v4, %v2828_v52 }
 0x3e5   : > { %v2898_v60 = vmax.f32 %v2882_v16, 0.0  ;;  %v2849_v13 = vadd.f32 %v8440_v4, %v2827_v55  ;;  %v5838_v22 = vpop.f32.mrb[92].mxu1 }
 0x3e6   : > { %2915 = vst [vmem:[%s8455_s19 + $0x48] sm:$0xff] %v2899_v58  ;;  %v2885_v8 = vadd.f32 %v4605_v62, %v2850_v29  ;;  %v2830_v6 = vmul.f32 %v5838_v22, %v8435_v17  ;;  %v2792_v28 = vpop.f32.mrb[93].mxu1 }
 0x3e7   : > { %2914 = vst [vmem:[%s8455_s19 + $0x40] sm:$0xff] %v2898_v60  ;;  %v2884_v34 = vadd.f32 %v4604_v33, %v2849_v13  ;;  %v2829_v12 = vmul.f32 %v8435_v17, %v2792_v28 }
 0x3e8   : > { %v2901_v9 = vmax.f32 %v2885_v8, 0.0  ;;  %v2852_v63 = vadd.f32 %v8440_v4, %v2830_v6 }
 0x3e9   : > { %v2900_v43 = vmax.f32 %v2884_v34, 0.0  ;;  %v2851_v41 = vadd.f32 %v8440_v4, %v2829_v12  ;;  %v5841_v15 = vpop.f32.mrb[94].mxu1 }
 0x3ea   : > { %2917 = vst [vmem:[%s8455_s19 + $0x58] sm:$0xff] %v2901_v9  ;;  %v2887_v50 = vadd.f32 %v4607_v5, %v2852_v63  ;;  %v2832_v40 = vmul.f32 %v5841_v15, %v8435_v17  ;;  %v2802_v2 = vpop.f32.mrb[95].mxu1 }
 0x3eb   : > { %2916 = vst [vmem:[%s8455_s19 + $0x50] sm:$0xff] %v2900_v43  ;;  %v2886_v21 = vadd.f32 %v4606_v54, %v2851_v41  ;;  %v2831_v51 = vmul.f32 %v8435_v17, %v2802_v2 }
 0x3ec   : > { %v2903_v48 = vmax.f32 %v2887_v50, 0.0  ;;  %v2854_v52 = vadd.f32 %v8440_v4, %v2832_v40 }
 0x3ed   : > { %v2902_v16 = vmax.f32 %v2886_v21, 0.0  ;;  %v2853_v62 = vadd.f32 %v8440_v4, %v2831_v51  ;;  %v5132_v55 = vpop.f32.mrb[96].mxu1 }
 0x3ee   : > { %2919 = vst [vmem:[%s8455_s19 + $0x68] sm:$0xff] %v2903_v48  ;;  %v2889_v58 = vadd.f32 %v4609_v11, %v2854_v52  ;;  %v5133_v29 = vpop.f32.mrb[97].mxu1 }
 0x3ef   : > { %2918 = vst [vmem:[%s8455_s19 + $0x60] sm:$0xff] %v2902_v16  ;;  %v2888_v33 = vadd.f32 %v4608_v24, %v2853_v62  ;;  %v5134_v60 = vadd.f32 %v5133_v29, %v5132_v55 }
 0x3f0   : > { %v2905_v13 = vmax.f32 %v2889_v58, 0.0 }
 0x3f1   : > { %v2904_v22 = vmax.f32 %v2888_v33, 0.0  ;;  %v8508_v8 = vadd.f32 %v8307_v0, %v5134_v60  ;;  %v5135_v6 = vpop.f32.mrb[98].mxu1 }
 0x3f2   : > { %2921 = vst [vmem:[%s8455_s19 + $0x78] sm:$0xff] %v2905_v13  ;;  %v5136_v28 = vpop.f32.mrb[99].mxu1 }
 0x3f3   : > { %2920 = vst [vmem:[%s8455_s19 + $0x70] sm:$0xff] %v2904_v22  ;;  %v5137_v34 = vadd.f32 %v5136_v28, %v5135_v6 }
 0x3f5   : > { %v8513_v5 = vadd.f32 %v8315_v32, %v5137_v34  ;;  %v5138_v12 = vpop.f32.mrb[100].mxu1 }
 0x3f6   : > { %v5139_v9 = vpop.f32.mrb[101].mxu1 }
 0x3f7   : > { %v5140_v63 = vadd.f32 %v5139_v9, %v5138_v12 }
 0x3f9   : > { %v8516_v54 = vadd.f32 %v8323_v53, %v5140_v63  ;;  %v5141_v43 = vpop.f32.mrb[102].mxu1 }
 0x3fa   : > { %v5142_v41 = vpop.f32.mrb[103].mxu1 }
 0x3fb   : > { %v5143_v15 = vadd.f32 %v5142_v41, %v5141_v43 }
 0x3fd   : > { %v8519_v0 = vadd.f32 %v8331_v57, %v5143_v15  ;;  %v5144_v50 = vpop.f32.mrb[104].mxu1 }
 0x3fe   : > { %v5145_v40 = vpop.f32.mrb[105].mxu1 }
 0x3ff   : > { %v5146_v2 = vadd.f32 %v5145_v40, %v5144_v50 }
 0x401   : > { %v8522_v21 = vadd.f32 %v8341_v26, %v5146_v2  ;;  %v5147_v32 = vpop.f32.mrb[106].mxu1 }
 0x402   : > { %v5148_v11 = vpop.f32.mrb[107].mxu1 }
 0x403   : > { %v5149_v51 = vadd.f32 %v5148_v11, %v5147_v32 }
 0x405   : > { %v8525_v48 = vadd.f32 %v8349_v27, %v5149_v51  ;;  %v5150_v53 = vpop.f32.mrb[108].mxu1 }
 0x406   : > { %v5151_v52 = vpop.f32.mrb[109].mxu1 }
 0x407   : > { %v5152_v24 = vadd.f32 %v5151_v52, %v5150_v53 }
 0x409   : > { %v8528_v16 = vadd.f32 %v8355_v14, %v5152_v24  ;;  %v5153_v57 = vpop.f32.mrb[110].mxu1 }
 0x40a   : > { %v5154_v62 = vpop.f32.mrb[111].mxu1 }
 0x40b   : > { %v5155_v55 = vadd.f32 %v5154_v62, %v5153_v57 }
 0x40d   : > { %v8531_v58 = vadd.f32 %v8357_v23, %v5155_v55  ;;  %v5156_v26 = vpop.f32.mrb[112].mxu1 }
 0x40e   : > { %v5157_v29 = vpop.f32.mrb[113].mxu1 }
 0x40f   : > { %v5158_v33 = vadd.f32 %v5157_v29, %v5156_v26 }
 0x411   : > { %v8534_v60 = vadd.f32 %v8359_v49, %v5158_v33  ;;  %v5159_v27 = vpop.f32.mrb[114].mxu1 }
 0x412   : > { %v5160_v13 = vpop.f32.mrb[115].mxu1 }
 0x413   : > { %v5161_v22 = vadd.f32 %v5160_v13, %v5159_v27 }
 0x415   : > { %v8537_v6 = vadd.f32 %v8361_v7, %v5161_v22  ;;  %v5162_v14 = vpop.f32.mrb[116].mxu1  ;;  %v8563_v22 = vld [vmem:[%s8756_s5] ss:$0 sm:$0xff] }
 0x416   : > { %v5163_v28 = vpop.f32.mrb[117].mxu1 }
 0x417   : > { %v5164_v34 = vadd.f32 %v5163_v28, %v5162_v14 }
 0x419   : > { %v8540_v12 = vadd.f32 %v8364_v47, %v5164_v34  ;;  %v5165_v23 = vpop.f32.mrb[118].mxu1 }
 0x41a   : > { %v5166_v9 = vpop.f32.mrb[119].mxu1 }
 0x41b   : > { %v5167_v63 = vadd.f32 %v5166_v9, %v5165_v23 }
 0x41d   : > { %v8543_v43 = vadd.f32 %v8368_v3, %v5167_v63  ;;  %v5168_v49 = vpop.f32.mrb[120].mxu1 }
 0x41e   : > { %v5169_v41 = vpop.f32.mrb[121].mxu1 }
 0x41f   : > { %v5170_v15 = vadd.f32 %v5169_v41, %v5168_v49 }
 0x421   : > { %v8546_v50 = vadd.f32 %v8372_v36, %v5170_v15  ;;  %v5171_v7 = vpop.f32.mrb[122].mxu1 }
 0x422   : > { %v5172_v40 = vpop.f32.mrb[123].mxu1 }
 0x423   : > { %v5173_v2 = vadd.f32 %v5172_v40, %v5171_v7 }
 0x425   : > { %v8549_v32 = vadd.f32 %v8376_v61, %v5173_v2  ;;  %v5174_v47 = vpop.f32.mrb[124].mxu1 }
 0x426   : > { %v5175_v11 = vpop.f32.mrb[125].mxu1 }
 0x427   : > { %v5176_v51 = vadd.f32 %v5175_v11, %v5174_v47 }
 0x429   : > { %v8552_v53 = vadd.f32 %v8380_v30, %v5176_v51  ;;  %v5177_v3 = vpop.f32.mrb[126].mxu1 }
 0x42a   : > { %v5178_v52 = vpop.f32.mrb[127].mxu1 }
 0x42b   : > { %v5179_v24 = vadd.f32 %v5178_v52, %v5177_v3 }
 0x42d   : > { %v8555_v57 = vadd.f32 %v8384_v10, %v5179_v24  ;;  %v5356_v36 = vpop.f32.mrb[128].mxu1 }
 0x42e   : > { %v5357_v62 = vpop.f32.mrb[129].mxu1 }
 0x42f   : > { %v5358_v55 = vadd.f32 %v5357_v62, %v5356_v36 }
 0x431   : > { %v6662_v26 = vadd.f32 %v8508_v8, %v5358_v55  ;;  %v5359_v29 = vpop.f32.mrb[130].mxu1  ;;  %v8570_v8 = vld [vmem:[%s8795_s27] ss:$0 sm:$0xff] }
 0x432   : > { %v5360_v61 = vpop.f32.mrb[131].mxu1 }
 0x433   : > { %v6663_v33 = vadd.f32 %v6662_v26, %v8399_v25  ;;  %v5361_v27 = vadd.f32 %v5360_v61, %v5359_v29 }
 0x435   : > { %v6659_v13 = vadd.f32 %v8513_v5, %v5361_v27  ;;  %v5362_v30 = vpop.f32.mrb[132].mxu1  ;;  %v4098_v10 = vmul.f32 %v8563_v22, %v6663_v33 }
 0x436   : > { %v5363_v14 = vpop.f32.mrb[133].mxu1 }
 0x437   : > { %v6660_v28 = vadd.f32 %v6659_v13, %v8396_v46  ;;  %v5364_v34 = vadd.f32 %v5363_v14, %v5362_v30  ;;  %v4114_v25 = vadd.f32 %v8570_v8, %v4098_v10 }
 0x439   : > { %v4099_v5 = vmul.f32 %v8563_v22, %v6660_v28  ;;  %v6668_v23 = vadd.f32 %v8516_v54, %v5364_v34  ;;  %v5365_v9 = vpop.f32.mrb[134].mxu1  ;;  %v4130_v63 = vmax.f32 %v4114_v25, 0.0 }
 0x43a   : > { %v5366_v49 = vpop.f32.mrb[135].mxu1 }
 0x43b   : > { %v4115_v41 = vadd.f32 %v8570_v8, %v4099_v5  ;;  %v6669_v15 = vadd.f32 %v6668_v23, %v8405_v59  ;;  %v5367_v46 = vadd.f32 %v5366_v49, %v5365_v9  ;;  %6042 = vmatprep.mubr.f32.mxu1 %v4130_v63 }
 0x43d   : > { %v4131_v7 = vmax.f32 %v4115_v41, 0.0  ;;  %v6665_v40 = vadd.f32 %v8519_v0, %v5367_v46  ;;  %v5368_v2 = vpop.f32.mrb[136].mxu1  ;;  %v4100_v47 = vmul.f32 %v8563_v22, %v6669_v15 }
 0x43e   : > { %v5369_v11 = vpop.f32.mrb[137].mxu1 }
 0x43f   : > { %v6666_v51 = vadd.f32 %v6665_v40, %v8402_v44  ;;  %v5370_v3 = vadd.f32 %v5369_v11, %v5368_v2  ;;  %6043 = vmatmul.mubr.f32.vlgmr.msra.gmra.mrb[160].mxu1 %v4131_v7  ;;  %v4116_v54 = vadd.f32 %v8570_v8, %v4100_v47 }
 0x441   : > { %v6674_v52 = vadd.f32 %v8522_v21, %v5370_v3  ;;  %v5371_v24 = vpop.f32.mrb[138].mxu1  ;;  %v4132_v36 = vmax.f32 %v4116_v54, 0.0  ;;  %v4101_v59 = vmul.f32 %v8563_v22, %v6666_v51 }
 0x442   : > { %v5372_v62 = vpop.f32.mrb[139].mxu1 }
 0x443   : > { %v6675_v55 = vadd.f32 %v6674_v52, %v8410_v20  ;;  %v5373_v0 = vadd.f32 %v5372_v62, %v5371_v24  ;;  %6045 = vmatprep.mubr.f32.mxu1 %v4132_v36  ;;  %v4117_v26 = vadd.f32 %v8570_v8, %v4101_v59 }
 0x445   : > { %v6671_v29 = vadd.f32 %v8525_v48, %v5373_v0  ;;  %v5374_v44 = vpop.f32.mrb[140].mxu1  ;;  %v4133_v61 = vmax.f32 %v4117_v26, 0.0  ;;  %v4102_v33 = vmul.f32 %v8563_v22, %v6675_v55 }
 0x446   : > { %v5375_v27 = vpop.f32.mrb[141].mxu1 }
 0x447   : > { %v6672_v21 = vadd.f32 %v6671_v29, %v8408_v35  ;;  %v5376_v13 = vadd.f32 %v5375_v27, %v5374_v44  ;;  %6046 = vmatmul.mubr.f32.gmra.mrb[162].mxu1 %v4133_v61  ;;  %v4118_v30 = vadd.f32 %v8570_v8, %v4102_v33 }
 0x449   : > { %v6680_v10 = vadd.f32 %v8528_v16, %v5376_v13  ;;  %v5377_v20 = vpop.f32.mrb[142].mxu1  ;;  %v4134_v14 = vmax.f32 %v4118_v30, 0.0  ;;  %v4103_v28 = vmul.f32 %v8563_v22, %v6672_v21 }
 0x44a   : > { %v5378_v34 = vpop.f32.mrb[143].mxu1 }
 0x44b   : > { %v6681_v48 = vadd.f32 %v6680_v10, %v8414_v42  ;;  %v5379_v25 = vadd.f32 %v5378_v34, %v5377_v20  ;;  %6048 = vmatprep.mubr.f32.mxu1 %v4134_v14  ;;  %v4119_v5 = vadd.f32 %v8570_v8, %v4103_v28 }
 0x44d   : > { %v6677_v23 = vadd.f32 %v8531_v58, %v5379_v25  ;;  %v5380_v35 = vpop.f32.mrb[144].mxu1  ;;  %v4135_v9 = vmax.f32 %v4119_v5, 0.0  ;;  %v4104_v63 = vmul.f32 %v8563_v22, %v6681_v48 }
 0x44e   : > { %v5381_v49 = vpop.f32.mrb[145].mxu1 }
 0x44f   : > { %v6678_v16 = vadd.f32 %v6677_v23, %v8412_v19  ;;  %v5382_v41 = vadd.f32 %v5381_v49, %v5380_v35  ;;  %6049 = vmatmul.mubr.f32.gmra.mrb[164].mxu1 %v4135_v9  ;;  %v4120_v15 = vadd.f32 %v8570_v8, %v4104_v63 }
 0x451   : > { %v6686_v46 = vadd.f32 %v8534_v60, %v5382_v41  ;;  %v5383_v42 = vpop.f32.mrb[146].mxu1  ;;  %v4136_v7 = vmax.f32 %v4120_v15, 0.0  ;;  %v4105_v40 = vmul.f32 %v8563_v22, %v6678_v16 }
 0x452   : > { %v5384_v2 = vpop.f32.mrb[147].mxu1 }
 0x453   : > { %v6687_v58 = vadd.f32 %v6686_v46, %v8418_v37  ;;  %v5385_v47 = vadd.f32 %v5384_v2, %v5383_v42  ;;  %6051 = vmatprep.mubr.f32.mxu1 %v4136_v7  ;;  %v4121_v11 = vadd.f32 %v8570_v8, %v4105_v40 }
 0x455   : > { %v6683_v51 = vadd.f32 %v8537_v6, %v5385_v47  ;;  %v5386_v19 = vpop.f32.mrb[148].mxu1  ;;  %v4137_v3 = vmax.f32 %v4121_v11, 0.0  ;;  %v4106_v54 = vmul.f32 %v8563_v22, %v6687_v58 }
 0x456   : > { %v5387_v52 = vpop.f32.mrb[149].mxu1 }
 0x457   : > { %v6684_v60 = vadd.f32 %v6683_v51, %v8416_v18  ;;  %v5388_v24 = vadd.f32 %v5387_v52, %v5386_v19  ;;  %6052 = vmatmul.mubr.f32.gmra.mrb[166].mxu1 %v4137_v3  ;;  %v4122_v36 = vadd.f32 %v8570_v8, %v4106_v54  ;;  %v4611_v19 = vld [vmem:[%s7399_s11 + $0x98] sm:$0xff]  ;;  %v4610_v54 = vld [vmem:[%s7399_s11 + $0x90] sm:$0xff] }
 0x459   : > { %v6692_v59 = vadd.f32 %v8540_v12, %v5388_v24  ;;  %v5389_v37 = vpop.f32.mrb[150].mxu1  ;;  %v4138_v62 = vmax.f32 %v4122_v36, 0.0  ;;  %v4107_v55 = vmul.f32 %v8563_v22, %v6684_v60 }
 0x45a   : > { %v5390_v0 = vpop.f32.mrb[151].mxu1 }
 0x45b   : > { %v6693_v6 = vadd.f32 %v6692_v59, %v8422_v1  ;;  %v5391_v26 = vadd.f32 %v5390_v0, %v5389_v37  ;;  %6054 = vmatprep.mubr.f32.mxu1 %v4138_v62  ;;  %v4123_v29 = vadd.f32 %v8570_v8, %v4107_v55  ;;  %v4613_v62 = vld [vmem:[%s7399_s11 + $0xa8] sm:$0xff] }
 0x45d   : > { %v6689_v44 = vadd.f32 %v8543_v43, %v5391_v26  ;;  %v5392_v18 = vpop.f32.mrb[152].mxu1  ;;  %v4139_v61 = vmax.f32 %v4123_v29, 0.0  ;;  %v4108_v33 = vmul.f32 %v8563_v22, %v6693_v6  ;;  %v4612_v6 = vld [vmem:[%s7399_s11 + $0xa0] sm:$0xff] }
 0x45e   : > { %v5393_v27 = vpop.f32.mrb[153].mxu1 }
 0x45f   : > { %v6690_v12 = vadd.f32 %v6689_v44, %v8420_v45  ;;  %v5394_v21 = vadd.f32 %v5393_v27, %v5392_v18  ;;  %6055 = vmatmul.mubr.f32.gmra.mrb[168].mxu1 %v4139_v61  ;;  %v4124_v13 = vadd.f32 %v8570_v8, %v4108_v33 }
 0x461   : > { %v6698_v30 = vadd.f32 %v8546_v50, %v5394_v21  ;;  %v5395_v1 = vpop.f32.mrb[154].mxu1  ;;  %v4140_v10 = vmax.f32 %v4124_v13, 0.0  ;;  %v4109_v20 = vmul.f32 %v8563_v22, %v6690_v12  ;;  %v4615_v21 = vld [vmem:[%s7399_s11 + $0xb8] sm:$0xff] }
 0x462   : > { %v5396_v14 = vpop.f32.mrb[155].mxu1 }
 0x463   : > { %v6699_v43 = vadd.f32 %v6698_v30, %v8426_v31  ;;  %v5397_v28 = vadd.f32 %v5396_v14, %v5395_v1  ;;  %6057 = vmatprep.mubr.f32.mxu1 %v4140_v10  ;;  %v4125_v34 = vadd.f32 %v8570_v8, %v4109_v20  ;;  %v4614_v1 = vld [vmem:[%s7399_s11 + $0xb0] sm:$0xff] }
 0x465   : > { %v6695_v48 = vadd.f32 %v8549_v32, %v5397_v28  ;;  %v5398_v45 = vpop.f32.mrb[156].mxu1  ;;  %v4141_v25 = vmax.f32 %v4125_v34, 0.0  ;;  %v4110_v5 = vmul.f32 %v8563_v22, %v6699_v43 }
 0x466   : > { %v5399_v23 = vpop.f32.mrb[157].mxu1 }
 0x467   : > { %v6696_v50 = vadd.f32 %v6695_v48, %v8424_v56  ;;  %v5400_v35 = vadd.f32 %v5399_v23, %v5398_v45  ;;  %6058 = vmatmul.mubr.f32.gmra.mrb[170].mxu1 %v4141_v25  ;;  %v4126_v9 = vadd.f32 %v8570_v8, %v4110_v5  ;;  %v4617_v25 = vld [vmem:[%s7399_s11 + $0xc8] sm:$0xff] }
 0x469   : > { %v6704_v63 = vadd.f32 %v8552_v53, %v5400_v35  ;;  %v5401_v31 = vpop.f32.mrb[158].mxu1  ;;  %v4142_v49 = vmax.f32 %v4126_v9, 0.0  ;;  %v4111_v16 = vmul.f32 %v8563_v22, %v6696_v50  ;;  %v4616_v50 = vld [vmem:[%s7399_s11 + $0xc0] sm:$0xff] }
 0x46a   : > { %v5402_v41 = vpop.f32.mrb[159].mxu1 }
 0x46b   : > { %v6705_v32 = vadd.f32 %v6704_v63, %v8430_v39  ;;  %v5403_v15 = vadd.f32 %v5402_v41, %v5401_v31  ;;  %6060 = vmatprep.mubr.f32.mxu1 %v4142_v49  ;;  %v4127_v46 = vadd.f32 %v8570_v8, %v4111_v16 }
 0x46d   : > { %v6701_v56 = vadd.f32 %v8555_v57, %v5403_v15  ;;  %v4143_v42 = vmax.f32 %v4127_v46, 0.0  ;;  %v4112_v7 = vmul.f32 %v8563_v22, %v6705_v32  ;;  %v4619_v15 = vld [vmem:[%s7399_s11 + $0xd8] sm:$0xff] }
 0x46f   : > { %v6702_v53 = vadd.f32 %v6701_v56, %v8428_v38  ;;  %6061 = vmatmul.mubr.f32.gmra.mrb[172].mxu1 %v4143_v42  ;;  %v4128_v40 = vadd.f32 %v8570_v8, %v4112_v7  ;;  %v4618_v42 = vld [vmem:[%s7399_s11 + $0xd0] sm:$0xff] }
 0x471   : > { %v4144_v2 = vmax.f32 %v4128_v40, 0.0  ;;  %v4113_v58 = vmul.f32 %v8563_v22, %v6702_v53 }
 0x473   : > { %6063 = vmatprep.mubr.f32.mxu1 %v4144_v2  ;;  %v4129_v39 = vadd.f32 %v8570_v8, %v4113_v58 }
 0x475   : > { %v4145_v47 = vmax.f32 %v4129_v39, 0.0 }
 0x477   : > { %6064 = vmatmul.mubr.f32.gmra.mrb[174].mxu1 %v4145_v47 }
 0x512   : > { %v6044_v11 = vpop.f32.mrb[160].mxu1 }
 0x513   : > { %v4308_v57 = vmul.f32 %v6044_v11, %v8435_v17  ;;  %v4228_v51 = vpop.f32.mrb[161].mxu1 }
 0x514   : > { %v4307_v38 = vmul.f32 %v8435_v17, %v4228_v51 }
 0x515   : > { %v4324_v3 = vadd.f32 %v8440_v4, %v4308_v57  ;;  %v4621_v57 = vld [vmem:[%s7399_s11 + $0xe8] sm:$0xff] }
 0x516   : > { %v4323_v22 = vadd.f32 %v8440_v4, %v4307_v38  ;;  %v4620_v38 = vld [vmem:[%s7399_s11 + $0xe0] sm:$0xff] }
 0x517   : > { %v4359_v52 = vadd.f32 %v4611_v19, %v4324_v3 }
 0x518   : > { %v4358_v8 = vadd.f32 %v4610_v54, %v4323_v22 }
 0x519   : > { %v4375_v60 = vmax.f32 %v4359_v52, 0.0 }
 0x51a   : > { %v4374_v24 = vmax.f32 %v4358_v8, 0.0  ;;  %v6047_v36 = vpop.f32.mrb[162].mxu1 }
 0x51b   : > { %4627 = vst [vmem:[%s8455_s19 + $0x88] sm:$0xff] %v4375_v60  ;;  %v4310_v59 = vmul.f32 %v6047_v36, %v8435_v17  ;;  %v4238_v37 = vpop.f32.mrb[163].mxu1 }
 0x51c   : > { %4626 = vst [vmem:[%s8455_s19 + $0x80] sm:$0xff] %v4374_v24  ;;  %v4309_v55 = vmul.f32 %v8435_v17, %v4238_v37 }
 0x51d   : > { %v4326_v0 = vadd.f32 %v8440_v4, %v4310_v59  ;;  %v4623_v59 = vld [vmem:[%s7399_s11 + $0xf8] sm:$0xff] }
 0x51e   : > { %v4325_v26 = vadd.f32 %v8440_v4, %v4309_v55  ;;  %v4622_v55 = vld [vmem:[%s7399_s11 + $0xf0] sm:$0xff] }
 0x51f   : > { %v4361_v29 = vadd.f32 %v4613_v62, %v4326_v0 }
 0x520   : > { %v4360_v44 = vadd.f32 %v4612_v6, %v4325_v26 }
 0x521   : > { %v4377_v18 = vmax.f32 %v4361_v29, 0.0 }
 0x522   : > { %v4376_v61 = vmax.f32 %v4360_v44, 0.0  ;;  %v6050_v33 = vpop.f32.mrb[164].mxu1 }
 0x523   : > { %4629 = vst [vmem:[%s8455_s19 + $0x98] sm:$0xff] %v4377_v18  ;;  %v4312_v27 = vmul.f32 %v6050_v33, %v8435_v17  ;;  %v4248_v12 = vpop.f32.mrb[165].mxu1 }
 0x524   : > { %4628 = vst [vmem:[%s8455_s19 + $0x90] sm:$0xff] %v4376_v61  ;;  %v4311_v13 = vmul.f32 %v8435_v17, %v4248_v12 }
 0x525   : > { %v4328_v30 = vadd.f32 %v8440_v4, %v4312_v27  ;;  %v4625_v27 = vld [vmem:[%s7399_s11 + $0x108] sm:$0xff] }
 0x526   : > { %v4327_v10 = vadd.f32 %v8440_v4, %v4311_v13  ;;  %v4624_v13 = vld [vmem:[%s7399_s11 + $0x100] sm:$0xff]  ;;  %s4408_s11 = scalar_lea.sflag [#allocation5], %s7395_s10 }
 0x527   : > { %v4363_v20 = vadd.f32 %v4615_v21, %v4328_v30 }
 0x528   : > { %v4362_v14 = vadd.f32 %v4614_v1, %v4327_v10 }
 0x529   : > { %v4379_v43 = vmax.f32 %v4363_v20, 0.0 }
 0x52a   : > { %v4378_v28 = vmax.f32 %v4362_v14, 0.0  ;;  %v6053_v34 = vpop.f32.mrb[166].mxu1 }
 0x52b   : > { %4631 = vst [vmem:[%s8455_s19 + $0xa8] sm:$0xff] %v4379_v43  ;;  %v4314_v48 = vmul.f32 %v6053_v34, %v8435_v17  ;;  %v4258_v45 = vpop.f32.mrb[167].mxu1 }
 0x52c   : > { %4630 = vst [vmem:[%s8455_s19 + $0xa0] sm:$0xff] %v4378_v28  ;;  %v4313_v5 = vmul.f32 %v8435_v17, %v4258_v45 }
 0x52d   : > { %v4330_v23 = vadd.f32 %v8440_v4, %v4314_v48 }
 0x52e   : > { %v4329_v35 = vadd.f32 %v8440_v4, %v4313_v5 }
 0x52f   : > { %v4365_v9 = vadd.f32 %v4617_v25, %v4330_v23 }
 0x530   : > { %v4364_v63 = vadd.f32 %v4616_v50, %v4329_v35 }
 0x531   : > { %v4381_v31 = vmax.f32 %v4365_v9, 0.0 }
 0x532   : > { %v4380_v49 = vmax.f32 %v4364_v63, 0.0  ;;  %v6056_v16 = vpop.f32.mrb[168].mxu1 }
 0x533   : > { %4633 = vst [vmem:[%s8455_s19 + $0xb8] sm:$0xff] %v4381_v31  ;;  %v4316_v41 = vmul.f32 %v6056_v16, %v8435_v17  ;;  %v4268_v32 = vpop.f32.mrb[169].mxu1 }
 0x534   : > { %4632 = vst [vmem:[%s8455_s19 + $0xb0] sm:$0xff] %v4380_v49  ;;  %v4315_v46 = vmul.f32 %v8435_v17, %v4268_v32 }
 0x535   : > { %v4332_v56 = vadd.f32 %v8440_v4, %v4316_v41 }
 0x536   : > { %v4331_v7 = vadd.f32 %v8440_v4, %v4315_v46 }
 0x537   : > { %v4367_v53 = vadd.f32 %v4619_v15, %v4332_v56 }
 0x538   : > { %v4366_v40 = vadd.f32 %v4618_v42, %v4331_v7 }
 0x539   : > { %v4383_v2 = vmax.f32 %v4367_v53, 0.0 }
 0x53a   : > { %v4382_v58 = vmax.f32 %v4366_v40, 0.0  ;;  %v6059_v39 = vpop.f32.mrb[170].mxu1 }
 0x53b   : > { %4635 = vst [vmem:[%s8455_s19 + $0xc8] sm:$0xff] %v4383_v2  ;;  %v4318_v47 = vmul.f32 %v6059_v39, %v8435_v17  ;;  %v4278_v11 = vpop.f32.mrb[171].mxu1 }
 0x53c   : > { %4634 = vst [vmem:[%s8455_s19 + $0xc0] sm:$0xff] %v4382_v58  ;;  %v4317_v51 = vmul.f32 %v8435_v17, %v4278_v11 }
 0x53d   : > { %v4334_v19 = vadd.f32 %v8440_v4, %v4318_v47 }
 0x53e   : > { %v4333_v3 = vadd.f32 %v8440_v4, %v4317_v51 }
 0x53f   : > { %v4369_v54 = vadd.f32 %v4621_v57, %v4334_v19 }
 0x540   : > { %v4368_v22 = vadd.f32 %v4620_v38, %v4333_v3 }
 0x541   : > { %v4385_v52 = vmax.f32 %v4369_v54, 0.0 }
 0x542   : > { %v4384_v8 = vmax.f32 %v4368_v22, 0.0  ;;  %v6062_v60 = vpop.f32.mrb[172].mxu1 }
 0x543   : > { %4637 = vst [vmem:[%s8455_s19 + $0xd8] sm:$0xff] %v4385_v52  ;;  %v4320_v24 = vmul.f32 %v6062_v60, %v8435_v17  ;;  %v4288_v36 = vpop.f32.mrb[173].mxu1 }
 0x544   : > { %4636 = vst [vmem:[%s8455_s19 + $0xd0] sm:$0xff] %v4384_v8  ;;  %v4319_v37 = vmul.f32 %v8435_v17, %v4288_v36 }
 0x545   : > { %v4336_v62 = vadd.f32 %v8440_v4, %v4320_v24 }
 0x546   : > { %v4335_v0 = vadd.f32 %v8440_v4, %v4319_v37 }
 0x547   : > { %v4371_v6 = vadd.f32 %v4623_v59, %v4336_v62 }
 0x548   : > { %v4370_v26 = vadd.f32 %v4622_v55, %v4335_v0 }
 0x549   : > { %v4387_v29 = vmax.f32 %v4371_v6, 0.0 }
 0x54a   : > { %v4386_v44 = vmax.f32 %v4370_v26, 0.0  ;;  %v6065_v18 = vpop.f32.mrb[174].mxu1 }
 0x54b   : > { %4639 = vst [vmem:[%s8455_s19 + $0xe8] sm:$0xff] %v4387_v29  ;;  %v4322_v61 = vmul.f32 %v6065_v18, %v8435_v17  ;;  %v4298_v33 = vpop.f32.mrb[175].mxu1 }
 0x54c   : > { %4638 = vst [vmem:[%s8455_s19 + $0xe0] sm:$0xff] %v4386_v44  ;;  %v4321_v12 = vmul.f32 %v8435_v17, %v4298_v33 }
 0x54d   : > { %v4338_v21 = vadd.f32 %v8440_v4, %v4322_v61 }
 0x54e   : > { %v4337_v30 = vadd.f32 %v8440_v4, %v4321_v12 }
 0x54f   : > { %v4373_v1 = vadd.f32 %v4625_v27, %v4338_v21 }
 0x550   : > { %v4372_v10 = vadd.f32 %v4624_v13, %v4337_v30 }
 0x551   : > { %v4389_v20 = vmax.f32 %v4373_v1, 0.0 }
 0x552   : > { %v4388_v17 = vmax.f32 %v4372_v10, 0.0 }
 0x553   : > { %4641 = vst [vmem:[%s8455_s19 + $0xf8] sm:$0xff] %v4389_v20 }
 0x554   : > { %4640 = vst [vmem:[%s8455_s19 + $0xf0] sm:$0xff] %v4388_v17 }
 0x555   : > { %7032 = shalt.err (!%p7029_p0)
}
 0x556   : > { %s7033_s19 = scalar_lea.hbm %s8698_s21, 4096  ;;  %s7037_s9 = scalar_lea.hbm %s8799_s29, 8192 }
 0x557   : > { %p7034_p4 = scmp.ne.s32.totalorder %s8698_s21, %s7033_s19  ;;  %p7038_p12 = scmp.lt.u32.totalorder %s8698_s21, %s8799_s29 }
 0x558   : > { %p7039_p1 = scmp.lt.u32.totalorder %s7037_s9, %s7033_s19  ;;  %p7041_p13 = scmp.lt.u32.totalorder %s7033_s19, %s8698_s21 }
 0x559   : > { %p7035_p2 = pnand %p7034_p4, %p7336_p10 }
 0x55a   : > { %p7040_p11 = por %p7039_p1, %p7038_p12 }
 0x55b   : > { %p7036_p8 = pneg %p7035_p2 }
 0x55c   : > { %p7042_p6 = por %p7041_p13, %p7040_p11 }
 0x55e   : > { %p7043_p3 = pnand %p7042_p6, %p7036_p8 }
 0x560   : > { %7046 = shalt.err (!%p7043_p3)
}
 0x561   : > { %s7119_s20 = smov 128   ;;  %s7120_s23 = smov 8  }
 0x562   : > { %6787 = dma.vmem_to_hbm [thread:$0]  (%p7336_p10), %s8700_s24, 4096, %s8698_s21, %s4408_s11, %s7119_s20, %s7119_s20, %s7120_s23  }
 0x563 PF: > { %s8800_s25 = sld [smem:[#allocation16_spill]]  ;;  %s8801_s26 = sld [smem:[#allocation18_spill]] }
 0x564   : > { %p8803_p7 = scmp.ge.s32.totalorder %s7109_s18, 2 }
 0x569   : > { %s4439_s13 = sand.u32 1, %s8800_s25   ;;  %p8802_p5 = scmp.ne.s32.totalorder %s8801_s26, 0 }
 0x56a   : > { %s4440_s19 = scalar_lea.sflag [#allocation5], %s4439_s13 }
 0x56b   : > { %p6804_p9 = pnand %p8803_p7, %p8802_p5 }
 0x56d   : > { %7084 = dma.done.wait (!%p6804_p9), %s4440_s19, 4096  }
 0x56e   : > { %7086 = vsyncadd (!%p6804_p9), %s4440_s19, 4294963200  ;;  %s28_s18 = sadd.s32 1, %s7109_s18   ;;  %s8804_s13 = smov %s7093_s14 }
 0x56f   : > { %p25_p0 = scmp.ge.s32.totalorder %s28_s18, 4   ;;  %s8805_s14 = smov %s7097_s15 }
 0x570   : > { %s8806_s15 = smov %s7352_s22  ;;  %s8807_s16 = smov %s7105_s17 }
 0x571   : > { %s8808_s17 = smov %s8810_s28  ;;  %27 = sbr.rel (!%p25_p0) target bundleno = 13 (0xd), region = 136 }
 0x578   :  { %4445 = vsyncpa [#allocation4], 1 }
 0x579   :  { %4447 = vsyncpa [#allocation4 + $0x1], 1 }
 0x57a   :  { %4448 = vsyncpa [#allocation7], 1 }
 0x57b   :  { %4449 = vsyncpa [#allocation10], 1 }
 0x57c   :  { %4450 = vsyncpa [#allocation5], 1 }
 0x57d   :  { %4452 = vsyncpa [#allocation5 + $0x1], 1 }

</bundles_post_ra>
